<compile_context>
chip_gen: v7x
topology: tpu7x:2x2x1
jax: 0.10.0
libtpu: 0.0.40
codegen_flags: <defaults>
</compile_context>

<pallas_src>
import functools

import jax
import jax.numpy as jnp
import numpy as np
from jax.experimental import pallas as pl
from jax.experimental.pallas import tpu as pltpu


# ---------------------------------------------------------------------------
# Fused forward kernel: one grid step == BB batch items stacked along M.
# Activation layout: rows = (image, H-row), lanes = W*C (w*C + c).
# ---------------------------------------------------------------------------
def _lenet5_fused_kernel(x_ref,
                         t1e_ref, t1o_ref, b1_ref,
                         t3e_ref, t3o_ref, b3_ref,
                         t5_ref, b5_ref,
                         w6_ref, b6_ref, w7_ref, b7_ref,
                         out_ref,
                         lhs1_scr, m1_scr, p1_scr, lhs3_scr, m3_scr, lhs5_scr):
    bb = x_ref.shape[0]
    cdt = t1e_ref.dtype                           # matmul operand dtype (bf16)

    def mm(a, b_ref):
        return jnp.dot(a, b_ref[...], preferred_element_type=jnp.float32)

    # ---- c1 (5x5, 1->6) + ReLU, W half of the 2x2 pool folded into even/odd
    #      Toeplitz weights.  im2col lanes: ki*28 + w  (K = 140).
    for ki in range(5):
        lhs1_scr[:, :, ki * 28:(ki + 1) * 28] = x_ref[:, ki:ki + 24, :]
    lhs1 = lhs1_scr[...].reshape(bb * 24, 140).astype(cdt)
    m1 = jnp.maximum(mm(lhs1, t1e_ref), mm(lhs1, t1o_ref)) + b1_ref[...]
    m1_scr[...] = jnp.maximum(m1, 0.0).reshape(bb, 24, 72)     # (BB, 24, 72) f32

    # ---- s2 H half: even/odd row (sublane) strided reads + elementwise max.
    p1_scr[...] = jnp.maximum(m1_scr[:, pl.ds(0, 12, stride=2), :],
                              m1_scr[:, pl.ds(1, 12, stride=2), :])  # (BB, 12, 72)

    # ---- c3 (5x5, 6->16) + ReLU, W pool folded.  lanes: ki*72 + w*6 + c (K=360).
    for ki in range(5):
        lhs3_scr[:, :, ki * 72:(ki + 1) * 72] = p1_scr[:, ki:ki + 8, :]
    lhs3 = lhs3_scr[...].reshape(bb * 8, 360).astype(cdt)
    m3 = jnp.maximum(mm(lhs3, t3e_ref), mm(lhs3, t3o_ref)) + b3_ref[...]
    m3_scr[...] = jnp.maximum(m3, 0.0).reshape(bb, 8, 64)      # (BB, 8, 64) f32

    # ---- s4 H half + c5 (4x4, 16->120) as one full contraction (K = 256).
    for ki in range(4):
        lhs5_scr[:, ki * 64:(ki + 1) * 64] = jnp.maximum(m3_scr[:, 2 * ki, :],
                                                         m3_scr[:, 2 * ki + 1, :])
    f5 = jnp.maximum(mm(lhs5_scr[...].astype(cdt), t5_ref) + b5_ref[...], 0.0)  # (BB,120)

    # ---- f6 + ReLU, f7 + numerically stable log-softmax.
    h6 = jnp.maximum(mm(f5.astype(cdt), w6_ref) + b6_ref[...], 0.0)             # (BB, 84)
    logits = mm(h6.astype(cdt), w7_ref) + b7_ref[...]                           # (BB, 10)
    z = logits - jnp.max(logits, axis=-1, keepdims=True)
    out_ref[...] = z - jnp.log(jnp.sum(jnp.exp(z), axis=-1, keepdims=True))


# ---------------------------------------------------------------------------
# One-time weight preprocessing (hoisted out of the per-step forward).
# ---------------------------------------------------------------------------
def prepare_params(params, compute_dtype=jnp.bfloat16):
    w1 = np.asarray(params["c1_w"], np.float32)   # (6,1,5,5)
    b1 = np.asarray(params["c1_b"], np.float32)
    w3 = np.asarray(params["c3_w"], np.float32)   # (16,6,5,5)
    b3 = np.asarray(params["c3_b"], np.float32)
    w5 = np.asarray(params["c5_w"], np.float32)   # (120,16,4,4)
    b5 = np.asarray(params["c5_b"], np.float32)
    w6 = np.asarray(params["f6_w"], np.float32)   # (84,120)
    b6 = np.asarray(params["f6_b"], np.float32)
    w7 = np.asarray(params["f7_w"], np.float32)   # (10,84)
    b7 = np.asarray(params["f7_b"], np.float32)

    # c1 Toeplitz with even/odd W-pool output columns folded in:
    #   t1e[ki*28 + w, j2*6 + o] = w1[o, 0, ki, w - 2*j2]
    #   t1o[ki*28 + w, j2*6 + o] = w1[o, 0, ki, w - (2*j2 + 1)]
    t1e = np.zeros((5, 28, 12 * 6), np.float32)
    t1o = np.zeros((5, 28, 12 * 6), np.float32)
    for ki in range(5):
        for j2 in range(12):
            for kj in range(5):
                t1e[ki, 2 * j2 + kj,     j2 * 6:(j2 + 1) * 6] = w1[:, 0, ki, kj]
                t1o[ki, 2 * j2 + 1 + kj, j2 * 6:(j2 + 1) * 6] = w1[:, 0, ki, kj]

    # c3 Toeplitz, even/odd W-pool columns folded:
    #   rows: ki*72 + w*6 + c ; cols: j2*16 + o
    t3e = np.zeros((5, 12, 6, 4 * 16), np.float32)
    t3o = np.zeros((5, 12, 6, 4 * 16), np.float32)
    for ki in range(5):
        for j2 in range(4):
            for kj in range(5):
                for c in range(6):
                    t3e[ki, 2 * j2 + kj,     c, j2 * 16:(j2 + 1) * 16] = w3[:, c, ki, kj]
                    t3o[ki, 2 * j2 + 1 + kj, c, j2 * 16:(j2 + 1) * 16] = w3[:, c, ki, kj]

    # c5 full contraction: rows ki*64 + kj*16 + c ; cols o5.
    t5 = np.ascontiguousarray(np.transpose(w5, (2, 3, 1, 0))).reshape(256, 120)

    prep = {
        "t1e": t1e.reshape(140, 72), "t1o": t1o.reshape(140, 72),
        "b1": np.tile(b1, 12).reshape(1, 72),
        "t3e": t3e.reshape(360, 64), "t3o": t3o.reshape(360, 64),
        "b3": np.tile(b3, 4).reshape(1, 64),
        "t5": t5,
        "b5": b5.reshape(1, 120),
        "w6": np.ascontiguousarray(w6.T),   # (120, 84)
        "b6": b6.reshape(1, 84),
        "w7": np.ascontiguousarray(w7.T),   # (84, 10)
        "b7": b7.reshape(1, 10),
    }
    bias_keys = {"b1", "b3", "b5", "b6", "b7"}
    return {k: jnp.asarray(v, jnp.float32 if k in bias_keys else compute_dtype)
            for k, v in prep.items()}


_KEYS = ("t1e", "t1o", "b1", "t3e", "t3o", "b3", "t5", "b5", "w6", "b6", "w7", "b7")


# ---------------------------------------------------------------------------
# Forward: a single pallas_call over batch blocks.
# ---------------------------------------------------------------------------
def lenet5_forward(x, prep, block_b=64):
    """x: (B, 1, 28, 28) NCHW.  Returns (B, 10) log-probabilities."""
    B = x.shape[0]
    assert x.shape[1:] == (1, 28, 28), "this LeNet5 head requires 1x28x28 inputs"
    x3 = x.reshape(B, 28, 28).astype(jnp.float32)

    bb = int(min(block_b, B))
    n_blocks = -(-B // bb)
    b_pad = n_blocks * bb
    if b_pad != B:
        x3 = jnp.pad(x3, ((0, b_pad - B), (0, 0), (0, 0)))

    weights = [prep[k] for k in _KEYS]
    adt = jnp.float32                       # activation scratch / accumulation dtype
    in_specs = [pl.BlockSpec((bb, 28, 28), lambda b: (b, 0, 0))]
    in_specs += [pl.BlockSpec(w.shape, lambda b: (0, 0)) for w in weights]

    out = pl.pallas_call(
        _lenet5_fused_kernel,
        out_shape=jax.ShapeDtypeStruct((b_pad, 10), jnp.float32),
        grid=(n_blocks,),
        in_specs=in_specs,
        out_specs=pl.BlockSpec((bb, 10), lambda b: (b, 0)),
        scratch_shapes=[
            pltpu.VMEM((bb, 24, 140), adt),   # c1 im2col (K=140)
            pltpu.VMEM((bb, 24, 72), adt),    # c1 out, W-pooled, pre H-pool
            pltpu.VMEM((bb, 12, 72), adt),    # pool-1 output
            pltpu.VMEM((bb, 8, 360), adt),    # c3 im2col (K=360)
            pltpu.VMEM((bb, 8, 64), adt),     # c3 out, W-pooled, pre H-pool
            pltpu.VMEM((bb, 256), adt),       # c5 im2col (pool-2 folded, K=256)
        ],
        compiler_params=pltpu.CompilerParams(
            dimension_semantics=("parallel",)),
    )(x3, *weights)
    return out[:B]


# ---------------------------------------------------------------------------
# Plain-JAX reference (mirrors the PyTorch module) for correctness checking.
# ---------------------------------------------------------------------------
def lenet5_reference(x, params):
    def conv(z, w, b):
        y = jax.lax.conv_general_dilated(
            z, w, window_strides=(1, 1), padding="VALID",
            dimension_numbers=("NCHW", "OIHW", "NCHW"))
        return jax.nn.relu(y + b.reshape(1, -1, 1, 1))

    def pool(z):
        Bz, C, H, W = z.shape
        return z.reshape(Bz, C, H // 2, 2, W // 2, 2).max(axis=(3, 5))

    y = pool(conv(x, params["c1_w"], params["c1_b"]))
    y = pool(conv(y, params["c3_w"], params["c3_b"]))
    y = conv(y, params["c5_w"], params["c5_b"])
    y = y.reshape(x.shape[0], -1)
    y = jax.nn.relu(y @ params["f6_w"].T + params["f6_b"])
    y = y @ params["f7_w"].T + params["f7_b"]
    return jax.nn.log_softmax(y, axis=-1)


def init_params(key):
    """Deterministic init matching nn.Conv2d / nn.Linear default shapes."""
    ks = jax.random.split(key, 10)

    def u(k, shape, fan_in):
        bound = 1.0 / jnp.sqrt(float(fan_in))
        return jax.random.uniform(k, shape, jnp.float32, -bound, bound)

    return {
        "c1_w": u(ks[0], (6, 1, 5, 5), 1 * 5 * 5),
        "c1_b": u(ks[1], (6,), 1 * 5 * 5),
        "c3_w": u(ks[2], (16, 6, 5, 5), 6 * 5 * 5),
        "c3_b": u(ks[3], (16,), 6 * 5 * 5),
        "c5_w": u(ks[4], (120, 16, 4, 4), 16 * 4 * 4),
        "c5_b": u(ks[5], (120,), 16 * 4 * 4),
        "f6_w": u(ks[6], (84, 120), 120),   # PyTorch Linear weight: (out, in)
        "f6_b": u(ks[7], (84,), 120),
        "f7_w": u(ks[8], (10, 84), 84),
        "f7_b": u(ks[9], (10,), 84),
    }


if __name__ == "__main__":
    key = jax.random.PRNGKey(0)
    kp, kx = jax.random.split(key)
    params = init_params(kp)
    prep = prepare_params(params)          # hoisted, one-time weight prep
    # Small demo: B=12 with block_b=8 exercises batch blocking, a 2-step grid
    # and the batch-padding path.
    x = jax.random.normal(kx, (12, 1, 28, 28), jnp.float32)

    fwd = jax.jit(functools.partial(lenet5_forward, block_b=8))
    out = jax.block_until_ready(fwd(x, prep))
    assert out.shape == (12, 10)
    assert bool(jnp.all(jnp.isfinite(out)))

    ref = jax.block_until_ready(lenet5_reference(x, params))
    max_diff = float(jnp.max(jnp.abs(out - ref)))
    assert bool(jnp.allclose(out, ref, atol=5e-2, rtol=5e-2)), f"max diff {max_diff}"
    print("KERNEL_OK")
</pallas_src>

<mosaic_0001>
module attributes {stable_mosaic.version = 11 : i64} {
  func.func @_lenet5_fused_kernel(%arg0: i32, %arg1: memref<8x28x28xf32, #tpu.memory_space<vmem>>, %arg2: memref<140x72xbf16, #tpu.memory_space<vmem>>, %arg3: memref<140x72xbf16, #tpu.memory_space<vmem>>, %arg4: memref<1x72xf32, #tpu.memory_space<vmem>>, %arg5: memref<360x64xbf16, #tpu.memory_space<vmem>>, %arg6: memref<360x64xbf16, #tpu.memory_space<vmem>>, %arg7: memref<1x64xf32, #tpu.memory_space<vmem>>, %arg8: memref<256x120xbf16, #tpu.memory_space<vmem>>, %arg9: memref<1x120xf32, #tpu.memory_space<vmem>>, %arg10: memref<120x84xbf16, #tpu.memory_space<vmem>>, %arg11: memref<1x84xf32, #tpu.memory_space<vmem>>, %arg12: memref<84x10xbf16, #tpu.memory_space<vmem>>, %arg13: memref<1x10xf32, #tpu.memory_space<vmem>>, %arg14: memref<8x10xf32, #tpu.memory_space<vmem>>, %arg15: memref<8x24x140xf32, #tpu.memory_space<vmem>>, %arg16: memref<8x24x72xf32, #tpu.memory_space<vmem>>, %arg17: memref<8x12x72xf32, #tpu.memory_space<vmem>>, %arg18: memref<8x8x360xf32, #tpu.memory_space<vmem>>, %arg19: memref<8x8x64xf32, #tpu.memory_space<vmem>>, %arg20: memref<8x256xf32, #tpu.memory_space<vmem>>) attributes {dimension_semantics = [#tpu.dimension_semantics<parallel>], iteration_bounds = array<i64: 2>, scalar_prefetch = 0 : i64, scratch_operands = 6 : i64, tpu.core_type = #tpu.core_type<tc>, window_params = [{transform_indices = @transform_0, window_bounds = array<i64: 8, 28, 28>}, {pipeline_mode = #tpu.pipeline_mode<synchronous>, transform_indices = @transform_1, window_bounds = array<i64: 140, 72>}, {pipeline_mode = #tpu.pipeline_mode<synchronous>, transform_indices = @transform_2, window_bounds = array<i64: 140, 72>}, {pipeline_mode = #tpu.pipeline_mode<synchronous>, transform_indices = @transform_3, window_bounds = array<i64: 1, 72>}, {pipeline_mode = #tpu.pipeline_mode<synchronous>, transform_indices = @transform_4, window_bounds = array<i64: 360, 64>}, {pipeline_mode = #tpu.pipeline_mode<synchronous>, transform_indices = @transform_5, window_bounds = array<i64: 360, 64>}, {pipeline_mode = #tpu.pipeline_mode<synchronous>, transform_indices = @transform_6, window_bounds = array<i64: 1, 64>}, {pipeline_mode = #tpu.pipeline_mode<synchronous>, transform_indices = @transform_7, window_bounds = array<i64: 256, 120>}, {pipeline_mode = #tpu.pipeline_mode<synchronous>, transform_indices = @transform_8, window_bounds = array<i64: 1, 120>}, {pipeline_mode = #tpu.pipeline_mode<synchronous>, transform_indices = @transform_9, window_bounds = array<i64: 120, 84>}, {pipeline_mode = #tpu.pipeline_mode<synchronous>, transform_indices = @transform_10, window_bounds = array<i64: 1, 84>}, {pipeline_mode = #tpu.pipeline_mode<synchronous>, transform_indices = @transform_11, window_bounds = array<i64: 84, 10>}, {pipeline_mode = #tpu.pipeline_mode<synchronous>, transform_indices = @transform_12, window_bounds = array<i64: 1, 10>}, {transform_indices = @transform_13, window_bounds = array<i64: 8, 10>}]} {
    %c0 = arith.constant 0 : index
    %c0_0 = arith.constant 0 : index
    %c0_1 = arith.constant 0 : index
    %0 = vector.load %arg1[%c0, %c0_0, %c0_1] : memref<8x28x28xf32, #tpu.memory_space<vmem>>, vector<8x24x28xf32>
    %c0_2 = arith.constant 0 : index
    %c0_3 = arith.constant 0 : index
    %c0_4 = arith.constant 0 : index
    %1 = vector.load %arg15[%c0_2, %c0_3, %c0_4] : memref<8x24x140xf32, #tpu.memory_space<vmem>>, vector<8x24x28xf32>
    tpu.vector_store %arg15[%c0_2, %c0_3, %c0_4], %0 {strides = array<i32>} : memref<8x24x140xf32, #tpu.memory_space<vmem>>, vector<8x24x28xf32>,
    %c0_5 = arith.constant 0 : index
    %c1 = arith.constant 1 : index
    %c0_6 = arith.constant 0 : index
    %2 = vector.load %arg1[%c0_5, %c1, %c0_6] : memref<8x28x28xf32, #tpu.memory_space<vmem>>, vector<8x24x28xf32>
    %c0_7 = arith.constant 0 : index
    %c0_8 = arith.constant 0 : index
    %c28 = arith.constant 28 : index
    %3 = vector.load %arg15[%c0_7, %c0_8, %c28] : memref<8x24x140xf32, #tpu.memory_space<vmem>>, vector<8x24x28xf32>
    tpu.vector_store %arg15[%c0_7, %c0_8, %c28], %2 {strides = array<i32>} : memref<8x24x140xf32, #tpu.memory_space<vmem>>, vector<8x24x28xf32>,
    %c0_9 = arith.constant 0 : index
    %c2 = arith.constant 2 : index
    %c0_10 = arith.constant 0 : index
    %4 = vector.load %arg1[%c0_9, %c2, %c0_10] : memref<8x28x28xf32, #tpu.memory_space<vmem>>, vector<8x24x28xf32>
    %c0_11 = arith.constant 0 : index
    %c0_12 = arith.constant 0 : index
    %c56 = arith.constant 56 : index
    %5 = vector.load %arg15[%c0_11, %c0_12, %c56] : memref<8x24x140xf32, #tpu.memory_space<vmem>>, vector<8x24x28xf32>
    tpu.vector_store %arg15[%c0_11, %c0_12, %c56], %4 {strides = array<i32>} : memref<8x24x140xf32, #tpu.memory_space<vmem>>, vector<8x24x28xf32>,
    %c0_13 = arith.constant 0 : index
    %c3 = arith.constant 3 : index
    %c0_14 = arith.constant 0 : index
    %6 = vector.load %arg1[%c0_13, %c3, %c0_14] : memref<8x28x28xf32, #tpu.memory_space<vmem>>, vector<8x24x28xf32>
    %c0_15 = arith.constant 0 : index
    %c0_16 = arith.constant 0 : index
    %c84 = arith.constant 84 : index
    %7 = vector.load %arg15[%c0_15, %c0_16, %c84] : memref<8x24x140xf32, #tpu.memory_space<vmem>>, vector<8x24x28xf32>
    tpu.vector_store %arg15[%c0_15, %c0_16, %c84], %6 {strides = array<i32>} : memref<8x24x140xf32, #tpu.memory_space<vmem>>, vector<8x24x28xf32>,
    %c0_17 = arith.constant 0 : index
    %c4 = arith.constant 4 : index
    %c0_18 = arith.constant 0 : index
    %8 = vector.load %arg1[%c0_17, %c4, %c0_18] : memref<8x28x28xf32, #tpu.memory_space<vmem>>, vector<8x24x28xf32>
    %c0_19 = arith.constant 0 : index
    %c0_20 = arith.constant 0 : index
    %c112 = arith.constant 112 : index
    %9 = vector.load %arg15[%c0_19, %c0_20, %c112] : memref<8x24x140xf32, #tpu.memory_space<vmem>>, vector<8x24x28xf32>
    tpu.vector_store %arg15[%c0_19, %c0_20, %c112], %8 {strides = array<i32>} : memref<8x24x140xf32, #tpu.memory_space<vmem>>, vector<8x24x28xf32>,
    %c0_21 = arith.constant 0 : index
    %c0_22 = arith.constant 0 : index
    %c0_23 = arith.constant 0 : index
    %10 = vector.load %arg15[%c0_21, %c0_22, %c0_23] : memref<8x24x140xf32, #tpu.memory_space<vmem>>, vector<8x24x140xf32>
    %11 = vector.shape_cast %10 : vector<8x24x140xf32> to vector<192x140xf32>
    %12 = arith.truncf %11 : vector<192x140xf32> to vector<192x140xbf16>
    %c0_24 = arith.constant 0 : index
    %c0_25 = arith.constant 0 : index
    %13 = vector.load %arg2[%c0_24, %c0_25] : memref<140x72xbf16, #tpu.memory_space<vmem>>, vector<140x72xbf16>
    %cst = arith.constant dense<0.000000e+00> : vector<192x72xf32>
    %14 = tpu.matmul %12, %13, %cst {dimension_numbers = #tpu.dot_dimension_numbers<[1], [0], [0], [1], [0, 0, 1, 1], [], []>} : vector<192x140xbf16>, vector<140x72xbf16>, vector<192x72xf32> -> vector<192x72xf32>
    %c0_26 = arith.constant 0 : index
    %c0_27 = arith.constant 0 : index
    %15 = vector.load %arg3[%c0_26, %c0_27] : memref<140x72xbf16, #tpu.memory_space<vmem>>, vector<140x72xbf16>
    %cst_28 = arith.constant dense<0.000000e+00> : vector<192x72xf32>
    %16 = tpu.matmul %12, %15, %cst_28 {dimension_numbers = #tpu.dot_dimension_numbers<[1], [0], [0], [1], [0, 0, 1, 1], [], []>} : vector<192x140xbf16>, vector<140x72xbf16>, vector<192x72xf32> -> vector<192x72xf32>
    %17 = arith.maximumf %14, %16 : vector<192x72xf32>
    %c0_29 = arith.constant 0 : index
    %c0_30 = arith.constant 0 : index
    %18 = vector.load %arg4[%c0_29, %c0_30] : memref<1x72xf32, #tpu.memory_space<vmem>>, vector<1x72xf32>
    %19 = vector.broadcast %18 : vector<1x72xf32> to vector<192x72xf32>
    %20 = arith.addf %17, %19 : vector<192x72xf32>
    %cst_31 = arith.constant 0.000000e+00 : f32
    %21 = vector.broadcast %cst_31 : f32 to vector<192x72xf32>
    %22 = arith.maximumf %20, %21 : vector<192x72xf32>
    %23 = vector.shape_cast %22 : vector<192x72xf32> to vector<8x24x72xf32>
    %c0_32 = arith.constant 0 : index
    %c0_33 = arith.constant 0 : index
    %c0_34 = arith.constant 0 : index
    %24 = vector.load %arg16[%c0_32, %c0_33, %c0_34] : memref<8x24x72xf32, #tpu.memory_space<vmem>>, vector<8x24x72xf32>
    tpu.vector_store %arg16[%c0_32, %c0_33, %c0_34], %23 {strides = array<i32>} : memref<8x24x72xf32, #tpu.memory_space<vmem>>, vector<8x24x72xf32>,
    %c0_35 = arith.constant 0 : index
    %c0_36 = arith.constant 0 : index
    %c0_37 = arith.constant 0 : index
    %25 = tpu.strided_load %arg16[%c0_35, %c0_36, %c0_37] {strides = array<i32: 1, 2, 1>} : memref<8x24x72xf32, #tpu.memory_space<vmem>>, vector<8x12x72xf32>
    %c0_38 = arith.constant 0 : index
    %c1_39 = arith.constant 1 : index
    %c0_40 = arith.constant 0 : index
    %26 = tpu.strided_load %arg16[%c0_38, %c1_39, %c0_40] {strides = array<i32: 1, 2, 1>} : memref<8x24x72xf32, #tpu.memory_space<vmem>>, vector<8x12x72xf32>
    %27 = arith.maximumf %25, %26 : vector<8x12x72xf32>
    %c0_41 = arith.constant 0 : index
    %c0_42 = arith.constant 0 : index
    %c0_43 = arith.constant 0 : index
    %28 = vector.load %arg17[%c0_41, %c0_42, %c0_43] : memref<8x12x72xf32, #tpu.memory_space<vmem>>, vector<8x12x72xf32>
    tpu.vector_store %arg17[%c0_41, %c0_42, %c0_43], %27 {strides = array<i32>} : memref<8x12x72xf32, #tpu.memory_space<vmem>>, vector<8x12x72xf32>,
    %c0_44 = arith.constant 0 : index
    %c0_45 = arith.constant 0 : index
    %c0_46 = arith.constant 0 : index
    %29 = vector.load %arg17[%c0_44, %c0_45, %c0_46] : memref<8x12x72xf32, #tpu.memory_space<vmem>>, vector<8x8x72xf32>
    %c0_47 = arith.constant 0 : index
    %c0_48 = arith.constant 0 : index
    %c0_49 = arith.constant 0 : index
    %30 = vector.load %arg18[%c0_47, %c0_48, %c0_49] : memref<8x8x360xf32, #tpu.memory_space<vmem>>, vector<8x8x72xf32>
    tpu.vector_store %arg18[%c0_47, %c0_48, %c0_49], %29 {strides = array<i32>} : memref<8x8x360xf32, #tpu.memory_space<vmem>>, vector<8x8x72xf32>,
    %c0_50 = arith.constant 0 : index
    %c1_51 = arith.constant 1 : index
    %c0_52 = arith.constant 0 : index
    %31 = vector.load %arg17[%c0_50, %c1_51, %c0_52] : memref<8x12x72xf32, #tpu.memory_space<vmem>>, vector<8x8x72xf32>
    %c0_53 = arith.constant 0 : index
    %c0_54 = arith.constant 0 : index
    %c72 = arith.constant 72 : index
    %32 = vector.load %arg18[%c0_53, %c0_54, %c72] : memref<8x8x360xf32, #tpu.memory_space<vmem>>, vector<8x8x72xf32>
    tpu.vector_store %arg18[%c0_53, %c0_54, %c72], %31 {strides = array<i32>} : memref<8x8x360xf32, #tpu.memory_space<vmem>>, vector<8x8x72xf32>,
    %c0_55 = arith.constant 0 : index
    %c2_56 = arith.constant 2 : index
    %c0_57 = arith.constant 0 : index
    %33 = vector.load %arg17[%c0_55, %c2_56, %c0_57] : memref<8x12x72xf32, #tpu.memory_space<vmem>>, vector<8x8x72xf32>
    %c0_58 = arith.constant 0 : index
    %c0_59 = arith.constant 0 : index
    %c144 = arith.constant 144 : index
    %34 = vector.load %arg18[%c0_58, %c0_59, %c144] : memref<8x8x360xf32, #tpu.memory_space<vmem>>, vector<8x8x72xf32>
    tpu.vector_store %arg18[%c0_58, %c0_59, %c144], %33 {strides = array<i32>} : memref<8x8x360xf32, #tpu.memory_space<vmem>>, vector<8x8x72xf32>,
    %c0_60 = arith.constant 0 : index
    %c3_61 = arith.constant 3 : index
    %c0_62 = arith.constant 0 : index
    %35 = vector.load %arg17[%c0_60, %c3_61, %c0_62] : memref<8x12x72xf32, #tpu.memory_space<vmem>>, vector<8x8x72xf32>
    %c0_63 = arith.constant 0 : index
    %c0_64 = arith.constant 0 : index
    %c216 = arith.constant 216 : index
    %36 = vector.load %arg18[%c0_63, %c0_64, %c216] : memref<8x8x360xf32, #tpu.memory_space<vmem>>, vector<8x8x72xf32>
    tpu.vector_store %arg18[%c0_63, %c0_64, %c216], %35 {strides = array<i32>} : memref<8x8x360xf32, #tpu.memory_space<vmem>>, vector<8x8x72xf32>,
    %c0_65 = arith.constant 0 : index
    %c4_66 = arith.constant 4 : index
    %c0_67 = arith.constant 0 : index
    %37 = vector.load %arg17[%c0_65, %c4_66, %c0_67] : memref<8x12x72xf32, #tpu.memory_space<vmem>>, vector<8x8x72xf32>
    %c0_68 = arith.constant 0 : index
    %c0_69 = arith.constant 0 : index
    %c288 = arith.constant 288 : index
    %38 = vector.load %arg18[%c0_68, %c0_69, %c288] : memref<8x8x360xf32, #tpu.memory_space<vmem>>, vector<8x8x72xf32>
    tpu.vector_store %arg18[%c0_68, %c0_69, %c288], %37 {strides = array<i32>} : memref<8x8x360xf32, #tpu.memory_space<vmem>>, vector<8x8x72xf32>,
    %c0_70 = arith.constant 0 : index
    %c0_71 = arith.constant 0 : index
    %c0_72 = arith.constant 0 : index
    %39 = vector.load %arg18[%c0_70, %c0_71, %c0_72] : memref<8x8x360xf32, #tpu.memory_space<vmem>>, vector<8x8x360xf32>
    %40 = vector.shape_cast %39 : vector<8x8x360xf32> to vector<64x360xf32>
    %41 = arith.truncf %40 : vector<64x360xf32> to vector<64x360xbf16>
    %c0_73 = arith.constant 0 : index
    %c0_74 = arith.constant 0 : index
    %42 = vector.load %arg5[%c0_73, %c0_74] : memref<360x64xbf16, #tpu.memory_space<vmem>>, vector<360x64xbf16>
    %cst_75 = arith.constant dense<0.000000e+00> : vector<64x64xf32>
    %43 = tpu.matmul %41, %42, %cst_75 {dimension_numbers = #tpu.dot_dimension_numbers<[1], [0], [0], [1], [0, 0, 1, 1], [], []>} : vector<64x360xbf16>, vector<360x64xbf16>, vector<64x64xf32> -> vector<64x64xf32>
    %c0_76 = arith.constant 0 : index
    %c0_77 = arith.constant 0 : index
    %44 = vector.load %arg6[%c0_76, %c0_77] : memref<360x64xbf16, #tpu.memory_space<vmem>>, vector<360x64xbf16>
    %cst_78 = arith.constant dense<0.000000e+00> : vector<64x64xf32>
    %45 = tpu.matmul %41, %44, %cst_78 {dimension_numbers = #tpu.dot_dimension_numbers<[1], [0], [0], [1], [0, 0, 1, 1], [], []>} : vector<64x360xbf16>, vector<360x64xbf16>, vector<64x64xf32> -> vector<64x64xf32>
    %46 = arith.maximumf %43, %45 : vector<64x64xf32>
    %c0_79 = arith.constant 0 : index
    %c0_80 = arith.constant 0 : index
    %47 = vector.load %arg7[%c0_79, %c0_80] : memref<1x64xf32, #tpu.memory_space<vmem>>, vector<1x64xf32>
    %48 = vector.broadcast %47 : vector<1x64xf32> to vector<64x64xf32>
    %49 = arith.addf %46, %48 : vector<64x64xf32>
    %cst_81 = arith.constant 0.000000e+00 : f32
    %50 = vector.broadcast %cst_81 : f32 to vector<64x64xf32>
    %51 = arith.maximumf %49, %50 : vector<64x64xf32>
    %52 = vector.shape_cast %51 : vector<64x64xf32> to vector<8x8x64xf32>
    %c0_82 = arith.constant 0 : index
    %c0_83 = arith.constant 0 : index
    %c0_84 = arith.constant 0 : index
    %53 = vector.load %arg19[%c0_82, %c0_83, %c0_84] : memref<8x8x64xf32, #tpu.memory_space<vmem>>, vector<8x8x64xf32>
    tpu.vector_store %arg19[%c0_82, %c0_83, %c0_84], %52 {strides = array<i32>} : memref<8x8x64xf32, #tpu.memory_space<vmem>>, vector<8x8x64xf32>,
    %c0_85 = arith.constant 0 : index
    %c0_86 = arith.constant 0 : index
    %c0_87 = arith.constant 0 : index
    %54 = vector.load %arg19[%c0_85, %c0_86, %c0_87] : memref<8x8x64xf32, #tpu.memory_space<vmem>>, vector<8x1x64xf32>
    %55 = vector.shape_cast %54 : vector<8x1x64xf32> to vector<8x64xf32>
    %c0_88 = arith.constant 0 : index
    %c1_89 = arith.constant 1 : index
    %c0_90 = arith.constant 0 : index
    %56 = vector.load %arg19[%c0_88, %c1_89, %c0_90] : memref<8x8x64xf32, #tpu.memory_space<vmem>>, vector<8x1x64xf32>
    %57 = vector.shape_cast %56 : vector<8x1x64xf32> to vector<8x64xf32>
    %58 = arith.maximumf %55, %57 : vector<8x64xf32>
    %c0_91 = arith.constant 0 : index
    %c0_92 = arith.constant 0 : index
    %59 = vector.load %arg20[%c0_91, %c0_92] : memref<8x256xf32, #tpu.memory_space<vmem>>, vector<8x64xf32>
    tpu.vector_store %arg20[%c0_91, %c0_92], %58 {strides = array<i32>} : memref<8x256xf32, #tpu.memory_space<vmem>>, vector<8x64xf32>,
    %c0_93 = arith.constant 0 : index
    %c2_94 = arith.constant 2 : index
    %c0_95 = arith.constant 0 : index
    %60 = vector.load %arg19[%c0_93, %c2_94, %c0_95] : memref<8x8x64xf32, #tpu.memory_space<vmem>>, vector<8x1x64xf32>
    %61 = vector.shape_cast %60 : vector<8x1x64xf32> to vector<8x64xf32>
    %c0_96 = arith.constant 0 : index
    %c3_97 = arith.constant 3 : index
    %c0_98 = arith.constant 0 : index
    %62 = vector.load %arg19[%c0_96, %c3_97, %c0_98] : memref<8x8x64xf32, #tpu.memory_space<vmem>>, vector<8x1x64xf32>
    %63 = vector.shape_cast %62 : vector<8x1x64xf32> to vector<8x64xf32>
    %64 = arith.maximumf %61, %63 : vector<8x64xf32>
    %c0_99 = arith.constant 0 : index
    %c64 = arith.constant 64 : index
    %65 = vector.load %arg20[%c0_99, %c64] : memref<8x256xf32, #tpu.memory_space<vmem>>, vector<8x64xf32>
    tpu.vector_store %arg20[%c0_99, %c64], %64 {strides = array<i32>} : memref<8x256xf32, #tpu.memory_space<vmem>>, vector<8x64xf32>,
    %c0_100 = arith.constant 0 : index
    %c4_101 = arith.constant 4 : index
    %c0_102 = arith.constant 0 : index
    %66 = vector.load %arg19[%c0_100, %c4_101, %c0_102] : memref<8x8x64xf32, #tpu.memory_space<vmem>>, vector<8x1x64xf32>
    %67 = vector.shape_cast %66 : vector<8x1x64xf32> to vector<8x64xf32>
    %c0_103 = arith.constant 0 : index
    %c5 = arith.constant 5 : index
    %c0_104 = arith.constant 0 : index
    %68 = vector.load %arg19[%c0_103, %c5, %c0_104] : memref<8x8x64xf32, #tpu.memory_space<vmem>>, vector<8x1x64xf32>
    %69 = vector.shape_cast %68 : vector<8x1x64xf32> to vector<8x64xf32>
    %70 = arith.maximumf %67, %69 : vector<8x64xf32>
    %c0_105 = arith.constant 0 : index
    %c128 = arith.constant 128 : index
    %71 = vector.load %arg20[%c0_105, %c128] : memref<8x256xf32, #tpu.memory_space<vmem>>, vector<8x64xf32>
    tpu.vector_store %arg20[%c0_105, %c128], %70 {strides = array<i32>} : memref<8x256xf32, #tpu.memory_space<vmem>>, vector<8x64xf32>,
    %c0_106 = arith.constant 0 : index
    %c6 = arith.constant 6 : index
    %c0_107 = arith.constant 0 : index
    %72 = vector.load %arg19[%c0_106, %c6, %c0_107] : memref<8x8x64xf32, #tpu.memory_space<vmem>>, vector<8x1x64xf32>
    %73 = vector.shape_cast %72 : vector<8x1x64xf32> to vector<8x64xf32>
    %c0_108 = arith.constant 0 : index
    %c7 = arith.constant 7 : index
    %c0_109 = arith.constant 0 : index
    %74 = vector.load %arg19[%c0_108, %c7, %c0_109] : memref<8x8x64xf32, #tpu.memory_space<vmem>>, vector<8x1x64xf32>
    %75 = vector.shape_cast %74 : vector<8x1x64xf32> to vector<8x64xf32>
    %76 = arith.maximumf %73, %75 : vector<8x64xf32>
    %c0_110 = arith.constant 0 : index
    %c192 = arith.constant 192 : index
    %77 = vector.load %arg20[%c0_110, %c192] : memref<8x256xf32, #tpu.memory_space<vmem>>, vector<8x64xf32>
    tpu.vector_store %arg20[%c0_110, %c192], %76 {strides = array<i32>} : memref<8x256xf32, #tpu.memory_space<vmem>>, vector<8x64xf32>,
    %c0_111 = arith.constant 0 : index
    %c0_112 = arith.constant 0 : index
    %78 = vector.load %arg20[%c0_111, %c0_112] : memref<8x256xf32, #tpu.memory_space<vmem>>, vector<8x256xf32>
    %79 = arith.truncf %78 : vector<8x256xf32> to vector<8x256xbf16>
    %c0_113 = arith.constant 0 : index
    %c0_114 = arith.constant 0 : index
    %80 = vector.load %arg8[%c0_113, %c0_114] : memref<256x120xbf16, #tpu.memory_space<vmem>>, vector<256x120xbf16>
    %cst_115 = arith.constant dense<0.000000e+00> : vector<8x120xf32>
    %81 = tpu.matmul %79, %80, %cst_115 {dimension_numbers = #tpu.dot_dimension_numbers<[1], [0], [0], [1], [0, 0, 1, 1], [], []>} : vector<8x256xbf16>, vector<256x120xbf16>, vector<8x120xf32> -> vector<8x120xf32>
    %c0_116 = arith.constant 0 : index
    %c0_117 = arith.constant 0 : index
    %82 = vector.load %arg9[%c0_116, %c0_117] : memref<1x120xf32, #tpu.memory_space<vmem>>, vector<1x120xf32>
    %83 = vector.broadcast %82 : vector<1x120xf32> to vector<8x120xf32>
    %84 = arith.addf %81, %83 : vector<8x120xf32>
    %cst_118 = arith.constant 0.000000e+00 : f32
    %85 = vector.broadcast %cst_118 : f32 to vector<8x120xf32>
    %86 = arith.maximumf %84, %85 : vector<8x120xf32>
    %87 = arith.truncf %86 : vector<8x120xf32> to vector<8x120xbf16>
    %c0_119 = arith.constant 0 : index
    %c0_120 = arith.constant 0 : index
    %88 = vector.load %arg10[%c0_119, %c0_120] : memref<120x84xbf16, #tpu.memory_space<vmem>>, vector<120x84xbf16>
    %cst_121 = arith.constant dense<0.000000e+00> : vector<8x84xf32>
    %89 = tpu.matmul %87, %88, %cst_121 {dimension_numbers = #tpu.dot_dimension_numbers<[1], [0], [0], [1], [0, 0, 1, 1], [], []>} : vector<8x120xbf16>, vector<120x84xbf16>, vector<8x84xf32> -> vector<8x84xf32>
    %c0_122 = arith.constant 0 : index
    %c0_123 = arith.constant 0 : index
    %90 = vector.load %arg11[%c0_122, %c0_123] : memref<1x84xf32, #tpu.memory_space<vmem>>, vector<1x84xf32>
    %91 = vector.broadcast %90 : vector<1x84xf32> to vector<8x84xf32>
    %92 = arith.addf %89, %91 : vector<8x84xf32>
    %cst_124 = arith.constant 0.000000e+00 : f32
    %93 = vector.broadcast %cst_124 : f32 to vector<8x84xf32>
    %94 = arith.maximumf %92, %93 : vector<8x84xf32>
    %95 = arith.truncf %94 : vector<8x84xf32> to vector<8x84xbf16>
    %c0_125 = arith.constant 0 : index
    %c0_126 = arith.constant 0 : index
    %96 = vector.load %arg12[%c0_125, %c0_126] : memref<84x10xbf16, #tpu.memory_space<vmem>>, vector<84x10xbf16>
    %cst_127 = arith.constant dense<0.000000e+00> : vector<8x10xf32>
    %97 = tpu.matmul %95, %96, %cst_127 {dimension_numbers = #tpu.dot_dimension_numbers<[1], [0], [0], [1], [0, 0, 1, 1], [], []>} : vector<8x84xbf16>, vector<84x10xbf16>, vector<8x10xf32> -> vector<8x10xf32>
    %c0_128 = arith.constant 0 : index
    %c0_129 = arith.constant 0 : index
    %98 = vector.load %arg13[%c0_128, %c0_129] : memref<1x10xf32, #tpu.memory_space<vmem>>, vector<1x10xf32>
    %99 = vector.broadcast %98 : vector<1x10xf32> to vector<8x10xf32>
    %100 = arith.addf %97, %99 : vector<8x10xf32>
    %cst_130 = arith.constant dense<0xFF800000> : vector<8xf32>
    %101 = vector.multi_reduction <maximumf>, %100, %cst_130 [1] : vector<8x10xf32> to vector<8xf32>
    %102 = vector.shape_cast %101 : vector<8xf32> to vector<8x1xf32>
    %103 = vector.broadcast %102 : vector<8x1xf32> to vector<8x10xf32>
    %104 = arith.subf %100, %103 : vector<8x10xf32>
    %105 = math.exp %104 : vector<8x10xf32>
    %cst_131 = arith.constant dense<0.000000e+00> : vector<8xf32>
    %106 = vector.multi_reduction <add>, %105, %cst_131 [1] : vector<8x10xf32> to vector<8xf32>
    %107 = vector.shape_cast %106 : vector<8xf32> to vector<8x1xf32>
    %108 = math.log %107 : vector<8x1xf32>
    %109 = vector.broadcast %108 : vector<8x1xf32> to vector<8x10xf32>
    %110 = arith.subf %104, %109 : vector<8x10xf32>
    %c0_132 = arith.constant 0 : index
    %c0_133 = arith.constant 0 : index
    %111 = vector.load %arg14[%c0_132, %c0_133] : memref<8x10xf32, #tpu.memory_space<vmem>>, vector<8x10xf32>
    tpu.vector_store %arg14[%c0_132, %c0_133], %110 {strides = array<i32>} : memref<8x10xf32, #tpu.memory_space<vmem>>, vector<8x10xf32>,
    return
  }
  func.func @transform_0(%arg0: i32) -> (i32, i32, i32) {
    %c0_i32 = arith.constant 0 : i32
    %c0_i32_0 = arith.constant 0 : i32
    %c0_i32_1 = arith.constant 0 : i32
    return %arg0, %c0_i32, %c0_i32_0 : i32, i32, i32
  }
  func.func @transform_1(%arg0: i32) -> (i32, i32) {
    %c0_i32 = arith.constant 0 : i32
    %c0_i32_0 = arith.constant 0 : i32
    %c0_i32_1 = arith.constant 0 : i32
    return %c0_i32, %c0_i32_0 : i32, i32
  }
  func.func @transform_2(%arg0: i32) -> (i32, i32) {
    %c0_i32 = arith.constant 0 : i32
    %c0_i32_0 = arith.constant 0 : i32
    %c0_i32_1 = arith.constant 0 : i32
    return %c0_i32, %c0_i32_0 : i32, i32
  }
  func.func @transform_3(%arg0: i32) -> (i32, i32) {
    %c0_i32 = arith.constant 0 : i32
    %c0_i32_0 = arith.constant 0 : i32
    %c0_i32_1 = arith.constant 0 : i32
    return %c0_i32, %c0_i32_0 : i32, i32
  }
  func.func @transform_4(%arg0: i32) -> (i32, i32) {
    %c0_i32 = arith.constant 0 : i32
    %c0_i32_0 = arith.constant 0 : i32
    %c0_i32_1 = arith.constant 0 : i32
    return %c0_i32, %c0_i32_0 : i32, i32
  }
  func.func @transform_5(%arg0: i32) -> (i32, i32) {
    %c0_i32 = arith.constant 0 : i32
    %c0_i32_0 = arith.constant 0 : i32
    %c0_i32_1 = arith.constant 0 : i32
    return %c0_i32, %c0_i32_0 : i32, i32
  }
  func.func @transform_6(%arg0: i32) -> (i32, i32) {
    %c0_i32 = arith.constant 0 : i32
    %c0_i32_0 = arith.constant 0 : i32
    %c0_i32_1 = arith.constant 0 : i32
    return %c0_i32, %c0_i32_0 : i32, i32
  }
  func.func @transform_7(%arg0: i32) -> (i32, i32) {
    %c0_i32 = arith.constant 0 : i32
    %c0_i32_0 = arith.constant 0 : i32
    %c0_i32_1 = arith.constant 0 : i32
    return %c0_i32, %c0_i32_0 : i32, i32
  }
  func.func @transform_8(%arg0: i32) -> (i32, i32) {
    %c0_i32 = arith.constant 0 : i32
    %c0_i32_0 = arith.constant 0 : i32
    %c0_i32_1 = arith.constant 0 : i32
    return %c0_i32, %c0_i32_0 : i32, i32
  }
  func.func @transform_9(%arg0: i32) -> (i32, i32) {
    %c0_i32 = arith.constant 0 : i32
    %c0_i32_0 = arith.constant 0 : i32
    %c0_i32_1 = arith.constant 0 : i32
    return %c0_i32, %c0_i32_0 : i32, i32
  }
  func.func @transform_10(%arg0: i32) -> (i32, i32) {
    %c0_i32 = arith.constant 0 : i32
    %c0_i32_0 = arith.constant 0 : i32
    %c0_i32_1 = arith.constant 0 : i32
    return %c0_i32, %c0_i32_0 : i32, i32
  }
  func.func @transform_11(%arg0: i32) -> (i32, i32) {
    %c0_i32 = arith.constant 0 : i32
    %c0_i32_0 = arith.constant 0 : i32
    %c0_i32_1 = arith.constant 0 : i32
    return %c0_i32, %c0_i32_0 : i32, i32
  }
  func.func @transform_12(%arg0: i32) -> (i32, i32) {
    %c0_i32 = arith.constant 0 : i32
    %c0_i32_0 = arith.constant 0 : i32
    %c0_i32_1 = arith.constant 0 : i32
    return %c0_i32, %c0_i32_0 : i32, i32
  }
  func.func @transform_13(%arg0: i32) -> (i32, i32) {
    %c0_i32 = arith.constant 0 : i32
    %c0_i32_0 = arith.constant 0 : i32
    return %arg0, %c0_i32 : i32, i32
  }
}

</mosaic_0001>

<bundles_post_ra>
// kernel: lenet5_forward.1
= control target key start
LH: loop header
LB: loop body
LE: loop exit
PB: predicated region body
PF: predicated region fallthrough
CT: control target
= control target key end

     0   :  { %s5193_s0 = inlined_call_operand.vmem [shape: f32[16,28,28], index: 0, kind: input, shape index: {}]   ;;  %s5194_s1 = inlined_call_operand.vmem [shape: bf16[140,72], index: 1, kind: input, shape index: {}]   ;;  %s5195_s2 = inlined_call_operand.vmem [shape: bf16[140,72], index: 2, kind: input, shape index: {}]   ;;  %s5196_s3 = inlined_call_operand.vmem [shape: f32[1,72], index: 3, kind: input, shape index: {}]   ;;  %s5197_s4 = inlined_call_operand.vmem [shape: bf16[360,64], index: 4, kind: input, shape index: {}]   ;;  %s5198_s5 = inlined_call_operand.vmem [shape: bf16[360,64], index: 5, kind: input, shape index: {}]   ;;  %s5199_s6 = inlined_call_operand.vmem [shape: f32[1,64], index: 6, kind: input, shape index: {}]   ;;  %s5200_s7 = inlined_call_operand.vmem [shape: bf16[256,120], index: 7, kind: input, shape index: {}]   ;;  %s5201_s8 = inlined_call_operand.vmem [shape: f32[1,120], index: 8, kind: input, shape index: {}]   ;;  %s5202_s9 = inlined_call_operand.vmem [shape: bf16[120,84], index: 9, kind: input, shape index: {}]   ;;  %s5203_s10 = inlined_call_operand.vmem [shape: f32[1,84], index: 10, kind: input, shape index: {}]   ;;  %s5204_s11 = inlined_call_operand.vmem [shape: bf16[84,10], index: 11, kind: input, shape index: {}]   ;;  %s5205_s12 = inlined_call_operand.vmem [shape: f32[1,10], index: 12, kind: input, shape index: {}]   ;;  %s5206_s13 = inlined_call_operand.hbm [shape: f32[16,10], index: 13, kind: output, shape index: {}]  }
   0x1   :  { %5214 = sst [smem:[#allocation13_spill]] %s5193_s0 }
   0x2   :  { %18 = vsyncpa [#allocation9], 0 }
   0x3   :  { %20 = vsyncpa [#allocation9 + $0x1], 0  ;;  %s4111_s25 = smov 0   ;;  %s4113_s26 = smov 0  }
   0x4   :  { %s4115_s27 = smov 0   ;;  %s4117_s28 = smov 0  }
   0x5 LB: > { %5215 = sst [smem:[#allocation11_spill]] %s4022_s27  ;;  %s4132_s29 = sadd.s32 4294967295, %s4026_s28   ;;  %s4026_s28 = sphi %s4117_s28, %s5227_s28   ;;  %s4022_s27 = sphi %s4115_s27, %s5224_s27   ;;  %s4018_s26 = sphi %s4113_s26, %s5226_s26   ;;  %s4014_s25 = sphi %s4111_s25, %s5225_s25  }
   0x6   : > { %s3447_s30 = sadd.s32 4294967294, %s4026_s28   ;;  %s4136_s14 = sadd.s32 1, %s4026_s28  }
   0x7   : > { %s311_s15 = sadd.s32 1, %s4022_s27  ;;  %s308_s16 = ssub.s32 %s4026_s28, %s4136_s14 }
   0x8   : > { %p321_p0 = scmp.ne.s32.totalorder %s4022_s27, %s4018_s26  ;;  %p309_p1 = scmp.eq.s32.totalorder %s308_s16, 0 }
   0x9   : > { %p322_p2 = scmp.eq.s32.totalorder %s4132_s29, 1  ;;  %p327_p3 = scmp.ne.s32.totalorder %s4018_s26, %s4014_s25 }
   0xa   : > { %p328_p4 = scmp.eq.s32.totalorder %s3447_s30, 1  ;;  %p3450_p7 = scmp.ge.s32.totalorder %s4026_s28, 1 }
   0xb   : > { %s4147_s17 = scalar_select %p309_p1, %s4022_s27, %s311_s15  }
   0xc   : > { %p4149_p5 = por %p322_p2, %p321_p0  ;;  %p4153_p6 = por %p328_p4, %p327_p3 }
   0xd   : > { %5216 = sst [smem:[#allocation12_spill]] %s4147_s17  ;;  %p392_p8 = scmp.lt.s32.totalorder %s4026_s28, 3 }
   0xf   : > { %p393_p9 = pnand %p3450_p7, %p392_p8 }
  0x10   : > { %s3452_s20 = sshll.u32 (!%p393_p9), %s4132_s29, 3  ;;  %v3866_v0 = vld [vmem:[%s5194_s1] sm:$0xff] (!%p393_p9)   ;;  %v4028_v1 = vmov (!%p393_p9), 0   ;;  %v3868_v3 = vld [vmem:[%s5194_s1 + $0x8] sm:$0xff] (!%p393_p9)   ;;  %s5219_s0 = sld [smem:[#allocation13_spill]] (!%p393_p9)  ;;  %v3870_v5 = vld [vmem:[%s5194_s1 + $0x10] sm:$0xff] (!%p393_p9)  }
  0x11   : > { %396 = sbr.rel (%p393_p9) target bundleno = 2095 (0x82f), region = 72  ;;  %p438_p10 = scmp.lt.s32.totalorder (!%p393_p9), %s3452_s20, 15  ;;  %1282 = vmatprep.subr.bf16.mxu0 (!%p393_p9), %v4028_v1  ;;  %1485 = vmatprep.subr.bf16.mxu1 (!%p393_p9), %v4028_v1  ;;  %v3867_v2 = vld [vmem:[%s5195_s2] sm:$0xff] (!%p393_p9)   ;;  %v3869_v4 = vld [vmem:[%s5195_s2 + $0x8] sm:$0xff] (!%p393_p9)   ;;  %v3871_v10 = vld [vmem:[%s5195_s2 + $0x10] sm:$0xff] (!%p393_p9)   ;;  %vm469_vm0 = vcmask (!%p393_p9), 228352  }
  0x12   : > { %1283 = vmatpush1.bf16.msra.mxu0 (!%p393_p9), %v3866_v0  ;;  %1486 = vmatpush1.bf16.msra.mxu1 (!%p393_p9), %v3867_v2  ;;  %s4030_s27 = smov (!%p393_p9), 28   ;;  %v3872_v11 = vld [vmem:[%s5194_s1 + $0x18] sm:$0xff] (!%p393_p9)   ;;  %s5208_s22 = smov (!%p393_p9), 84   ;;  %v3874_v26 = vld [vmem:[%s5194_s1 + $0x20] sm:$0xff] (!%p393_p9)   ;;  %v3876_v29 = vld [vmem:[%s5194_s1 + $0x28] sm:$0xff] (!%p393_p9)   ;;  %vm1278_vm1 = vcmask (!%p393_p9), 1045504  }
  0x13   : > { %1284 = vmatprep.subr.bf16.mxu0 (!%p393_p9), %v4028_v1  ;;  %1487 = vmatprep.subr.bf16.mxu1 (!%p393_p9), %v4028_v1  ;;  %s4032_s24 = smov (!%p393_p9), 112   ;;  %v3873_v23 = vld [vmem:[%s5195_s2 + $0x18] sm:$0xff] (!%p393_p9)   ;;  %v3875_v28 = vld [vmem:[%s5195_s2 + $0x20] sm:$0xff] (!%p393_p9)   ;;  %v3877_v32 = vld [vmem:[%s5195_s2 + $0x28] sm:$0xff] (!%p393_p9)   ;;  %s5220_s21 = smov (!%p393_p9), 84   ;;  %vm614_vm2 = vcmask (!%p393_p9), 457952  }
  0x14   : > { %v3878_v33 = vld [vmem:[%s5194_s1 + $0x30] sm:$0xff] (!%p393_p9)   ;;  %v3880_v39 = vld [vmem:[%s5194_s1 + $0x38] sm:$0xff] (!%p393_p9)   ;;  %v3882_v42 = vld [vmem:[%s5194_s1 + $0x40] sm:$0x3f] (!%p393_p9)   ;;  %vm759_vm3 = vcmask (!%p393_p9), 687552   ;;  %vm904_vm4 = vcmask (!%p393_p9), 917152  }
  0x15   : > { %v3879_v38 = vld [vmem:[%s5195_s2 + $0x30] sm:$0xff] (!%p393_p9)   ;;  %v3881_v43 = vld [vmem:[%s5195_s2 + $0x38] sm:$0xff] (!%p393_p9)   ;;  %v3883_v44 = vld [vmem:[%s5195_s2 + $0x40] sm:$0x3f] (!%p393_p9)   ;;  %v1280_v45 = vsel (!%p393_p9), %vm1278_vm1, %v3882_v42, 0  ;;  %vm1049_vm5 = vcmask (!%p393_p9), 1048448  }
  0x16   : > { %1285 = vmatpush1.bf16.msra.mxu0 (!%p393_p9), %v3868_v3  ;;  %1488 = vmatpush1.bf16.msra.mxu1 (!%p393_p9), %v3869_v4  ;;  %v1483_v50 = vsel (!%p393_p9), %vm1278_vm1, %v3883_v44, 0  ;;  %vm1051_vm6 = vcmask (!%p393_p9), 97280   ;;  %vm1693_vm7 = vcmask (!%p393_p9), 588800   ;;  %vm1798_vm8 = vcmask (!%p393_p9), 584704   ;;  %s5210_s15 = smov (!%p393_p9), 32   ;;  %s4037_s30 = smov (!%p393_p9), 64  }
  0x17   : > { %1286 = vmatprep.subr.bf16.mxu0 (!%p393_p9), %v4028_v1  ;;  %1489 = vmatprep.subr.bf16.mxu1 (!%p393_p9), %v4028_v1  ;;  %vm2273_vm9 = vcmask (!%p393_p9), 1043456   ;;  %vm1870_vm10 = vcmask (!%p393_p9), 1048128   ;;  %vm1872_vm11 = vcmask (!%p393_p9), 130048   ;;  %vm1928_vm12 = vcmask (!%p393_p9), 720000  }
  0x18   : > { %s5229_s20 = smov (!%p438_p10, %s3452_s20), 15  ;;  %vm1977_vm13 = vcmask 1048256   ;;  %vm1979_vm14 = vcmask 261120   ;;  %vm2035_vm15 = vcmask 851200   ;;  %vm2751_vm1 = vcmask 523264  }
  0x19   : > { %s3592_s16 = sshll.u32 %s5229_s20, 5  ;;  %s4029_s20 = smov 56  }
  0x1a   : > { %s4179_s23 = scalar_lea.vmem %s5219_s0, %s3592_s16  ;;  %1287 = vmatpush1.bf16.msra.mxu0 %v3870_v5  ;;  %1490 = vmatpush1.bf16.msra.mxu1 %v3871_v10  ;;  %s434_s16 = sand.u32 1, %s4018_s26  }
  0x1b   : > { %v639_v6 = vld [vmem:[%s4179_s23 + $0x2] sm:$0xff]  ;;  %v640_v8 = vld [vmem:[%s4179_s23 + $0xa] sm:$0xff]  ;;  %1288 = vmatprep.subr.bf16.mxu0 %v4028_v1  ;;  %1491 = vmatprep.subr.bf16.mxu1 %v4028_v1  ;;  %v641_v19 = vld [vmem:[%s4179_s23 + $0x12] sm:$0xff] }
  0x1c   : > { %v494_v7 = vld [vmem:[%s4179_s23 + $0x1] sm:$0xff]  ;;  %687 = vrot.lane.b32.xlu1 %v639_v6, %s4029_s20  ;;  %v495_v9 = vld [vmem:[%s4179_s23 + $0x9] sm:$0xff]  ;;  %v496_v17 = vld [vmem:[%s4179_s23 + $0x11] sm:$0xff] }
  0x1d   : > { %542 = vrot.lane.b32.xlu0 %v494_v7, %s4030_s27  ;;  %v785_v12 = vld [vmem:[%s4179_s23 + $0xb] sm:$0xff]  ;;  %v784_v13 = vld [vmem:[%s4179_s23 + $0x3] sm:$0xff]  ;;  %v786_v21 = vld [vmem:[%s4179_s23 + $0x13] sm:$0xff] }
  0x1e   : > { %1289 = vmatpush1.bf16.msra.mxu0 %v3872_v11  ;;  %v930_v14 = vld [vmem:[%s4179_s23 + $0xc] sm:$0xff]  ;;  %v929_v15 = vld [vmem:[%s4179_s23 + $0x4] sm:$0xff]  ;;  %v931_v27 = vld [vmem:[%s4179_s23 + $0x14] sm:$0xff]  ;;  %1492 = vmatpush1.bf16.msra.mxu1 %v3873_v23 }
  0x1f   : > { %1290 = vmatprep.subr.bf16.mxu0 %v4028_v1  ;;  %v497_v16 = vld [vmem:[%s4179_s23 + $0x21] sm:$0xff]  ;;  %1493 = vmatprep.subr.bf16.mxu1 %v4028_v1  ;;  %v499_v30 = vld [vmem:[%s4179_s23 + $0x31] sm:$0xff]  ;;  %v498_v31 = vld [vmem:[%s4179_s23 + $0x29] sm:$0xff] }
  0x20   : > { %689 = vrot.lane.b32.xlu1 %v640_v8, %s4029_s20  ;;  %v642_v18 = vld [vmem:[%s4179_s23 + $0x22] sm:$0xff]  ;;  %v644_v34 = vld [vmem:[%s4179_s23 + $0x32] sm:$0xff]  ;;  %v643_v35 = vld [vmem:[%s4179_s23 + $0x2a] sm:$0xff] }
  0x21   : > { %544 = vrot.lane.b32.xlu0 %v495_v9, %s4030_s27  ;;  %v787_v20 = vld [vmem:[%s4179_s23 + $0x23] sm:$0xff]  ;;  %v447_v37 = vld [vmem:[%s4179_s23 + $0x10] sm:$0xff] }
  0x22   : > { %v445_v22 = vld [vmem:[%s4179_s23] sm:$0xff]  ;;  %v446_v25 = vld [vmem:[%s4179_s23 + $0x8] sm:$0xff]  ;;  %1291 = vmatpush1.bf16.msra.mxu0 %v3874_v26  ;;  %1494 = vmatpush1.bf16.msra.mxu1 %v3875_v28  ;;  %472 = vst.msk [vmem:[#allocation2 + $0x20] sm:$0xff] %vm469_vm0, %v447_v37  ;;  %v789_v40 = vld [vmem:[%s4179_s23 + $0x33] sm:$0xff] }
  0x23   : > { %470 = vst.msk [vmem:[#allocation2] sm:$0xff] %vm469_vm0, %v445_v22  ;;  %v932_v24 = vld [vmem:[%s4179_s23 + $0x24] sm:$0xff]  ;;  %471 = vst.msk [vmem:[#allocation2 + $0x10] sm:$0xff] %vm469_vm0, %v446_v25  ;;  %1292 = vmatprep.subr.bf16.mxu0 %v4028_v1  ;;  %1495 = vmatprep.subr.bf16.mxu1 %v4028_v1  ;;  %v450_v46 = vld [vmem:[%s4179_s23 + $0x30] sm:$0xff] }
  0x24   : > { %834 = vrot.lane.b32.xlu1 %v785_v12, %s5208_s22  ;;  %v448_v36 = vld [vmem:[%s4179_s23 + $0x20] sm:$0xff]  ;;  %v788_v41 = vld [vmem:[%s4179_s23 + $0x2b] sm:$0xff]  ;;  %v934_v48 = vld [vmem:[%s4179_s23 + $0x34] sm:$0xff]  ;;  %475 = vst.msk [vmem:[#allocation2 + $0x50] sm:$0xff] %vm469_vm0, %v450_v46 }
  0x25   : > { %832 = vrot.lane.b32.xlu0 %v784_v13, %s5208_s22  ;;  %473 = vst.msk [vmem:[#allocation2 + $0x30] sm:$0xff] %vm469_vm0, %v448_v36  ;;  %v449_v47 = vld [vmem:[%s4179_s23 + $0x28] sm:$0xff]  ;;  %v451_v52 = vld [vmem:[%s4179_s23 + $0x40] sm:$0xff]  ;;  %v453_v58 = vld [vmem:[%s4179_s23 + $0x50] sm:$0xff] }
  0x26   : > { %1293 = vmatpush1.bf16.msra.mxu0 %v3876_v29  ;;  %1496 = vmatpush1.bf16.msra.mxu1 %v3877_v32  ;;  %v933_v49 = vld [vmem:[%s4179_s23 + $0x2c] sm:$0xff]  ;;  %474 = vst.msk [vmem:[#allocation2 + $0x40] sm:$0xff] %vm469_vm0, %v449_v47  ;;  %v500_v54 = vld [vmem:[%s4179_s23 + $0x41] sm:$0xff]  ;;  %476 = vst.msk [vmem:[#allocation2 + $0x60] sm:$0xff] %vm469_vm0, %v451_v52 }
  0x27   : > { %1294 = vmatprep.subr.bf16.mxu0 %v4028_v1  ;;  %1497 = vmatprep.subr.bf16.mxu1 %v4028_v1  ;;  %v452_v51 = vld [vmem:[%s4179_s23 + $0x48] sm:$0xff]  ;;  %v454_v57 = vld [vmem:[%s4179_s23 + $0x60] sm:$0xff]  ;;  %478 = vst.msk [vmem:[#allocation2 + $0x80] sm:$0xff] %vm469_vm0, %v453_v58  ;;  %v502_v0 = vld [vmem:[%s4179_s23 + $0x51] sm:$0xff] }
  0x28   : > { %979 = vrot.lane.b32.xlu1 %v930_v14, %s4032_s24  ;;  %477 = vst.msk [vmem:[#allocation2 + $0x70] sm:$0xff] %vm469_vm0, %v452_v51  ;;  %v501_v53 = vld [vmem:[%s4179_s23 + $0x49] sm:$0xff]  ;;  %479 = vst.msk [vmem:[#allocation2 + $0x90] sm:$0xff] %vm469_vm0, %v454_v57  ;;  %v503_v63 = vld [vmem:[%s4179_s23 + $0x61] sm:$0xff] }
  0x29   : > { %977 = vrot.lane.b32.xlu0 %v929_v15, %s4032_s24  ;;  %v646_v55 = vld [vmem:[%s4179_s23 + $0x4a] sm:$0xff]  ;;  %v645_v56 = vld [vmem:[%s4179_s23 + $0x42] sm:$0xff]  ;;  %v647_v2 = vld [vmem:[%s4179_s23 + $0x52] sm:$0xff] }
  0x2a   : > { %1295 = vmatpush1.bf16.msra.mxu0 %v3878_v33  ;;  %1498 = vmatpush1.bf16.msra.mxu1 %v3879_v38  ;;  %v791_v59 = vld [vmem:[%s4179_s23 + $0x4b] sm:$0xff]  ;;  %v790_v60 = vld [vmem:[%s4179_s23 + $0x43] sm:$0xff]  ;;  %v792_v6 = vld [vmem:[%s4179_s23 + $0x53] sm:$0xff] }
  0x2b   : > { %1296 = vmatprep.subr.bf16.mxu0 %v4028_v1  ;;  %1499 = vmatprep.subr.bf16.mxu1 %v4028_v1  ;;  %v936_v61 = vld [vmem:[%s4179_s23 + $0x4c] sm:$0xff]  ;;  %v935_v62 = vld [vmem:[%s4179_s23 + $0x44] sm:$0xff]  ;;  %v937_v8 = vld [vmem:[%s4179_s23 + $0x54] sm:$0xff] }
  0x2c   : > { %548 = vrot.lane.b32.xlu1 %v497_v16, %s4030_s27  ;;  %v456_v3 = vld [vmem:[%s4179_s23 + $0x70] sm:$0xff]  ;;  %v455_v4 = vld [vmem:[%s4179_s23 + $0x68] sm:$0xff]  ;;  %v457_v14 = vld [vmem:[%s4179_s23 + $0x80] sm:$0xff] }
  0x2d   : > { %546 = vrot.lane.b32.xlu0 %v496_v17, %s4030_s27  ;;  %v793_v5 = vld [vmem:[%s4179_s23 + $0x63] sm:$0xff]  ;;  %481 = vst.msk [vmem:[#allocation2 + $0xb0] sm:$0xff] %vm469_vm0, %v456_v3  ;;  %480 = vst.msk [vmem:[#allocation2 + $0xa0] sm:$0xff] %vm469_vm0, %v455_v4  ;;  %v505_v9 = vld [vmem:[%s4179_s23 + $0x71] sm:$0xff] }
  0x2e   : > { %1297 = vmatpush1.bf16.msra.mxu0 %v3880_v39  ;;  %1500 = vmatpush1.bf16.msra.mxu1 %v3881_v43  ;;  %v938_v7 = vld [vmem:[%s4179_s23 + $0x64] sm:$0xff]  ;;  %v650_v11 = vld [vmem:[%s4179_s23 + $0x72] sm:$0xff]  ;;  %482 = vst.msk [vmem:[#allocation2 + $0xc0] sm:$0xff] %vm469_vm0, %v457_v14 }
  0x2f   : > { %1298 = vmatprep.subr.bf16.mxu0 %v4028_v1  ;;  %1501 = vmatprep.subr.bf16.mxu1 %v4028_v1  ;;  %v648_v1 = vld [vmem:[%s4179_s23 + $0x62] sm:$0xff]  ;;  %v649_v12 = vld [vmem:[%s4179_s23 + $0x6a] sm:$0xff]  ;;  %v795_v15 = vld [vmem:[%s4179_s23 + $0x73] sm:$0xff] }
  0x30   : > { %693 = vrot.lane.b32.xlu1 %v642_v18, %s4029_s20  ;;  %v504_v10 = vld [vmem:[%s4179_s23 + $0x69] sm:$0xff]  ;;  %v940_v17 = vld [vmem:[%s4179_s23 + $0x74] sm:$0xff]  ;;  %v460_v23 = vld [vmem:[%s4179_s23 + $0xa0] sm:$0xff] }
  0x31   : > { %691 = vrot.lane.b32.xlu0 %v641_v19, %s4029_s20  ;;  %v458_v13 = vld [vmem:[%s4179_s23 + $0x88] sm:$0xff]  ;;  %485 = vst.msk [vmem:[#allocation2 + $0xf0] sm:$0xff] %vm469_vm0, %v460_v23  ;;  %v653_v32 = vld [vmem:[%s4179_s23 + $0x92] sm:$0xff] }
  0x32   : > { %1299 = vmatpush1.bf16.msra.mxu0 %v1280_v45  ;;  %1502 = vmatpush1.bf16.msra.mxu1 %v1483_v50  ;;  %v794_v16 = vld [vmem:[%s4179_s23 + $0x6b] sm:$0xff]  ;;  %483 = vst.msk [vmem:[#allocation2 + $0xd0] sm:$0xff] %vm469_vm0, %v458_v13  ;;  %v651_v22 = vld [vmem:[%s4179_s23 + $0x82] sm:$0xff]  ;;  %v798_v38 = vld [vmem:[%s4179_s23 + $0x93] sm:$0xff] }
  0x33   : > { %v939_v18 = vld [vmem:[%s4179_s23 + $0x6c] sm:$0xff]  ;;  %v796_v26 = vld [vmem:[%s4179_s23 + $0x83] sm:$0xff]  ;;  %v943_v42 = vld [vmem:[%s4179_s23 + $0x94] sm:$0xff] }
  0x34   : > { %838 = vrot.lane.b32.xlu1 %v787_v20, %s5208_s22  ;;  %v507_v19 = vld [vmem:[%s4179_s23 + $0x89] sm:$0xff]  ;;  %v506_v20 = vld [vmem:[%s4179_s23 + $0x81] sm:$0xff]  ;;  %v511_v45 = vld [vmem:[%s4179_s23 + $0xb1] sm:$0xff] }
  0x35   : > { %836 = vrot.lane.b32.xlu0 %v786_v21, %s5208_s22  ;;  %v652_v21 = vld [vmem:[%s4179_s23 + $0x8a] sm:$0xff]  ;;  %v509_v29 = vld [vmem:[%s4179_s23 + $0xa1] sm:$0xff]  ;;  %s4034_s22 = smov 16  }
  0x36   : > { %v797_v25 = vld [vmem:[%s4179_s23 + $0x8b] sm:$0xff]  ;;  %v799_v37 = vld [vmem:[%s4179_s23 + $0xa3] sm:$0xff] }
  0x37   : > { %v941_v28 = vld [vmem:[%s4179_s23 + $0x84] sm:$0xff]  ;;  %v465_v14 = vld [vmem:[%s4179_s23 + $0xd0] sm:$0xff] }
  0x38   : > { %983 = vrot.lane.b32.xlu1 %v932_v24, %s4032_s24  ;;  %v459_v24 = vld [vmem:[%s4179_s23 + $0x90] sm:$0xff]  ;;  %v461_v36 = vld [vmem:[%s4179_s23 + $0xa8] sm:$0xff]  ;;  %v466_v13 = vld [vmem:[%s4179_s23 + $0xe0] sm:$0xff]  ;;  %490 = vst.msk [vmem:[#allocation2 + $0x140] sm:$0xff] %vm469_vm0, %v465_v14 }
  0x39   : > { %981 = vrot.lane.b32.xlu0 %v931_v27, %s4032_s24  ;;  %484 = vst.msk [vmem:[#allocation2 + $0xe0] sm:$0xff] %vm469_vm0, %v459_v24  ;;  %v942_v27 = vld [vmem:[%s4179_s23 + $0x8c] sm:$0xff]  ;;  %486 = vst.msk [vmem:[#allocation2 + $0x100] sm:$0xff] %vm469_vm0, %v461_v36 }
  0x3a   : > { %v510_v46 = vld [vmem:[%s4179_s23 + $0xa9] sm:$0xff]  ;;  %491 = vst.msk [vmem:[#allocation2 + $0x150] sm:$0xff] %vm469_vm0, %v466_v13 }
  0x3b   : > { %v655_v50 = vld [vmem:[%s4179_s23 + $0xaa] sm:$0xff] }
  0x3c   : > { %552 = vrot.lane.b32.xlu1 %v499_v30, %s4030_s27  ;;  %v508_v30 = vld [vmem:[%s4179_s23 + $0x91] sm:$0xff] }
  0x3d   : > { %550 = vrot.lane.b32.xlu0 %v498_v31, %s4030_s27  ;;  %v654_v31 = vld [vmem:[%s4179_s23 + $0xa2] sm:$0xff] }
  0x40   : > { %697 = vrot.lane.b32.xlu1 %v644_v34, %s4029_s20 }
  0x41   : > { %695 = vrot.lane.b32.xlu0 %v643_v35, %s4029_s20  ;;  %v462_v35 = vld [vmem:[%s4179_s23 + $0xb0] sm:$0xff] }
  0x42   : > { %487 = vst.msk [vmem:[#allocation2 + $0x110] sm:$0xff] %vm469_vm0, %v462_v35 }
  0x44   : > { %842 = vrot.lane.b32.xlu1 %v789_v40, %s5220_s21 }
  0x45   : > { %840 = vrot.lane.b32.xlu0 %v788_v41, %s5220_s21  ;;  %v944_v41 = vld [vmem:[%s4179_s23 + $0xa4] sm:$0xff] }
  0x48   : > { %987 = vrot.lane.b32.xlu1 %v934_v48, %s4032_s24 }
  0x49   : > { %985 = vrot.lane.b32.xlu0 %v933_v49, %s4032_s24  ;;  %v656_v49 = vld [vmem:[%s4179_s23 + $0xb2] sm:$0xff] }
  0x4c   : > { %556 = vrot.lane.b32.xlu1 %v501_v53, %s4030_s27  ;;  %v464_v53 = vld [vmem:[%s4179_s23 + $0xc8] sm:$0xff] }
  0x4d   : > { %554 = vrot.lane.b32.xlu0 %v500_v54, %s4030_s27  ;;  %v463_v54 = vld [vmem:[%s4179_s23 + $0xc0] sm:$0xff]  ;;  %489 = vst.msk [vmem:[#allocation2 + $0x130] sm:$0xff] %vm469_vm0, %v464_v53  ;;  %v517_v53 = vld [vmem:[%s4179_s23 + $0xf1] sm:$0xff] }
  0x4e   : > { %488 = vst.msk [vmem:[#allocation2 + $0x120] sm:$0xff] %vm469_vm0, %v463_v54  ;;  %v516_v54 = vld [vmem:[%s4179_s23 + $0xe9] sm:$0xff] }
  0x50   : > { %701 = vrot.lane.b32.xlu1 %v646_v55, %s4029_s20  ;;  %v801_v55 = vld [vmem:[%s4179_s23 + $0xb3] sm:$0xff] }
  0x51   : > { %699 = vrot.lane.b32.xlu0 %v645_v56, %s4029_s20  ;;  %v800_v56 = vld [vmem:[%s4179_s23 + $0xab] sm:$0xff] }
  0x54   : > { %846 = vrot.lane.b32.xlu1 %v791_v59, %s5220_s21 }
  0x55   : > { %844 = vrot.lane.b32.xlu0 %v790_v60, %s5220_s21 }
  0x58   : > { %991 = vrot.lane.b32.xlu1 %v936_v61, %s4032_s24 }
  0x59   : > { %989 = vrot.lane.b32.xlu0 %v935_v62, %s4032_s24 }
  0x5c   : > { %560 = vrot.lane.b32.xlu1 %v503_v63, %s4030_s27 }
  0x5d   : > { %558 = vrot.lane.b32.xlu0 %v502_v0, %s4030_s27 }
  0x60   : > { %705 = vrot.lane.b32.xlu1 %v648_v1, %s4029_s20  ;;  %v946_v1 = vld [vmem:[%s4179_s23 + $0xb4] sm:$0xff] }
  0x61   : > { %703 = vrot.lane.b32.xlu0 %v647_v2, %s4029_s20  ;;  %v945_v2 = vld [vmem:[%s4179_s23 + $0xac] sm:$0xff] }
  0x64   : > { %850 = vrot.lane.b32.xlu1 %v793_v5, %s5220_s21  ;;  %v513_v5 = vld [vmem:[%s4179_s23 + $0xc9] sm:$0xff] }
  0x65   : > { %848 = vrot.lane.b32.xlu0 %v792_v6, %s5220_s21  ;;  %v512_v6 = vld [vmem:[%s4179_s23 + $0xc1] sm:$0xff] }
  0x68   : > { %995 = vrot.lane.b32.xlu1 %v938_v7, %s4032_s24 }
  0x69   : > { %993 = vrot.lane.b32.xlu0 %v937_v8, %s4032_s24 }
  0x6c   : > { %564 = vrot.lane.b32.xlu1 %v505_v9, %s4030_s27  ;;  %v658_v9 = vld [vmem:[%s4179_s23 + $0xca] sm:$0xff] }
  0x6d   : > { %562 = vrot.lane.b32.xlu0 %v504_v10, %s4030_s27  ;;  %v657_v10 = vld [vmem:[%s4179_s23 + $0xc2] sm:$0xff] }
  0x70   : > { %709 = vrot.lane.b32.xlu1 %v650_v11, %s4029_s20 }
  0x71   : > { %707 = vrot.lane.b32.xlu0 %v649_v12, %s4029_s20 }
  0x74   : > { %854 = vrot.lane.b32.xlu1 %v795_v15, %s5220_s21  ;;  %v803_v15 = vld [vmem:[%s4179_s23 + $0xcb] sm:$0xff] }
  0x75   : > { %852 = vrot.lane.b32.xlu0 %v794_v16, %s5220_s21  ;;  %v802_v16 = vld [vmem:[%s4179_s23 + $0xc3] sm:$0xff] }
  0x78   : > { %999 = vrot.lane.b32.xlu1 %v940_v17, %s4032_s24 }
  0x79   : > { %997 = vrot.lane.b32.xlu0 %v939_v18, %s4032_s24 }
  0x7c   : > { %568 = vrot.lane.b32.xlu1 %v507_v19, %s4030_s27 }
  0x7d   : > { %566 = vrot.lane.b32.xlu0 %v506_v20, %s4030_s27 }
  0x80   : > { %713 = vrot.lane.b32.xlu1 %v652_v21, %s4029_s20 }
  0x81   : > { %711 = vrot.lane.b32.xlu0 %v651_v22, %s4029_s20 }
  0x84   : > { %858 = vrot.lane.b32.xlu1 %v797_v25, %s5220_s21  ;;  %v948_v25 = vld [vmem:[%s4179_s23 + $0xcc] sm:$0xff] }
  0x85   : > { %856 = vrot.lane.b32.xlu0 %v796_v26, %s5220_s21  ;;  %v947_v26 = vld [vmem:[%s4179_s23 + $0xc4] sm:$0xff] }
  0x88   : > { %1003 = vrot.lane.b32.xlu1 %v942_v27, %s4032_s24 }
  0x89   : > { %1001 = vrot.lane.b32.xlu0 %v941_v28, %s4032_s24 }
  0x8c   : > { %572 = vrot.lane.b32.xlu1 %v509_v29, %s4030_s27  ;;  %v515_v29 = vld [vmem:[%s4179_s23 + $0xe1] sm:$0xff] }
  0x8d   : > { %570 = vrot.lane.b32.xlu0 %v508_v30, %s4030_s27  ;;  %v514_v30 = vld [vmem:[%s4179_s23 + $0xd1] sm:$0xff] }
  0x8e   : > { %v688_v33 = vpop.permute.xlu1 %687 }
  0x8f   : > { %v543_v34 = vpop.permute.xlu0 %542 }
  0x90   : > { %615 = vst.msk [vmem:[#allocation2] sm:$0xff] %vm614_vm2, %v543_v34  ;;  %717 = vrot.lane.b32.xlu1 %v654_v31, %s4029_s20  ;;  %v659_v34 = vld [vmem:[%s4179_s23 + $0xd2] sm:$0xff] }
  0x91   : > { %715 = vrot.lane.b32.xlu0 %v653_v32, %s4029_s20  ;;  %760 = vst.msk [vmem:[#allocation2] sm:$0xff] %vm759_vm3, %v688_v33  ;;  %v660_v33 = vld [vmem:[%s4179_s23 + $0xe2] sm:$0xff] }
  0x92   : > { %v690_v39 = vpop.permute.xlu1 %689 }
  0x93   : > { %v545_v40 = vpop.permute.xlu0 %544 }
  0x94   : > { %616 = vst.msk [vmem:[#allocation2 + $0x10] sm:$0xff] %vm614_vm2, %v545_v40  ;;  %862 = vrot.lane.b32.xlu1 %v799_v37, %s5220_s21  ;;  %v468_v37 = vld [vmem:[%s4179_s23 + $0xf0] sm:$0xff] }
  0x95   : > { %860 = vrot.lane.b32.xlu0 %v798_v38, %s5220_s21  ;;  %761 = vst.msk [vmem:[#allocation2 + $0x10] sm:$0xff] %vm759_vm3, %v690_v39  ;;  %v467_v38 = vld [vmem:[%s4179_s23 + $0xe8] sm:$0xff]  ;;  %v804_v40 = vld [vmem:[%s4179_s23 + $0xd3] sm:$0xff] }
  0x96   : > { %v835_v43 = vpop.permute.xlu1 %834  ;;  %493 = vst.msk [vmem:[#allocation2 + $0x170] sm:$0xff] %vm469_vm0, %v468_v37  ;;  %492 = vst.msk [vmem:[#allocation2 + $0x160] sm:$0xff] %vm469_vm0, %v467_v38  ;;  %v805_v39 = vld [vmem:[%s4179_s23 + $0xe3] sm:$0xff]  ;;  %vm2260_vm0 = vcmask 850944  }
  0x97   : > { %v833_v44 = vpop.permute.xlu0 %832  ;;  %906 = vst.msk [vmem:[#allocation2 + $0x10] sm:$0xff] %vm904_vm4, %v835_v43 }
  0x98   : > { %905 = vst.msk [vmem:[#allocation2] sm:$0xff] %vm904_vm4, %v833_v44  ;;  %1007 = vrot.lane.b32.xlu1 %v944_v41, %s4032_s24 }
  0x99   : > { %1005 = vrot.lane.b32.xlu0 %v943_v42, %s4032_s24 }
  0x9a   : > { %v980_v47 = vpop.permute.xlu1 %979 }
  0x9b   : > { %v978_v48 = vpop.permute.xlu0 %977  ;;  %1053 = vst.msk [vmem:[#allocation2 + $0x10] sm:$0xff] %vm1049_vm5, %v980_v47 }
  0x9c   : > { %1054 = vst.msk [vmem:[#allocation2 + $0x18] sm:$0xff] %vm1051_vm6, %v980_v47  ;;  %1052 = vst.msk [vmem:[#allocation2 + $0x8] sm:$0xff] %vm1051_vm6, %v978_v48  ;;  %576 = vrot.lane.b32.xlu1 %v511_v45, %s4030_s27 }
  0x9d   : > { %1050 = vst.msk [vmem:[#allocation2] sm:$0xff] %vm1049_vm5, %v978_v48  ;;  %574 = vrot.lane.b32.xlu0 %v510_v46, %s4030_s27 }
  0x9e   : > { %v549_v51 = vpop.permute.xlu1 %548 }
  0x9f   : > { %v547_v52 = vpop.permute.xlu0 %546  ;;  %618 = vst.msk [vmem:[#allocation2 + $0x30] sm:$0xff] %vm614_vm2, %v549_v51 }
  0xa0   : > { %617 = vst.msk [vmem:[#allocation2 + $0x20] sm:$0xff] %vm614_vm2, %v547_v52  ;;  %721 = vrot.lane.b32.xlu1 %v656_v49, %s4029_s20  ;;  %v950_v49 = vld [vmem:[%s4179_s23 + $0xe4] sm:$0xff] }
  0xa1   : > { %719 = vrot.lane.b32.xlu0 %v655_v50, %s4029_s20  ;;  %v949_v50 = vld [vmem:[%s4179_s23 + $0xd4] sm:$0xff] }
  0xa2   : > { %v694_v57 = vpop.permute.xlu1 %693  ;;  %v1101_v63 = vld [vmem:[#allocation2 + $0x10] sm:$0xff] }
  0xa3   : > { %v692_v58 = vpop.permute.xlu0 %691  ;;  %v1100_v59 = vld [vmem:[#allocation2 + $0x8] sm:$0xff]  ;;  %v1102_v60 = vld [vmem:[#allocation2 + $0x18] sm:$0xff]  ;;  %763 = vst.msk [vmem:[#allocation2 + $0x30] sm:$0xff] %vm759_vm3, %v694_v57 }
  0xa4   : > { %v1099_v61 = vld [vmem:[#allocation2] sm:$0xff]  ;;  %762 = vst.msk [vmem:[#allocation2 + $0x20] sm:$0xff] %vm759_vm3, %v692_v58  ;;  %v1148_v62 = vpack.c.bf16 %v1102_v60, %v1100_v59  ;;  %866 = vrot.lane.b32.xlu1 %v801_v55, %s5220_s21  ;;  %v662_v57 = vld [vmem:[%s4179_s23 + $0xf2] sm:$0xff]  ;;  %v661_v58 = vld [vmem:[%s4179_s23 + $0xea] sm:$0xff] }
  0xa5   : > { %864 = vrot.lane.b32.xlu0 %v800_v56, %s5220_s21  ;;  %v1147_v0 = vpack.c.bf16 %v1101_v63, %v1099_v61  ;;  %v807_v61 = vld [vmem:[%s4179_s23 + $0xf3] sm:$0xff] }
  0xa6   : > { %3464 = vmatprep.mubr.msk.bf16.mxu0 %vm1051_vm6, %v1148_v62  ;;  %3485 = vmatprep.mubr.msk.bf16.mxu1 %vm1051_vm6, %v1148_v62  ;;  %v839_v3 = vpop.permute.xlu1 %838  ;;  %v806_v62 = vld [vmem:[%s4179_s23 + $0xeb] sm:$0xff] }
  0xa7   : > { %v837_v4 = vpop.permute.xlu0 %836  ;;  %1315 = vmatmul.mubr.bf16.vlgmr.msra.gmra.mrb[0].mxu0 %v1147_v0  ;;  %1518 = vmatmul.mubr.bf16.vlgmr.msra.gmra.mrb[0].mxu1 %v1147_v0  ;;  %908 = vst.msk [vmem:[#allocation2 + $0x30] sm:$0xff] %vm904_vm4, %v839_v3 }
  0xa8   : > { %907 = vst.msk [vmem:[#allocation2 + $0x20] sm:$0xff] %vm904_vm4, %v837_v4  ;;  %1011 = vrot.lane.b32.xlu1 %v946_v1, %s4032_s24 }
  0xa9   : > { %1009 = vrot.lane.b32.xlu0 %v945_v2, %s4032_s24 }
  0xaa   : > { %v984_v7 = vpop.permute.xlu1 %983 }
  0xab   : > { %v982_v8 = vpop.permute.xlu0 %981  ;;  %1057 = vst.msk [vmem:[#allocation2 + $0x30] sm:$0xff] %vm1049_vm5, %v984_v7 }
  0xac   : > { %1058 = vst.msk [vmem:[#allocation2 + $0x38] sm:$0xff] %vm1051_vm6, %v984_v7  ;;  %1056 = vst.msk [vmem:[#allocation2 + $0x28] sm:$0xff] %vm1051_vm6, %v982_v8  ;;  %580 = vrot.lane.b32.xlu1 %v513_v5, %s4030_s27  ;;  %v952_v7 = vld [vmem:[%s4179_s23 + $0xf4] sm:$0xff] }
  0xad   : > { %1055 = vst.msk [vmem:[#allocation2 + $0x20] sm:$0xff] %vm1049_vm5, %v982_v8  ;;  %578 = vrot.lane.b32.xlu0 %v512_v6, %s4030_s27  ;;  %v951_v8 = vld [vmem:[%s4179_s23 + $0xec] sm:$0xff]  ;;  %s4033_s23 = smov 72  }
  0xae   : > { %v553_v11 = vpop.permute.xlu1 %552 }
  0xaf   : > { %v551_v12 = vpop.permute.xlu0 %550  ;;  %620 = vst.msk [vmem:[#allocation2 + $0x50] sm:$0xff] %vm614_vm2, %v553_v11 }
  0xb0   : > { %619 = vst.msk [vmem:[#allocation2 + $0x40] sm:$0xff] %vm614_vm2, %v551_v12  ;;  %725 = vrot.lane.b32.xlu1 %v658_v9, %s4029_s20 }
  0xb1   : > { %723 = vrot.lane.b32.xlu0 %v657_v10, %s4029_s20 }
  0xb2   : > { %v698_v17 = vpop.permute.xlu1 %697  ;;  %v1105_v23 = vld [vmem:[#allocation2 + $0x30] sm:$0xff] }
  0xb3   : > { %v696_v18 = vpop.permute.xlu0 %695  ;;  %v1104_v19 = vld [vmem:[#allocation2 + $0x28] sm:$0xff]  ;;  %v1106_v20 = vld [vmem:[#allocation2 + $0x38] sm:$0xff]  ;;  %765 = vst.msk [vmem:[#allocation2 + $0x50] sm:$0xff] %vm759_vm3, %v698_v17 }
  0xb4   : > { %v1103_v21 = vld [vmem:[#allocation2 + $0x20] sm:$0xff]  ;;  %764 = vst.msk [vmem:[#allocation2 + $0x40] sm:$0xff] %vm759_vm3, %v696_v18  ;;  %v1150_v22 = vpack.c.bf16 %v1106_v20, %v1104_v19  ;;  %870 = vrot.lane.b32.xlu1 %v803_v15, %s5220_s21 }
  0xb5   : > { %868 = vrot.lane.b32.xlu0 %v802_v16, %s5220_s21  ;;  %v1149_v24 = vpack.c.bf16 %v1105_v23, %v1103_v21 }
  0xb6   : > { %3465 = vmatprep.mubr.msk.bf16.mxu0 %vm1051_vm6, %v1150_v22  ;;  %3486 = vmatprep.mubr.msk.bf16.mxu1 %vm1051_vm6, %v1150_v22  ;;  %v843_v27 = vpop.permute.xlu1 %842 }
  0xb7   : > { %v841_v28 = vpop.permute.xlu0 %840  ;;  %1323 = vmatmul.mubr.bf16.gmra.mrb[4].mxu0 %v1149_v24  ;;  %1526 = vmatmul.mubr.bf16.gmra.mrb[4].mxu1 %v1149_v24  ;;  %910 = vst.msk [vmem:[#allocation2 + $0x50] sm:$0xff] %vm904_vm4, %v843_v27 }
  0xb8   : > { %909 = vst.msk [vmem:[#allocation2 + $0x40] sm:$0xff] %vm904_vm4, %v841_v28  ;;  %1015 = vrot.lane.b32.xlu1 %v948_v25, %s4032_s24 }
  0xb9   : > { %1013 = vrot.lane.b32.xlu0 %v947_v26, %s4032_s24 }
  0xba   : > { %v988_v31 = vpop.permute.xlu1 %987 }
  0xbb   : > { %v986_v32 = vpop.permute.xlu0 %985  ;;  %1061 = vst.msk [vmem:[#allocation2 + $0x50] sm:$0xff] %vm1049_vm5, %v988_v31 }
  0xbc   : > { %1062 = vst.msk [vmem:[#allocation2 + $0x58] sm:$0xff] %vm1051_vm6, %v988_v31  ;;  %1060 = vst.msk [vmem:[#allocation2 + $0x48] sm:$0xff] %vm1051_vm6, %v986_v32  ;;  %584 = vrot.lane.b32.xlu1 %v515_v29, %s4030_s27 }
  0xbd   : > { %1059 = vst.msk [vmem:[#allocation2 + $0x40] sm:$0xff] %vm1049_vm5, %v986_v32  ;;  %582 = vrot.lane.b32.xlu0 %v514_v30, %s4030_s27 }
  0xbe   : > { %v557_v35 = vpop.permute.xlu1 %556 }
  0xbf   : > { %v555_v36 = vpop.permute.xlu0 %554  ;;  %622 = vst.msk [vmem:[#allocation2 + $0x70] sm:$0xff] %vm614_vm2, %v557_v35 }
  0xc0   : > { %621 = vst.msk [vmem:[#allocation2 + $0x60] sm:$0xff] %vm614_vm2, %v555_v36  ;;  %729 = vrot.lane.b32.xlu1 %v660_v33, %s4029_s20 }
  0xc1   : > { %727 = vrot.lane.b32.xlu0 %v659_v34, %s4029_s20 }
  0xc2   : > { %v702_v41 = vpop.permute.xlu1 %701  ;;  %v1109_v47 = vld [vmem:[#allocation2 + $0x50] sm:$0xff] }
  0xc3   : > { %v700_v42 = vpop.permute.xlu0 %699  ;;  %v1108_v43 = vld [vmem:[#allocation2 + $0x48] sm:$0xff]  ;;  %v1110_v44 = vld [vmem:[#allocation2 + $0x58] sm:$0xff]  ;;  %767 = vst.msk [vmem:[#allocation2 + $0x70] sm:$0xff] %vm759_vm3, %v702_v41 }
  0xc4   : > { %v1107_v45 = vld [vmem:[#allocation2 + $0x40] sm:$0xff]  ;;  %766 = vst.msk [vmem:[#allocation2 + $0x60] sm:$0xff] %vm759_vm3, %v700_v42  ;;  %v1152_v46 = vpack.c.bf16 %v1110_v44, %v1108_v43  ;;  %874 = vrot.lane.b32.xlu1 %v805_v39, %s5220_s21 }
  0xc5   : > { %872 = vrot.lane.b32.xlu0 %v804_v40, %s5220_s21  ;;  %v1151_v48 = vpack.c.bf16 %v1109_v47, %v1107_v45 }
  0xc6   : > { %3466 = vmatprep.mubr.msk.bf16.mxu0 %vm1051_vm6, %v1152_v46  ;;  %3487 = vmatprep.mubr.msk.bf16.mxu1 %vm1051_vm6, %v1152_v46  ;;  %v847_v51 = vpop.permute.xlu1 %846 }
  0xc7   : > { %v845_v52 = vpop.permute.xlu0 %844  ;;  %1331 = vmatmul.mubr.bf16.gmra.mrb[8].mxu0 %v1151_v48  ;;  %1534 = vmatmul.mubr.bf16.gmra.mrb[8].mxu1 %v1151_v48  ;;  %912 = vst.msk [vmem:[#allocation2 + $0x70] sm:$0xff] %vm904_vm4, %v847_v51 }
  0xc8   : > { %911 = vst.msk [vmem:[#allocation2 + $0x60] sm:$0xff] %vm904_vm4, %v845_v52  ;;  %1019 = vrot.lane.b32.xlu1 %v950_v49, %s4032_s24 }
  0xc9   : > { %1017 = vrot.lane.b32.xlu0 %v949_v50, %s4032_s24 }
  0xca   : > { %v992_v55 = vpop.permute.xlu1 %991 }
  0xcb   : > { %v990_v56 = vpop.permute.xlu0 %989  ;;  %1065 = vst.msk [vmem:[#allocation2 + $0x70] sm:$0xff] %vm1049_vm5, %v992_v55 }
  0xcc   : > { %1066 = vst.msk [vmem:[#allocation2 + $0x78] sm:$0xff] %vm1051_vm6, %v992_v55  ;;  %1064 = vst.msk [vmem:[#allocation2 + $0x68] sm:$0xff] %vm1051_vm6, %v990_v56  ;;  %588 = vrot.lane.b32.xlu1 %v517_v53, %s4030_s27 }
  0xcd   : > { %1063 = vst.msk [vmem:[#allocation2 + $0x60] sm:$0xff] %vm1049_vm5, %v990_v56  ;;  %586 = vrot.lane.b32.xlu0 %v516_v54, %s4030_s27 }
  0xce   : > { %v561_v59 = vpop.permute.xlu1 %560 }
  0xcf   : > { %v559_v60 = vpop.permute.xlu0 %558  ;;  %624 = vst.msk [vmem:[#allocation2 + $0x90] sm:$0xff] %vm614_vm2, %v561_v59 }
  0xd0   : > { %623 = vst.msk [vmem:[#allocation2 + $0x80] sm:$0xff] %vm614_vm2, %v559_v60  ;;  %733 = vrot.lane.b32.xlu1 %v662_v57, %s4029_s20 }
  0xd1   : > { %731 = vrot.lane.b32.xlu0 %v661_v58, %s4029_s20  ;;  %s5212_s20 = smov 88  }
  0xd2   : > { %v706_v63 = vpop.permute.xlu1 %705  ;;  %v1113_v5 = vld [vmem:[#allocation2 + $0x70] sm:$0xff] }
  0xd3   : > { %v704_v0 = vpop.permute.xlu0 %703  ;;  %v1112_v1 = vld [vmem:[#allocation2 + $0x68] sm:$0xff]  ;;  %v1114_v2 = vld [vmem:[#allocation2 + $0x78] sm:$0xff]  ;;  %769 = vst.msk [vmem:[#allocation2 + $0x90] sm:$0xff] %vm759_vm3, %v706_v63 }
  0xd4   : > { %v1111_v3 = vld [vmem:[#allocation2 + $0x60] sm:$0xff]  ;;  %768 = vst.msk [vmem:[#allocation2 + $0x80] sm:$0xff] %vm759_vm3, %v704_v0  ;;  %v1154_v4 = vpack.c.bf16 %v1114_v2, %v1112_v1  ;;  %878 = vrot.lane.b32.xlu1 %v807_v61, %s5220_s21 }
  0xd5   : > { %876 = vrot.lane.b32.xlu0 %v806_v62, %s5220_s21  ;;  %v1153_v6 = vpack.c.bf16 %v1113_v5, %v1111_v3  ;;  %s3589_s21 = sshll.u32 %s4132_s29, 7  ;;  %s4040_s29 = smov [#allocation8]  }
  0xd6   : > { %3467 = vmatprep.mubr.msk.bf16.mxu0 %vm1051_vm6, %v1154_v4  ;;  %3488 = vmatprep.mubr.msk.bf16.mxu1 %vm1051_vm6, %v1154_v4  ;;  %v851_v9 = vpop.permute.xlu1 %850 }
  0xd7   : > { %v849_v10 = vpop.permute.xlu0 %848  ;;  %1339 = vmatmul.mubr.bf16.gmra.mrb[12].mxu0 %v1153_v6  ;;  %1542 = vmatmul.mubr.bf16.gmra.mrb[12].mxu1 %v1153_v6  ;;  %914 = vst.msk [vmem:[#allocation2 + $0x90] sm:$0xff] %vm904_vm4, %v851_v9 }
  0xd8   : > { %913 = vst.msk [vmem:[#allocation2 + $0x80] sm:$0xff] %vm904_vm4, %v849_v10  ;;  %1023 = vrot.lane.b32.xlu1 %v952_v7, %s4032_s24 }
  0xd9   : > { %1021 = vrot.lane.b32.xlu0 %v951_v8, %s4032_s24 }
  0xda   : > { %v996_v11 = vpop.permute.xlu1 %995 }
  0xdb   : > { %v994_v12 = vpop.permute.xlu0 %993  ;;  %1069 = vst.msk [vmem:[#allocation2 + $0x90] sm:$0xff] %vm1049_vm5, %v996_v11 }
  0xdc   : > { %1070 = vst.msk [vmem:[#allocation2 + $0x98] sm:$0xff] %vm1051_vm6, %v996_v11  ;;  %1068 = vst.msk [vmem:[#allocation2 + $0x88] sm:$0xff] %vm1051_vm6, %v994_v12 }
  0xdd   : > { %1067 = vst.msk [vmem:[#allocation2 + $0x80] sm:$0xff] %vm1049_vm5, %v994_v12 }
  0xde   : > { %v565_v13 = vpop.permute.xlu1 %564 }
  0xdf   : > { %v563_v14 = vpop.permute.xlu0 %562  ;;  %626 = vst.msk [vmem:[#allocation2 + $0xb0] sm:$0xff] %vm614_vm2, %v565_v13 }
  0xe0   : > { %625 = vst.msk [vmem:[#allocation2 + $0xa0] sm:$0xff] %vm614_vm2, %v563_v14 }
  0xe2   : > { %v710_v15 = vpop.permute.xlu1 %709  ;;  %v1117_v21 = vld [vmem:[#allocation2 + $0x90] sm:$0xff] }
  0xe3   : > { %v708_v16 = vpop.permute.xlu0 %707  ;;  %v1116_v17 = vld [vmem:[#allocation2 + $0x88] sm:$0xff]  ;;  %v1118_v18 = vld [vmem:[#allocation2 + $0x98] sm:$0xff]  ;;  %771 = vst.msk [vmem:[#allocation2 + $0xb0] sm:$0xff] %vm759_vm3, %v710_v15 }
  0xe4   : > { %v1115_v19 = vld [vmem:[#allocation2 + $0x80] sm:$0xff]  ;;  %770 = vst.msk [vmem:[#allocation2 + $0xa0] sm:$0xff] %vm759_vm3, %v708_v16  ;;  %v1156_v20 = vpack.c.bf16 %v1118_v18, %v1116_v17 }
  0xe5   : > { %v1155_v22 = vpack.c.bf16 %v1117_v21, %v1115_v19 }
  0xe6   : > { %3468 = vmatprep.mubr.msk.bf16.mxu0 %vm1051_vm6, %v1156_v20  ;;  %3489 = vmatprep.mubr.msk.bf16.mxu1 %vm1051_vm6, %v1156_v20  ;;  %v855_v23 = vpop.permute.xlu1 %854 }
  0xe7   : > { %v853_v24 = vpop.permute.xlu0 %852  ;;  %1347 = vmatmul.mubr.bf16.gmra.mrb[16].mxu0 %v1155_v22  ;;  %1550 = vmatmul.mubr.bf16.gmra.mrb[16].mxu1 %v1155_v22  ;;  %916 = vst.msk [vmem:[#allocation2 + $0xb0] sm:$0xff] %vm904_vm4, %v855_v23 }
  0xe8   : > { %915 = vst.msk [vmem:[#allocation2 + $0xa0] sm:$0xff] %vm904_vm4, %v853_v24 }
  0xea   : > { %v1000_v25 = vpop.permute.xlu1 %999 }
  0xeb   : > { %v998_v26 = vpop.permute.xlu0 %997  ;;  %1073 = vst.msk [vmem:[#allocation2 + $0xb0] sm:$0xff] %vm1049_vm5, %v1000_v25 }
  0xec   : > { %1074 = vst.msk [vmem:[#allocation2 + $0xb8] sm:$0xff] %vm1051_vm6, %v1000_v25  ;;  %1072 = vst.msk [vmem:[#allocation2 + $0xa8] sm:$0xff] %vm1051_vm6, %v998_v26 }
  0xed   : > { %1071 = vst.msk [vmem:[#allocation2 + $0xa0] sm:$0xff] %vm1049_vm5, %v998_v26 }
  0xee   : > { %v569_v27 = vpop.permute.xlu1 %568 }
  0xef   : > { %v567_v28 = vpop.permute.xlu0 %566  ;;  %628 = vst.msk [vmem:[#allocation2 + $0xd0] sm:$0xff] %vm614_vm2, %v569_v27 }
  0xf0   : > { %627 = vst.msk [vmem:[#allocation2 + $0xc0] sm:$0xff] %vm614_vm2, %v567_v28 }
  0xf2   : > { %v714_v29 = vpop.permute.xlu1 %713  ;;  %v1121_v35 = vld [vmem:[#allocation2 + $0xb0] sm:$0xff] }
  0xf3   : > { %v712_v30 = vpop.permute.xlu0 %711  ;;  %v1120_v31 = vld [vmem:[#allocation2 + $0xa8] sm:$0xff]  ;;  %v1122_v32 = vld [vmem:[#allocation2 + $0xb8] sm:$0xff]  ;;  %773 = vst.msk [vmem:[#allocation2 + $0xd0] sm:$0xff] %vm759_vm3, %v714_v29 }
  0xf4   : > { %v1119_v33 = vld [vmem:[#allocation2 + $0xa0] sm:$0xff]  ;;  %772 = vst.msk [vmem:[#allocation2 + $0xc0] sm:$0xff] %vm759_vm3, %v712_v30  ;;  %v1158_v34 = vpack.c.bf16 %v1122_v32, %v1120_v31 }
  0xf5   : > { %v1157_v36 = vpack.c.bf16 %v1121_v35, %v1119_v33 }
  0xf6   : > { %3469 = vmatprep.mubr.msk.bf16.mxu0 %vm1051_vm6, %v1158_v34  ;;  %3490 = vmatprep.mubr.msk.bf16.mxu1 %vm1051_vm6, %v1158_v34  ;;  %v859_v37 = vpop.permute.xlu1 %858 }
  0xf7   : > { %v857_v38 = vpop.permute.xlu0 %856  ;;  %1355 = vmatmul.mubr.bf16.gmra.mrb[20].mxu0 %v1157_v36  ;;  %1558 = vmatmul.mubr.bf16.gmra.mrb[20].mxu1 %v1157_v36  ;;  %918 = vst.msk [vmem:[#allocation2 + $0xd0] sm:$0xff] %vm904_vm4, %v859_v37 }
  0xf8   : > { %917 = vst.msk [vmem:[#allocation2 + $0xc0] sm:$0xff] %vm904_vm4, %v857_v38 }
  0xfa   : > { %v1004_v39 = vpop.permute.xlu1 %1003 }
  0xfb   : > { %v1002_v40 = vpop.permute.xlu0 %1001  ;;  %1077 = vst.msk [vmem:[#allocation2 + $0xd0] sm:$0xff] %vm1049_vm5, %v1004_v39 }
  0xfc   : > { %1078 = vst.msk [vmem:[#allocation2 + $0xd8] sm:$0xff] %vm1051_vm6, %v1004_v39  ;;  %1076 = vst.msk [vmem:[#allocation2 + $0xc8] sm:$0xff] %vm1051_vm6, %v1002_v40 }
  0xfd   : > { %1075 = vst.msk [vmem:[#allocation2 + $0xc0] sm:$0xff] %vm1049_vm5, %v1002_v40 }
  0xfe   : > { %v573_v41 = vpop.permute.xlu1 %572 }
  0xff   : > { %v571_v42 = vpop.permute.xlu0 %570  ;;  %630 = vst.msk [vmem:[#allocation2 + $0xf0] sm:$0xff] %vm614_vm2, %v573_v41 }
 0x100   : > { %629 = vst.msk [vmem:[#allocation2 + $0xe0] sm:$0xff] %vm614_vm2, %v571_v42 }
 0x102   : > { %v718_v43 = vpop.permute.xlu1 %717  ;;  %v1125_v49 = vld [vmem:[#allocation2 + $0xd0] sm:$0xff] }
 0x103   : > { %v716_v44 = vpop.permute.xlu0 %715  ;;  %v1124_v45 = vld [vmem:[#allocation2 + $0xc8] sm:$0xff]  ;;  %v1126_v46 = vld [vmem:[#allocation2 + $0xd8] sm:$0xff]  ;;  %775 = vst.msk [vmem:[#allocation2 + $0xf0] sm:$0xff] %vm759_vm3, %v718_v43 }
 0x104   : > { %v1123_v47 = vld [vmem:[#allocation2 + $0xc0] sm:$0xff]  ;;  %774 = vst.msk [vmem:[#allocation2 + $0xe0] sm:$0xff] %vm759_vm3, %v716_v44  ;;  %v1160_v48 = vpack.c.bf16 %v1126_v46, %v1124_v45 }
 0x105   : > { %v1159_v50 = vpack.c.bf16 %v1125_v49, %v1123_v47 }
 0x106   : > { %3470 = vmatprep.mubr.msk.bf16.mxu0 %vm1051_vm6, %v1160_v48  ;;  %3491 = vmatprep.mubr.msk.bf16.mxu1 %vm1051_vm6, %v1160_v48  ;;  %v863_v51 = vpop.permute.xlu1 %862 }
 0x107   : > { %v861_v52 = vpop.permute.xlu0 %860  ;;  %1363 = vmatmul.mubr.bf16.gmra.mrb[24].mxu0 %v1159_v50  ;;  %1566 = vmatmul.mubr.bf16.gmra.mrb[24].mxu1 %v1159_v50  ;;  %920 = vst.msk [vmem:[#allocation2 + $0xf0] sm:$0xff] %vm904_vm4, %v863_v51 }
 0x108   : > { %919 = vst.msk [vmem:[#allocation2 + $0xe0] sm:$0xff] %vm904_vm4, %v861_v52 }
 0x10a   : > { %v1008_v53 = vpop.permute.xlu1 %1007 }
 0x10b   : > { %v1006_v54 = vpop.permute.xlu0 %1005  ;;  %1081 = vst.msk [vmem:[#allocation2 + $0xf0] sm:$0xff] %vm1049_vm5, %v1008_v53 }
 0x10c   : > { %1082 = vst.msk [vmem:[#allocation2 + $0xf8] sm:$0xff] %vm1051_vm6, %v1008_v53  ;;  %1080 = vst.msk [vmem:[#allocation2 + $0xe8] sm:$0xff] %vm1051_vm6, %v1006_v54 }
 0x10d   : > { %1079 = vst.msk [vmem:[#allocation2 + $0xe0] sm:$0xff] %vm1049_vm5, %v1006_v54 }
 0x10e   : > { %v577_v55 = vpop.permute.xlu1 %576 }
 0x10f   : > { %v575_v56 = vpop.permute.xlu0 %574  ;;  %632 = vst.msk [vmem:[#allocation2 + $0x110] sm:$0xff] %vm614_vm2, %v577_v55  ;;  %v4626_v55 = vld [vmem:[%s5196_s3] ss:$0 sm:$0xff] }
 0x110   : > { %631 = vst.msk [vmem:[#allocation2 + $0x100] sm:$0xff] %vm614_vm2, %v575_v56 }
 0x112   : > { %v722_v57 = vpop.permute.xlu1 %721  ;;  %v1129_v63 = vld [vmem:[#allocation2 + $0xf0] sm:$0xff] }
 0x113   : > { %v720_v58 = vpop.permute.xlu0 %719  ;;  %v1128_v59 = vld [vmem:[#allocation2 + $0xe8] sm:$0xff]  ;;  %v1130_v60 = vld [vmem:[#allocation2 + $0xf8] sm:$0xff]  ;;  %777 = vst.msk [vmem:[#allocation2 + $0x110] sm:$0xff] %vm759_vm3, %v722_v57 }
 0x114   : > { %v1127_v61 = vld [vmem:[#allocation2 + $0xe0] sm:$0xff]  ;;  %776 = vst.msk [vmem:[#allocation2 + $0x100] sm:$0xff] %vm759_vm3, %v720_v58  ;;  %v1162_v62 = vpack.c.bf16 %v1130_v60, %v1128_v59 }
 0x115   : > { %v1161_v0 = vpack.c.bf16 %v1129_v63, %v1127_v61 }
 0x116   : > { %3471 = vmatprep.mubr.msk.bf16.mxu0 %vm1051_vm6, %v1162_v62  ;;  %3492 = vmatprep.mubr.msk.bf16.mxu1 %vm1051_vm6, %v1162_v62  ;;  %v867_v1 = vpop.permute.xlu1 %866 }
 0x117   : > { %v865_v2 = vpop.permute.xlu0 %864  ;;  %1371 = vmatmul.mubr.bf16.gmra.mrb[28].mxu0 %v1161_v0  ;;  %1574 = vmatmul.mubr.bf16.gmra.mrb[28].mxu1 %v1161_v0  ;;  %922 = vst.msk [vmem:[#allocation2 + $0x110] sm:$0xff] %vm904_vm4, %v867_v1 }
 0x118   : > { %921 = vst.msk [vmem:[#allocation2 + $0x100] sm:$0xff] %vm904_vm4, %v865_v2 }
 0x11a   : > { %v1012_v3 = vpop.permute.xlu1 %1011 }
 0x11b   : > { %v1010_v4 = vpop.permute.xlu0 %1009  ;;  %1085 = vst.msk [vmem:[#allocation2 + $0x110] sm:$0xff] %vm1049_vm5, %v1012_v3 }
 0x11c   : > { %1086 = vst.msk [vmem:[#allocation2 + $0x118] sm:$0xff] %vm1051_vm6, %v1012_v3  ;;  %1084 = vst.msk [vmem:[#allocation2 + $0x108] sm:$0xff] %vm1051_vm6, %v1010_v4 }
 0x11d   : > { %1083 = vst.msk [vmem:[#allocation2 + $0x100] sm:$0xff] %vm1049_vm5, %v1010_v4 }
 0x11e   : > { %v581_v5 = vpop.permute.xlu1 %580 }
 0x11f   : > { %v579_v6 = vpop.permute.xlu0 %578  ;;  %634 = vst.msk [vmem:[#allocation2 + $0x130] sm:$0xff] %vm614_vm2, %v581_v5 }
 0x120   : > { %633 = vst.msk [vmem:[#allocation2 + $0x120] sm:$0xff] %vm614_vm2, %v579_v6 }
 0x122   : > { %v726_v7 = vpop.permute.xlu1 %725  ;;  %v1133_v13 = vld [vmem:[#allocation2 + $0x110] sm:$0xff] }
 0x123   : > { %v724_v8 = vpop.permute.xlu0 %723  ;;  %v1132_v9 = vld [vmem:[#allocation2 + $0x108] sm:$0xff]  ;;  %v1134_v10 = vld [vmem:[#allocation2 + $0x118] sm:$0xff]  ;;  %779 = vst.msk [vmem:[#allocation2 + $0x130] sm:$0xff] %vm759_vm3, %v726_v7 }
 0x124   : > { %v1131_v11 = vld [vmem:[#allocation2 + $0x100] sm:$0xff]  ;;  %778 = vst.msk [vmem:[#allocation2 + $0x120] sm:$0xff] %vm759_vm3, %v724_v8  ;;  %v1164_v12 = vpack.c.bf16 %v1134_v10, %v1132_v9 }
 0x125   : > { %v1163_v14 = vpack.c.bf16 %v1133_v13, %v1131_v11 }
 0x126   : > { %3472 = vmatprep.mubr.msk.bf16.mxu0 %vm1051_vm6, %v1164_v12  ;;  %3493 = vmatprep.mubr.msk.bf16.mxu1 %vm1051_vm6, %v1164_v12  ;;  %v871_v15 = vpop.permute.xlu1 %870 }
 0x127   : > { %v869_v16 = vpop.permute.xlu0 %868  ;;  %1379 = vmatmul.mubr.bf16.gmra.mrb[32].mxu0 %v1163_v14  ;;  %1582 = vmatmul.mubr.bf16.gmra.mrb[32].mxu1 %v1163_v14  ;;  %924 = vst.msk [vmem:[#allocation2 + $0x130] sm:$0xff] %vm904_vm4, %v871_v15 }
 0x128   : > { %923 = vst.msk [vmem:[#allocation2 + $0x120] sm:$0xff] %vm904_vm4, %v869_v16 }
 0x12a   : > { %v1016_v17 = vpop.permute.xlu1 %1015 }
 0x12b   : > { %v1014_v18 = vpop.permute.xlu0 %1013  ;;  %1089 = vst.msk [vmem:[#allocation2 + $0x130] sm:$0xff] %vm1049_vm5, %v1016_v17 }
 0x12c   : > { %1090 = vst.msk [vmem:[#allocation2 + $0x138] sm:$0xff] %vm1051_vm6, %v1016_v17  ;;  %1088 = vst.msk [vmem:[#allocation2 + $0x128] sm:$0xff] %vm1051_vm6, %v1014_v18 }
 0x12d   : > { %1087 = vst.msk [vmem:[#allocation2 + $0x120] sm:$0xff] %vm1049_vm5, %v1014_v18 }
 0x12e   : > { %v585_v19 = vpop.permute.xlu1 %584 }
 0x12f   : > { %v583_v20 = vpop.permute.xlu0 %582  ;;  %636 = vst.msk [vmem:[#allocation2 + $0x150] sm:$0xff] %vm614_vm2, %v585_v19 }
 0x130   : > { %635 = vst.msk [vmem:[#allocation2 + $0x140] sm:$0xff] %vm614_vm2, %v583_v20 }
 0x132   : > { %v730_v21 = vpop.permute.xlu1 %729  ;;  %v1137_v27 = vld [vmem:[#allocation2 + $0x130] sm:$0xff] }
 0x133   : > { %v728_v22 = vpop.permute.xlu0 %727  ;;  %v1136_v23 = vld [vmem:[#allocation2 + $0x128] sm:$0xff]  ;;  %v1138_v24 = vld [vmem:[#allocation2 + $0x138] sm:$0xff]  ;;  %781 = vst.msk [vmem:[#allocation2 + $0x150] sm:$0xff] %vm759_vm3, %v730_v21 }
 0x134   : > { %v1135_v25 = vld [vmem:[#allocation2 + $0x120] sm:$0xff]  ;;  %780 = vst.msk [vmem:[#allocation2 + $0x140] sm:$0xff] %vm759_vm3, %v728_v22  ;;  %v1166_v26 = vpack.c.bf16 %v1138_v24, %v1136_v23 }
 0x135   : > { %v1165_v28 = vpack.c.bf16 %v1137_v27, %v1135_v25 }
 0x136   : > { %3473 = vmatprep.mubr.msk.bf16.mxu0 %vm1051_vm6, %v1166_v26  ;;  %3494 = vmatprep.mubr.msk.bf16.mxu1 %vm1051_vm6, %v1166_v26  ;;  %v875_v29 = vpop.permute.xlu1 %874 }
 0x137   : > { %v873_v30 = vpop.permute.xlu0 %872  ;;  %1387 = vmatmul.mubr.bf16.gmra.mrb[36].mxu0 %v1165_v28  ;;  %1590 = vmatmul.mubr.bf16.gmra.mrb[36].mxu1 %v1165_v28  ;;  %926 = vst.msk [vmem:[#allocation2 + $0x150] sm:$0xff] %vm904_vm4, %v875_v29 }
 0x138   : > { %925 = vst.msk [vmem:[#allocation2 + $0x140] sm:$0xff] %vm904_vm4, %v873_v30  ;;  %v3884_v30 = vld [vmem:[%s5197_s4 + $0x40] sm:$0xff]  }
 0x139   : > { %3593 = vmatprep.subr.bf16.mxu0 %v3884_v30 }
 0x13a   : > { %v1020_v31 = vpop.permute.xlu1 %1019 }
 0x13b   : > { %v1018_v32 = vpop.permute.xlu0 %1017  ;;  %1093 = vst.msk [vmem:[#allocation2 + $0x150] sm:$0xff] %vm1049_vm5, %v1020_v31 }
 0x13c   : > { %1094 = vst.msk [vmem:[#allocation2 + $0x158] sm:$0xff] %vm1051_vm6, %v1020_v31  ;;  %1092 = vst.msk [vmem:[#allocation2 + $0x148] sm:$0xff] %vm1051_vm6, %v1018_v32 }
 0x13d   : > { %1091 = vst.msk [vmem:[#allocation2 + $0x140] sm:$0xff] %vm1049_vm5, %v1018_v32 }
 0x13e   : > { %v589_v33 = vpop.permute.xlu1 %588 }
 0x13f   : > { %v587_v34 = vpop.permute.xlu0 %586  ;;  %638 = vst.msk [vmem:[#allocation2 + $0x170] sm:$0xff] %vm614_vm2, %v589_v33  ;;  %v3885_v33 = vld [vmem:[%s5197_s4] sm:$0xff]  }
 0x140   : > { %637 = vst.msk [vmem:[#allocation2 + $0x160] sm:$0xff] %vm614_vm2, %v587_v34  ;;  %3594 = vmatpush3.bf16.msra.mxu0 %v3885_v33  ;;  %vm2793_vm2 = vcmask 1041409  }
 0x142   : > { %v734_v35 = vpop.permute.xlu1 %733  ;;  %v1141_v41 = vld [vmem:[#allocation2 + $0x150] sm:$0xff] }
 0x143   : > { %v732_v36 = vpop.permute.xlu0 %731  ;;  %v1140_v37 = vld [vmem:[#allocation2 + $0x148] sm:$0xff]  ;;  %v1142_v38 = vld [vmem:[#allocation2 + $0x158] sm:$0xff]  ;;  %783 = vst.msk [vmem:[#allocation2 + $0x170] sm:$0xff] %vm759_vm3, %v734_v35 }
 0x144   : > { %v1139_v39 = vld [vmem:[#allocation2 + $0x140] sm:$0xff]  ;;  %782 = vst.msk [vmem:[#allocation2 + $0x160] sm:$0xff] %vm759_vm3, %v732_v36  ;;  %v1168_v40 = vpack.c.bf16 %v1142_v38, %v1140_v37  ;;  %vm2796_vm3 = vcmask 1042434  }
 0x145   : > { %v1167_v42 = vpack.c.bf16 %v1141_v41, %v1139_v39  ;;  %v3887_v41 = vld [vmem:[%s5197_s4 + $0x8] sm:$0xff]  }
 0x146   : > { %3474 = vmatprep.mubr.msk.bf16.mxu0 %vm1051_vm6, %v1168_v40  ;;  %3495 = vmatprep.mubr.msk.bf16.mxu1 %vm1051_vm6, %v1168_v40  ;;  %v879_v43 = vpop.permute.xlu1 %878  ;;  %v3886_v40 = vld [vmem:[%s5197_s4 + $0x48] sm:$0xff]  }
 0x147   : > { %v877_v44 = vpop.permute.xlu0 %876  ;;  %1395 = vmatmul.mubr.bf16.gmra.mrb[40].mxu0 %v1167_v42  ;;  %1598 = vmatmul.mubr.bf16.gmra.mrb[40].mxu1 %v1167_v42  ;;  %928 = vst.msk [vmem:[#allocation2 + $0x170] sm:$0xff] %vm904_vm4, %v879_v43 }
 0x148   : > { %927 = vst.msk [vmem:[#allocation2 + $0x160] sm:$0xff] %vm904_vm4, %v877_v44  ;;  %3595 = vmatprep.subr.bf16.mxu0 %v3886_v40  ;;  %v3888_v44 = vld [vmem:[%s5197_s4 + $0x50] sm:$0xff]   ;;  %vm2799_vm4 = vcmask 1043459  }
 0x149   : > { %3596 = vmatpush3.bf16.msra.mxu0 %v3887_v41 }
 0x14a   : > { %v1024_v45 = vpop.permute.xlu1 %1023  ;;  %3597 = vmatprep.subr.bf16.mxu0 %v3888_v44 }
 0x14b   : > { %v1022_v46 = vpop.permute.xlu0 %1021  ;;  %1097 = vst.msk [vmem:[#allocation2 + $0x170] sm:$0xff] %vm1049_vm5, %v1024_v45 }
 0x14c   : > { %1098 = vst.msk [vmem:[#allocation2 + $0x178] sm:$0xff] %vm1051_vm6, %v1024_v45  ;;  %1096 = vst.msk [vmem:[#allocation2 + $0x168] sm:$0xff] %vm1051_vm6, %v1022_v46  ;;  %v3889_v45 = vld [vmem:[%s5197_s4 + $0x10] sm:$0xff]  }
 0x14d   : > { %1095 = vst.msk [vmem:[#allocation2 + $0x160] sm:$0xff] %vm1049_vm5, %v1022_v46  ;;  %3598 = vmatpush3.bf16.msra.mxu0 %v3889_v45  ;;  %vm2802_vm5 = vcmask 1044484  }
 0x152   : > { %v1145_v51 = vld [vmem:[#allocation2 + $0x170] sm:$0xff] }
 0x153   : > { %v1144_v47 = vld [vmem:[#allocation2 + $0x168] sm:$0xff]  ;;  %v1146_v48 = vld [vmem:[#allocation2 + $0x178] sm:$0xff] }
 0x154   : > { %v1143_v49 = vld [vmem:[#allocation2 + $0x160] sm:$0xff]  ;;  %v1170_v50 = vpack.c.bf16 %v1146_v48, %v1144_v47  ;;  %v3890_v47 = vld [vmem:[%s5197_s4 + $0x58] sm:$0xff]  }
 0x155   : > { %v1169_v52 = vpack.c.bf16 %v1145_v51, %v1143_v49  ;;  %3599 = vmatprep.subr.bf16.mxu0 %v3890_v47 }
 0x156   : > { %3475 = vmatprep.mubr.msk.bf16.mxu0 %vm1051_vm6, %v1170_v50  ;;  %3496 = vmatprep.mubr.msk.bf16.mxu1 %vm1051_vm6, %v1170_v50  ;;  %v3891_v50 = vld [vmem:[%s5197_s4 + $0x18] sm:$0xff]   ;;  %vm2805_vm6 = vcmask 1045509  }
 0x157   : > { %1403 = vmatmul.mubr.bf16.gmra.mrb[44].mxu0 %v1169_v52  ;;  %1606 = vmatmul.mubr.bf16.gmra.mrb[44].mxu1 %v1169_v52 }
 0x158   : > { %3600 = vmatpush3.bf16.msra.mxu0 %v3891_v50 }
 0x17a   : > { %v1316_v53 = vpop.f32.mrb[0].mxu0  ;;  %v1519_v54 = vpop.f32.mrb[0].mxu1 }
 0x17b   : > { %v1614_v56 = vmax.f32 %v1316_v53, %v1519_v54  ;;  %v1318_v57 = vpop.f32.mrb[1].mxu0  ;;  %v1521_v58 = vpop.f32.mrb[1].mxu1 }
 0x17c   : > { %v1319_v59 = vpop.f32.mrb[2].mxu0  ;;  %v1522_v60 = vpop.f32.mrb[2].mxu1 }
 0x17d   : > { %v1645_v61 = vadd.f32 %v4626_v55, %v1614_v56  ;;  %v1615_v62 = vmax.f32 %v1319_v59, %v1522_v60  ;;  %v1321_v63 = vpop.f32.mrb[3].mxu0  ;;  %v1524_v0 = vpop.f32.mrb[3].mxu1 }
 0x17f   : > { %v1669_v1 = vmax.f32 %v1645_v61, 0.0  ;;  %v1646_v2 = vadd.f32 %v4626_v55, %v1615_v62  ;;  %v3892_v61 = vld [vmem:[%s5197_s4 + $0x60] sm:$0xff]  }
 0x180   : > { %3601 = vmatprep.subr.bf16.mxu0 %v3892_v61 }
 0x181   : > { %1694 = vst.msk [vmem:[#allocation3] sm:$0xff] %vm1693_vm7, %v1669_v1  ;;  %v1670_v3 = vmax.f32 %v1646_v2, 0.0  ;;  %v3893_v1 = vld [vmem:[%s5197_s4 + $0x20] sm:$0xff]  }
 0x182   : > { %3602 = vmatpush3.bf16.msra.mxu0 %v3893_v1 }
 0x183   : > { %1695 = vst.msk [vmem:[#allocation3 + $0x8] sm:$0xff] %vm1693_vm7, %v1670_v3 }
 0x18a   : > { %v1324_v4 = vpop.f32.mrb[4].mxu0  ;;  %v1527_v5 = vpop.f32.mrb[4].mxu1  ;;  %v1718_v6 = vld [vmem:[#allocation3] ss:$2 sm:$0xff]  ;;  %v1750_v7 = vld [vmem:[#allocation3 + $0x1] ss:$2 sm:$0xff] }
 0x18b   : > { %v1616_v8 = vmax.f32 %v1324_v4, %v1527_v5  ;;  %v1326_v9 = vpop.f32.mrb[5].mxu0  ;;  %v1529_v10 = vpop.f32.mrb[5].mxu1  ;;  %v1781_v11 = vmax.f32 %v1718_v6, %v1750_v7 }
 0x18c   : > { %v1327_v12 = vpop.f32.mrb[6].mxu0  ;;  %v1530_v13 = vpop.f32.mrb[6].mxu1  ;;  %v3894_v9 = vld [vmem:[%s5197_s4 + $0x68] sm:$0xff]  }
 0x18d   : > { %v1647_v14 = vadd.f32 %v4626_v55, %v1616_v8  ;;  %v1617_v15 = vmax.f32 %v1327_v12, %v1530_v13  ;;  %v1329_v16 = vpop.f32.mrb[7].mxu0  ;;  %v1532_v17 = vpop.f32.mrb[7].mxu1  ;;  %1797 = vst.msk [vmem:[#allocation4] sm:$0xff] %vm1693_vm7, %v1781_v11  ;;  %v3895_v10 = vld [vmem:[%s5197_s4 + $0x28] sm:$0xff]   ;;  %3603 = vmatprep.subr.bf16.mxu0 %v3894_v9  ;;  %v3896_v13 = vld [vmem:[%s5197_s4 + $0x70] sm:$0xff]  }
 0x18e   : > { %3604 = vmatpush3.bf16.msra.mxu0 %v3895_v10  ;;  %v3898_v16 = vld [vmem:[%s5197_s4 + $0x78] sm:$0xff]  }
 0x18f   : > { %v1671_v18 = vmax.f32 %v1647_v14, 0.0  ;;  %v1648_v19 = vadd.f32 %v4626_v55, %v1617_v15  ;;  %v3897_v14 = vld [vmem:[%s5197_s4 + $0x30] sm:$0xff]   ;;  %3605 = vmatprep.subr.bf16.mxu0 %v3896_v13  ;;  %v3899_v17 = vld [vmem:[%s5197_s4 + $0x38] sm:$0xff]  }
 0x190   : > { %v3903_v10 = vld [vmem:[%s5197_s4 + $0x98] sm:$0xff]  }
 0x191   : > { %1696 = vst.msk [vmem:[#allocation3 + $0x10] sm:$0xff] %vm1693_vm7, %v1671_v18  ;;  %v1672_v20 = vmax.f32 %v1648_v19, 0.0 }
 0x192   : > { %3606 = vmatpush3.bf16.msra.mxu0 %v3897_v14 }
 0x193   : > { %1697 = vst.msk [vmem:[#allocation3 + $0x18] sm:$0xff] %vm1693_vm7, %v1672_v20  ;;  %3607 = vmatprep.subr.bf16.mxu0 %v3898_v16 }
 0x194   : > { %v1814_v21 = vld [vmem:[#allocation4] sm:$0xff] }
 0x195   : > { %1822 = vst.msk [vmem:[#allocation5] sm:$0xff] %vm1693_vm7, %v1814_v21 }
 0x196   : > { %3608 = vmatpush3.bf16.msra.mxu0 %v3899_v17 }
 0x198   : > { %v1720_v22 = vld [vmem:[#allocation3 + $0x10] ss:$2 sm:$0xf]  ;;  %v1752_v23 = vld [vmem:[#allocation3 + $0x11] ss:$2 sm:$0xf] }
 0x199   : > { %v1782_v24 = vmax.f32 %v1720_v22, %v1752_v23 }
 0x19a   : > { %v1332_v25 = vpop.f32.mrb[8].mxu0  ;;  %v1535_v26 = vpop.f32.mrb[8].mxu1 }
 0x19b   : > { %v1618_v27 = vmax.f32 %v1332_v25, %v1535_v26  ;;  %v1334_v28 = vpop.f32.mrb[9].mxu0  ;;  %v1537_v29 = vpop.f32.mrb[9].mxu1  ;;  %1799 = vst.msk [vmem:[#allocation4 + $0x8] sm:$0xf] %vm1798_vm8, %v1782_v24 }
 0x19c   : > { %v1335_v31 = vpop.f32.mrb[10].mxu0  ;;  %v1538_v32 = vpop.f32.mrb[10].mxu1 }
 0x19d   : > { %v1649_v34 = vadd.f32 %v4626_v55, %v1618_v27  ;;  %v1619_v35 = vmax.f32 %v1335_v31, %v1538_v32  ;;  %v1337_v36 = vpop.f32.mrb[11].mxu0  ;;  %v1540_v37 = vpop.f32.mrb[11].mxu1 }
 0x19f   : > { %v1673_v38 = vmax.f32 %v1649_v34, 0.0  ;;  %v1650_v39 = vadd.f32 %v4626_v55, %v1619_v35 }
 0x1a1   : > { %1698 = vst.msk [vmem:[#allocation3 + $0x20] sm:$0xff] %vm1693_vm7, %v1673_v38  ;;  %v1674_v42 = vmax.f32 %v1650_v39, 0.0 }
 0x1a2   : > { %v1830_v43 = vld [vmem:[#allocation4 + $0x1] sm:$0xff] }
 0x1a3   : > { %1699 = vst.msk [vmem:[#allocation3 + $0x28] sm:$0xff] %vm1693_vm7, %v1674_v42  ;;  %1846 = vrot.lane.b32.xlu0 %v1830_v43, %s4033_s23  ;;  %v1888_v46 = vld [vmem:[#allocation4 + $0x2] sm:$0xff] }
 0x1a4   : > { %v1937_v54 = vld [vmem:[#allocation4 + $0x3] sm:$0xff] }
 0x1a5   : > { %v1995_v6 = vld [vmem:[#allocation4 + $0x4] sm:$0xff] }
 0x1a7   : > { %1904 = vrot.lane.b32.xlu0 %v1888_v46, %s4034_s22 }
 0x1a8   : > { %v1722_v48 = vld [vmem:[#allocation3 + $0x18] ss:$2 sm:$0xff]  ;;  %v1754_v49 = vld [vmem:[#allocation3 + $0x19] ss:$2 sm:$0xff] }
 0x1a9   : > { %v1783_v51 = vmax.f32 %v1722_v48, %v1754_v49 }
 0x1aa   : > { %v1340_v52 = vpop.f32.mrb[12].mxu0  ;;  %v1543_v53 = vpop.f32.mrb[12].mxu1  ;;  %v1724_v56 = vld [vmem:[#allocation3 + $0x28] ss:$2 sm:$0xf] }
 0x1ab   : > { %v1620_v57 = vmax.f32 %v1340_v52, %v1543_v53  ;;  %v1545_v58 = vpop.f32.mrb[13].mxu1  ;;  %1953 = vrot.lane.b32.xlu0 %v1937_v54, %s5212_s20  ;;  %v1342_v59 = vpop.f32.mrb[13].mxu0  ;;  %v1756_v60 = vld [vmem:[#allocation3 + $0x29] ss:$2 sm:$0xf]  ;;  %1800 = vst.msk [vmem:[#allocation4 + $0x10] sm:$0xff] %vm1693_vm7, %v1783_v51 }
 0x1ac   : > { %v1343_v62 = vpop.f32.mrb[14].mxu0  ;;  %v1546_v63 = vpop.f32.mrb[14].mxu1  ;;  %v1784_v0 = vmax.f32 %v1724_v56, %v1756_v60  ;;  %s5221_s20 = smov 88   ;;  %v3900_v58 = vld [vmem:[%s5197_s4 + $0x80] sm:$0xff]   ;;  %v3901_v60 = vld [vmem:[%s5197_s4 + $0x88] sm:$0xff]  }
 0x1ad   : > { %v1651_v2 = vadd.f32 %v4626_v55, %v1620_v57  ;;  %v1621_v3 = vmax.f32 %v1343_v62, %v1546_v63  ;;  %v1345_v4 = vpop.f32.mrb[15].mxu0  ;;  %v1548_v5 = vpop.f32.mrb[15].mxu1  ;;  %3733 = vmatprep.subr.bf16.mxu1 %v3900_v58  ;;  %v3902_v63 = vld [vmem:[%s5197_s4 + $0x90] sm:$0xff]  }
 0x1ae   : > { %1801 = vst.msk [vmem:[#allocation4 + $0x18] sm:$0xf] %vm1798_vm8, %v1784_v0  ;;  %3734 = vmatpush3.bf16.msra.mxu1 %v3900_v58 }
 0x1af   : > { %v1675_v7 = vmax.f32 %v1651_v2, 0.0  ;;  %v1652_v8 = vadd.f32 %v4626_v55, %v1621_v3  ;;  %2011 = vrot.lane.b32.xlu0 %v1995_v6, %s5210_s15  ;;  %s5222_s15 = smov 32   ;;  %3735 = vmatprep.subr.bf16.mxu1 %v3901_v60 }
 0x1b1   : > { %1700 = vst.msk [vmem:[#allocation3 + $0x30] sm:$0xff] %vm1693_vm7, %v1675_v7  ;;  %v1676_v11 = vmax.f32 %v1652_v8, 0.0 }
 0x1b2   : > { %v1815_v12 = vld [vmem:[#allocation4 + $0x10] sm:$0xff]  ;;  %3736 = vmatpush3.bf16.msra.mxu1 %v3901_v60 }
 0x1b3   : > { %1701 = vst.msk [vmem:[#allocation3 + $0x38] sm:$0xff] %vm1693_vm7, %v1676_v11  ;;  %1823 = vst.msk [vmem:[#allocation5 + $0x18] sm:$0xff] %vm1693_vm7, %v1815_v12  ;;  %3737 = vmatprep.subr.bf16.mxu1 %v3902_v63 }
 0x1b5   : > { %v1831_v15 = vld [vmem:[#allocation4 + $0x11] sm:$0xff] }
 0x1b6   : > { %1848 = vrot.lane.b32.xlu1 %v1831_v15, %s4033_s23  ;;  %v1889_v18 = vld [vmem:[#allocation4 + $0x12] sm:$0xff]  ;;  %3738 = vmatpush3.bf16.msra.mxu1 %v3902_v63 }
 0x1b7   : > { %v1938_v32 = vld [vmem:[#allocation4 + $0x13] sm:$0xff]  ;;  %3739 = vmatprep.subr.bf16.mxu1 %v3903_v10 }
 0x1b8   : > { %v1996_v37 = vld [vmem:[#allocation4 + $0x14] sm:$0xff] }
 0x1ba   : > { %v1726_v19 = vld [vmem:[#allocation3 + $0x30] ss:$2 sm:$0xff]  ;;  %v1758_v20 = vld [vmem:[#allocation3 + $0x31] ss:$2 sm:$0xff]  ;;  %1906 = vrot.lane.b32.xlu1 %v1889_v18, %s4034_s22  ;;  %v1348_v21 = vpop.f32.mrb[16].mxu0  ;;  %v1551_v22 = vpop.f32.mrb[16].mxu1  ;;  %3740 = vmatpush3.bf16.msra.mxu1 %v3903_v10 }
 0x1bb   : > { %v1622_v23 = vmax.f32 %v1348_v21, %v1551_v22  ;;  %v1350_v24 = vpop.f32.mrb[17].mxu0  ;;  %v1553_v25 = vpop.f32.mrb[17].mxu1  ;;  %v1785_v26 = vmax.f32 %v1726_v19, %v1758_v20  ;;  %v3904_v20 = vld [vmem:[%s5197_s4 + $0xa0] sm:$0xff]  }
 0x1bc   : > { %v1351_v27 = vpop.f32.mrb[18].mxu0  ;;  %v1554_v28 = vpop.f32.mrb[18].mxu1  ;;  %3741 = vmatprep.subr.bf16.mxu1 %v3904_v20  ;;  %v3905_v24 = vld [vmem:[%s5197_s4 + $0xa8] sm:$0xff]  }
 0x1bd   : > { %v1653_v29 = vadd.f32 %v4626_v55, %v1622_v23  ;;  %v1623_v30 = vmax.f32 %v1351_v27, %v1554_v28  ;;  %v1556_v31 = vpop.f32.mrb[19].mxu1  ;;  %v1353_v33 = vpop.f32.mrb[19].mxu0  ;;  %1802 = vst.msk [vmem:[#allocation4 + $0x20] sm:$0xff] %vm1693_vm7, %v1785_v26  ;;  %v3906_v28 = vld [vmem:[%s5197_s4 + $0xb0] ss:$0 sps:$4 sm:$0xff]  }
 0x1be   : > { %1955 = vrot.lane.b32.xlu1 %v1938_v32, %s5221_s20  ;;  %3742 = vmatpush3.bf16.msra.mxu1 %v3904_v20 }
 0x1bf   : > { %v1677_v34 = vmax.f32 %v1653_v29, 0.0  ;;  %v1654_v35 = vadd.f32 %v4626_v55, %v1623_v30  ;;  %3743 = vmatprep.subr.bf16.mxu1 %v3905_v24 }
 0x1c1   : > { %1702 = vst.msk [vmem:[#allocation3 + $0x40] sm:$0xff] %vm1693_vm7, %v1677_v34  ;;  %v1678_v36 = vmax.f32 %v1654_v35, 0.0 }
 0x1c2   : > { %2013 = vrot.lane.b32.xlu1 %v1996_v37, %s5222_s15  ;;  %3744 = vmatpush3.bf16.msra.mxu1 %v3905_v24 }
 0x1c3   : > { %1703 = vst.msk [vmem:[#allocation3 + $0x48] sm:$0xff] %vm1693_vm7, %v1678_v36  ;;  %3813 = vmatprep.subr.msk.bf16.mxu1 %vm2273_vm9, %v3906_v28 }
 0x1c4   : > { %v1816_v38 = vld [vmem:[#allocation4 + $0x20] sm:$0xff] }
 0x1c5   : > { %1824 = vst.msk [vmem:[#allocation5 + $0x30] sm:$0xff] %vm1693_vm7, %v1816_v38  ;;  %v2275_v38 = vsel %vm2273_vm9, %v3906_v28, 0 }
 0x1c6   : > { %3746 = vmatpush3.bf16.msra.mxu1 %v2275_v38 }
 0x1c8   : > { %v1728_v39 = vld [vmem:[#allocation3 + $0x40] ss:$2 sm:$0xf]  ;;  %v1760_v40 = vld [vmem:[#allocation3 + $0x41] ss:$2 sm:$0xf] }
 0x1c9   : > { %v1786_v41 = vmax.f32 %v1728_v39, %v1760_v40 }
 0x1ca   : > { %v1356_v42 = vpop.f32.mrb[20].mxu0  ;;  %v1559_v43 = vpop.f32.mrb[20].mxu1 }
 0x1cb   : > { %v1624_v44 = vmax.f32 %v1356_v42, %v1559_v43  ;;  %v1358_v45 = vpop.f32.mrb[21].mxu0  ;;  %v1561_v46 = vpop.f32.mrb[21].mxu1  ;;  %1803 = vst.msk [vmem:[#allocation4 + $0x28] sm:$0xf] %vm1798_vm8, %v1786_v41 }
 0x1cc   : > { %v1359_v47 = vpop.f32.mrb[22].mxu0  ;;  %v1562_v48 = vpop.f32.mrb[22].mxu1 }
 0x1cd   : > { %v1655_v49 = vadd.f32 %v4626_v55, %v1624_v44  ;;  %v1625_v50 = vmax.f32 %v1359_v47, %v1562_v48  ;;  %v1361_v51 = vpop.f32.mrb[23].mxu0  ;;  %v1564_v52 = vpop.f32.mrb[23].mxu1 }
 0x1cf   : > { %v1679_v53 = vmax.f32 %v1655_v49, 0.0  ;;  %v1656_v54 = vadd.f32 %v4626_v55, %v1625_v50 }
 0x1d1   : > { %1704 = vst.msk [vmem:[#allocation3 + $0x50] sm:$0xff] %vm1693_vm7, %v1679_v53  ;;  %v1680_v56 = vmax.f32 %v1656_v54, 0.0 }
 0x1d2   : > { %v1832_v57 = vld [vmem:[#allocation4 + $0x21] sm:$0xff] }
 0x1d3   : > { %1705 = vst.msk [vmem:[#allocation3 + $0x58] sm:$0xff] %vm1693_vm7, %v1680_v56  ;;  %1850 = vrot.lane.b32.xlu0 %v1832_v57, %s4033_s23  ;;  %v1890_v59 = vld [vmem:[#allocation4 + $0x22] sm:$0xff] }
 0x1d4   : > { %v1939_v0 = vld [vmem:[#allocation4 + $0x23] sm:$0xff] }
 0x1d5   : > { %v1997_v17 = vld [vmem:[#allocation4 + $0x24] sm:$0xff] }
 0x1d7   : > { %1908 = vrot.lane.b32.xlu0 %v1890_v59, %s4034_s22 }
 0x1d8   : > { %v1730_v61 = vld [vmem:[#allocation3 + $0x48] ss:$2 sm:$0xff]  ;;  %v1762_v62 = vld [vmem:[#allocation3 + $0x49] ss:$2 sm:$0xff] }
 0x1d9   : > { %v1787_v1 = vmax.f32 %v1730_v61, %v1762_v62 }
 0x1da   : > { %v1732_v2 = vld [vmem:[#allocation3 + $0x58] ss:$2 sm:$0xf]  ;;  %v1764_v3 = vld [vmem:[#allocation3 + $0x59] ss:$2 sm:$0xf] }
 0x1db   : > { %v1364_v4 = vpop.f32.mrb[24].mxu0  ;;  %v1567_v5 = vpop.f32.mrb[24].mxu1  ;;  %1957 = vrot.lane.b32.xlu0 %v1939_v0, %s5221_s20  ;;  %v1788_v6 = vmax.f32 %v1732_v2, %v1764_v3  ;;  %1804 = vst.msk [vmem:[#allocation4 + $0x30] sm:$0xff] %vm1693_vm7, %v1787_v1 }
 0x1dc   : > { %v1626_v7 = vmax.f32 %v1364_v4, %v1567_v5  ;;  %v1569_v8 = vpop.f32.mrb[25].mxu1  ;;  %v1366_v9 = vpop.f32.mrb[25].mxu0 }
 0x1dd   : > { %v1367_v11 = vpop.f32.mrb[26].mxu0  ;;  %v1570_v12 = vpop.f32.mrb[26].mxu1  ;;  %1805 = vst.msk [vmem:[#allocation4 + $0x38] sm:$0xf] %vm1798_vm8, %v1788_v6 }
 0x1de   : > { %v1657_v13 = vadd.f32 %v4626_v55, %v1626_v7  ;;  %v1627_v14 = vmax.f32 %v1367_v11, %v1570_v12  ;;  %v1369_v15 = vpop.f32.mrb[27].mxu0  ;;  %v1572_v16 = vpop.f32.mrb[27].mxu1 }
 0x1df   : > { %2015 = vrot.lane.b32.xlu0 %v1997_v17, %s5222_s15 }
 0x1e0   : > { %v1681_v18 = vmax.f32 %v1657_v13, 0.0  ;;  %v1658_v19 = vadd.f32 %v4626_v55, %v1627_v14 }
 0x1e2   : > { %1706 = vst.msk [vmem:[#allocation3 + $0x60] sm:$0xff] %vm1693_vm7, %v1681_v18  ;;  %v1682_v21 = vmax.f32 %v1658_v19, 0.0  ;;  %v1817_v22 = vld [vmem:[#allocation4 + $0x30] sm:$0xff] }
 0x1e3   : > { %1825 = vst.msk [vmem:[#allocation5 + $0x48] sm:$0xff] %vm1693_vm7, %v1817_v22 }
 0x1e4   : > { %1707 = vst.msk [vmem:[#allocation3 + $0x68] sm:$0xff] %vm1693_vm7, %v1682_v21  ;;  %v1833_v23 = vld [vmem:[#allocation4 + $0x31] sm:$0xff] }
 0x1e5   : > { %1852 = vrot.lane.b32.xlu1 %v1833_v23, %s4033_s23  ;;  %v1891_v25 = vld [vmem:[#allocation4 + $0x32] sm:$0xff] }
 0x1e6   : > { %v1940_v36 = vld [vmem:[#allocation4 + $0x33] sm:$0xff] }
 0x1e7   : > { %v1998_v45 = vld [vmem:[#allocation4 + $0x34] sm:$0xff] }
 0x1e9   : > { %1910 = vrot.lane.b32.xlu1 %v1891_v25, %s4034_s22 }
 0x1ea   : > { %v1372_v26 = vpop.f32.mrb[28].mxu0  ;;  %v1575_v27 = vpop.f32.mrb[28].mxu1 }
 0x1eb   : > { %v1734_v29 = vld [vmem:[#allocation3 + $0x60] ss:$2 sm:$0xff]  ;;  %v1766_v30 = vld [vmem:[#allocation3 + $0x61] ss:$2 sm:$0xff]  ;;  %v1628_v31 = vmax.f32 %v1372_v26, %v1575_v27  ;;  %v1374_v32 = vpop.f32.mrb[29].mxu0  ;;  %v1577_v33 = vpop.f32.mrb[29].mxu1 }
 0x1ec   : > { %v1375_v34 = vpop.f32.mrb[30].mxu0  ;;  %v1578_v35 = vpop.f32.mrb[30].mxu1  ;;  %v1789_v37 = vmax.f32 %v1734_v29, %v1766_v30 }
 0x1ed   : > { %v1659_v39 = vadd.f32 %v4626_v55, %v1628_v31  ;;  %v1629_v40 = vmax.f32 %v1375_v34, %v1578_v35  ;;  %v1580_v41 = vpop.f32.mrb[31].mxu1  ;;  %1959 = vrot.lane.b32.xlu1 %v1940_v36, %s5221_s20  ;;  %v1377_v42 = vpop.f32.mrb[31].mxu0 }
 0x1ee   : > { %1806 = vst.msk [vmem:[#allocation4 + $0x40] sm:$0xff] %vm1693_vm7, %v1789_v37 }
 0x1ef   : > { %v1683_v43 = vmax.f32 %v1659_v39, 0.0  ;;  %v1660_v44 = vadd.f32 %v4626_v55, %v1629_v40 }
 0x1f1   : > { %1708 = vst.msk [vmem:[#allocation3 + $0x70] sm:$0xff] %vm1693_vm7, %v1683_v43  ;;  %v1684_v46 = vmax.f32 %v1660_v44, 0.0  ;;  %2017 = vrot.lane.b32.xlu1 %v1998_v45, %s5222_s15 }
 0x1f3   : > { %1709 = vst.msk [vmem:[#allocation3 + $0x78] sm:$0xff] %vm1693_vm7, %v1684_v46 }
 0x1f5   : > { %v1818_v47 = vld [vmem:[#allocation4 + $0x40] sm:$0xff] }
 0x1f6   : > { %1826 = vst.msk [vmem:[#allocation5 + $0x60] sm:$0xff] %vm1693_vm7, %v1818_v47 }
 0x1f8   : > { %v1736_v48 = vld [vmem:[#allocation3 + $0x70] ss:$2 sm:$0xf]  ;;  %v1768_v49 = vld [vmem:[#allocation3 + $0x71] ss:$2 sm:$0xf] }
 0x1f9   : > { %v1790_v50 = vmax.f32 %v1736_v48, %v1768_v49 }
 0x1fa   : > { %v1380_v51 = vpop.f32.mrb[32].mxu0  ;;  %v1583_v52 = vpop.f32.mrb[32].mxu1 }
 0x1fb   : > { %v1630_v53 = vmax.f32 %v1380_v51, %v1583_v52  ;;  %v1382_v54 = vpop.f32.mrb[33].mxu0  ;;  %v1585_v56 = vpop.f32.mrb[33].mxu1  ;;  %1807 = vst.msk [vmem:[#allocation4 + $0x48] sm:$0xf] %vm1798_vm8, %v1790_v50 }
 0x1fc   : > { %v1383_v57 = vpop.f32.mrb[34].mxu0  ;;  %v1586_v58 = vpop.f32.mrb[34].mxu1 }
 0x1fd   : > { %v1661_v59 = vadd.f32 %v4626_v55, %v1630_v53  ;;  %v1631_v60 = vmax.f32 %v1383_v57, %v1586_v58  ;;  %v1385_v61 = vpop.f32.mrb[35].mxu0  ;;  %v1588_v62 = vpop.f32.mrb[35].mxu1 }
 0x1ff   : > { %v1685_v63 = vmax.f32 %v1661_v59, 0.0  ;;  %v1662_v0 = vadd.f32 %v4626_v55, %v1631_v60 }
 0x201   : > { %1710 = vst.msk [vmem:[#allocation3 + $0x80] sm:$0xff] %vm1693_vm7, %v1685_v63  ;;  %v1686_v1 = vmax.f32 %v1662_v0, 0.0 }
 0x202   : > { %v1834_v2 = vld [vmem:[#allocation4 + $0x41] sm:$0xff] }
 0x203   : > { %1711 = vst.msk [vmem:[#allocation3 + $0x88] sm:$0xff] %vm1693_vm7, %v1686_v1  ;;  %1854 = vrot.lane.b32.xlu0 %v1834_v2, %s4033_s23  ;;  %v1892_v3 = vld [vmem:[#allocation4 + $0x42] sm:$0xff] }
 0x204   : > { %v1941_v6 = vld [vmem:[#allocation4 + $0x43] sm:$0xff] }
 0x207   : > { %1912 = vrot.lane.b32.xlu0 %v1892_v3, %s4034_s22 }
 0x208   : > { %v1738_v4 = vld [vmem:[#allocation3 + $0x78] ss:$2 sm:$0xff]  ;;  %v1770_v5 = vld [vmem:[#allocation3 + $0x79] ss:$2 sm:$0xff] }
 0x209   : > { %v1791_v7 = vmax.f32 %v1738_v4, %v1770_v5 }
 0x20a   : > { %v1740_v8 = vld [vmem:[#allocation3 + $0x88] ss:$2 sm:$0xf]  ;;  %v1772_v9 = vld [vmem:[#allocation3 + $0x89] ss:$2 sm:$0xf] }
 0x20b   : > { %v1388_v10 = vpop.f32.mrb[36].mxu0  ;;  %v1591_v11 = vpop.f32.mrb[36].mxu1  ;;  %1961 = vrot.lane.b32.xlu0 %v1941_v6, %s5221_s20  ;;  %v1792_v12 = vmax.f32 %v1740_v8, %v1772_v9  ;;  %1808 = vst.msk [vmem:[#allocation4 + $0x50] sm:$0xff] %vm1693_vm7, %v1791_v7  ;;  %v3907_v9 = vld [vmem:[%s5198_s5 + $0x40] sm:$0xff]  }
 0x20c   : > { %v1632_v13 = vmax.f32 %v1388_v10, %v1591_v11  ;;  %v1593_v14 = vpop.f32.mrb[37].mxu1  ;;  %v1390_v15 = vpop.f32.mrb[37].mxu0  ;;  %3644 = vmatprep.subr.bf16.mxu0 %v3907_v9  ;;  %v3926_v9 = vld [vmem:[%s5198_s5 + $0xa0] sm:$0xff]  }
 0x20d   : > { %v1391_v16 = vpop.f32.mrb[38].mxu0  ;;  %v1594_v17 = vpop.f32.mrb[38].mxu1  ;;  %1809 = vst.msk [vmem:[#allocation4 + $0x58] sm:$0xf] %vm1798_vm8, %v1792_v12 }
 0x20e   : > { %v1663_v18 = vadd.f32 %v4626_v55, %v1632_v13  ;;  %v1633_v19 = vmax.f32 %v1391_v16, %v1594_v17  ;;  %v1393_v20 = vpop.f32.mrb[39].mxu0  ;;  %v1596_v21 = vpop.f32.mrb[39].mxu1 }
 0x210   : > { %v1687_v22 = vmax.f32 %v1663_v18, 0.0  ;;  %v1664_v23 = vadd.f32 %v4626_v55, %v1633_v19  ;;  %v3908_v19 = vld [vmem:[%s5198_s5] sm:$0xff]  }
 0x212   : > { %1712 = vst.msk [vmem:[#allocation3 + $0x90] sm:$0xff] %vm1693_vm7, %v1687_v22  ;;  %v1688_v24 = vmax.f32 %v1664_v23, 0.0  ;;  %v1819_v25 = vld [vmem:[#allocation4 + $0x50] sm:$0xff]  ;;  %v3909_v22 = vld [vmem:[%s5198_s5 + $0x48] sm:$0xff]  }
 0x213   : > { %1827 = vst.msk [vmem:[#allocation5 + $0x78] sm:$0xff] %vm1693_vm7, %v1819_v25 }
 0x214   : > { %1713 = vst.msk [vmem:[#allocation3 + $0x98] sm:$0xff] %vm1693_vm7, %v1688_v24  ;;  %v1835_v26 = vld [vmem:[#allocation4 + $0x51] sm:$0xff] }
 0x215   : > { %v1847_v27 = vpop.permute.xlu0 %1846  ;;  %1856 = vrot.lane.b32.xlu1 %v1835_v26, %s4033_s23  ;;  %v1893_v28 = vld [vmem:[#allocation4 + $0x52] sm:$0xff] }
 0x216   : > { %1871 = vst.msk [vmem:[#allocation5] sm:$0xff] %vm1870_vm10, %v1847_v27  ;;  %v1942_v39 = vld [vmem:[#allocation4 + $0x53] sm:$0xff] }
 0x217   : > { %1873 = vst.msk [vmem:[#allocation5 + $0x8] sm:$0xff] %vm1872_vm11, %v1847_v27 }
 0x219   : > { %v1905_v29 = vpop.permute.xlu0 %1904  ;;  %1914 = vrot.lane.b32.xlu1 %v1893_v28, %s4034_s22 }
 0x21a   : > { %1929 = vst.msk [vmem:[#allocation5 + $0x8] sm:$0xff] %vm1928_vm12, %v1905_v29  ;;  %v1396_v30 = vpop.f32.mrb[40].mxu0  ;;  %v1599_v31 = vpop.f32.mrb[40].mxu1  ;;  %v3910_v29 = vld [vmem:[%s5198_s5 + $0x8] sm:$0xff]  }
 0x21b   : > { %v1742_v32 = vld [vmem:[#allocation3 + $0x90] ss:$2 sm:$0xff]  ;;  %v1774_v33 = vld [vmem:[#allocation3 + $0x91] ss:$2 sm:$0xff]  ;;  %v1634_v34 = vmax.f32 %v1396_v30, %v1599_v31  ;;  %v1398_v35 = vpop.f32.mrb[41].mxu0  ;;  %v1601_v36 = vpop.f32.mrb[41].mxu1 }
 0x21c   : > { %v1399_v37 = vpop.f32.mrb[42].mxu0  ;;  %v1602_v38 = vpop.f32.mrb[42].mxu1  ;;  %v1793_v40 = vmax.f32 %v1742_v32, %v1774_v33  ;;  %v4829_v30 = vld [vmem:[%s5198_s5 + $0x80] sm:$0xff]   ;;  %v3911_v32 = vld [vmem:[%s5198_s5 + $0x50] sm:$0xff]   ;;  %v3913_v36 = vld [vmem:[%s5198_s5 + $0x58] sm:$0xff]  }
 0x21d   : > { %v1665_v41 = vadd.f32 %v4626_v55, %v1634_v34  ;;  %v1635_v42 = vmax.f32 %v1399_v37, %v1602_v38  ;;  %v1604_v43 = vpop.f32.mrb[43].mxu1  ;;  %v1954_v44 = vpop.permute.xlu0 %1953  ;;  %1963 = vrot.lane.b32.xlu1 %v1942_v39, %s5221_s20  ;;  %v2044_v17 = vld [vmem:[#allocation5] sm:$0xff]  ;;  %3755 = vmatprep.subr.bf16.mxu1 %v4829_v30  ;;  %v3912_v33 = vld [vmem:[%s5198_s5 + $0x10] sm:$0xff]   ;;  %v3915_v39 = vld [vmem:[%s5198_s5 + $0x18] sm:$0xff]  }
 0x21e   : > { %1978 = vst.msk [vmem:[#allocation5 + $0x8] sm:$0xff] %vm1977_vm13, %v1954_v44  ;;  %v1401_v45 = vpop.f32.mrb[43].mxu0  ;;  %v1999_v31 = vld [vmem:[#allocation4 + $0x44] sm:$0xff] }
 0x21f   : > { %1980 = vst.msk [vmem:[#allocation5 + $0x10] sm:$0xff] %vm1979_vm14, %v1954_v44  ;;  %v1689_v46 = vmax.f32 %v1665_v41, 0.0  ;;  %v1666_v47 = vadd.f32 %v4626_v55, %v1635_v42  ;;  %v3918_v43 = vld [vmem:[%s5198_s5 + $0x20] sm:$0xff]   ;;  %v3919_v44 = vld [vmem:[%s5198_s5 + $0x68] sm:$0xff]  }
 0x220   : > { %1810 = vst.msk [vmem:[#allocation4 + $0x60] sm:$0xff] %vm1693_vm7, %v1793_v40  ;;  %v3916_v40 = vld [vmem:[%s5198_s5 + $0x60] sm:$0xff]  }
 0x221   : > { %1714 = vst.msk [vmem:[#allocation3 + $0xa0] sm:$0xff] %vm1693_vm7, %v1689_v46  ;;  %v1690_v48 = vmax.f32 %v1666_v47, 0.0  ;;  %v2012_v49 = vpop.permute.xlu0 %2011  ;;  %v3921_v47 = vld [vmem:[%s5198_s5 + $0x28] sm:$0xff]  }
 0x222   : > { %2036 = vst.msk [vmem:[#allocation5 + $0x10] sm:$0xff] %vm2035_vm15, %v2012_v49 }
 0x223   : > { %1715 = vst.msk [vmem:[#allocation3 + $0xa8] sm:$0xff] %vm1693_vm7, %v1690_v48  ;;  %v3922_v48 = vld [vmem:[%s5198_s5 + $0x70] sm:$0xff]  }
 0x225   : > { %v2045_v11 = vld [vmem:[#allocation5 + $0x8] sm:$0xff] }
 0x227   : > { %v1820_v50 = vld [vmem:[#allocation4 + $0x60] sm:$0xff] }
 0x228   : > { %1828 = vst.msk [vmem:[#allocation5 + $0x90] sm:$0xff] %vm1693_vm7, %v1820_v50  ;;  %v1744_v51 = vld [vmem:[#allocation3 + $0xa0] ss:$2 sm:$0xf]  ;;  %v1849_v53 = vpop.permute.xlu1 %1848  ;;  %v2000_v50 = vld [vmem:[#allocation4 + $0x54] sm:$0xff] }
 0x229   : > { %v1776_v52 = vld [vmem:[#allocation3 + $0xa1] ss:$2 sm:$0xf]  ;;  %1874 = vst.msk [vmem:[#allocation5 + $0x18] sm:$0xff] %vm1870_vm10, %v1849_v53  ;;  %v2046_v25 = vld [vmem:[#allocation5 + $0x10] sm:$0xff] }
 0x22a   : > { %1875 = vst.msk [vmem:[#allocation5 + $0x20] sm:$0xff] %vm1872_vm11, %v1849_v53  ;;  %v1794_v54 = vmax.f32 %v1744_v51, %v1776_v52  ;;  %v1404_v56 = vpop.f32.mrb[44].mxu0  ;;  %v1607_v57 = vpop.f32.mrb[44].mxu1  ;;  %v3924_v51 = vld [vmem:[%s5198_s5 + $0x30] sm:$0xff]   ;;  %v3925_v52 = vld [vmem:[%s5198_s5 + $0x78] sm:$0xff]  }
 0x22b   : > { %v1636_v58 = vmax.f32 %v1404_v56, %v1607_v57  ;;  %v1609_v59 = vpop.f32.mrb[45].mxu1  ;;  %v1406_v60 = vpop.f32.mrb[45].mxu0 }
 0x22c   : > { %1811 = vst.msk [vmem:[#allocation4 + $0x68] sm:$0xf] %vm1798_vm8, %v1794_v54  ;;  %v1907_v61 = vpop.permute.xlu1 %1906  ;;  %v1407_v62 = vpop.f32.mrb[46].mxu0  ;;  %v3927_v54 = vld [vmem:[%s5198_s5 + $0x38] sm:$0xff]  }
 0x22d   : > { %v1667_v63 = vadd.f32 %v4626_v55, %v1636_v58  ;;  %1930 = vst.msk [vmem:[#allocation5 + $0x20] sm:$0xff] %vm1928_vm12, %v1907_v61  ;;  %v1610_v0 = vpop.f32.mrb[46].mxu1  ;;  %v1409_v1 = vpop.f32.mrb[47].mxu0 }
 0x22e   : > { %v1637_v2 = vmax.f32 %v1407_v62, %v1610_v0  ;;  %v1612_v3 = vpop.f32.mrb[47].mxu1 }
 0x22f   : > { %v1691_v4 = vmax.f32 %v1667_v63, 0.0 }
 0x230   : > { %v1668_v5 = vadd.f32 %v4626_v55, %v1637_v2  ;;  %v1956_v6 = vpop.permute.xlu1 %1955  ;;  %v2047_v12 = vld [vmem:[#allocation5 + $0x18] sm:$0xff] }
 0x231   : > { %1716 = vst.msk [vmem:[#allocation3 + $0xb0] sm:$0xff] %vm1693_vm7, %v1691_v4  ;;  %v4812_v20 = vpack.c.bf16 %v2047_v12, %v2044_v17  ;;  %v3929_v12 = vld [vmem:[%s5198_s5 + $0xb0] ss:$0 sps:$4 sm:$0xff]  }
 0x232   : > { %1981 = vst.msk [vmem:[#allocation5 + $0x20] sm:$0xff] %vm1977_vm13, %v1956_v6  ;;  %v1692_v7 = vmax.f32 %v1668_v5, 0.0  ;;  %v3917_v5 = vld [vmem:[%s5198_s5 + $0x88] sm:$0xff]  }
 0x233   : > { %1982 = vst.msk [vmem:[#allocation5 + $0x28] sm:$0xff] %vm1979_vm14, %v1956_v6  ;;  %v1836_v8 = vld [vmem:[#allocation4 + $0x61] sm:$0xff]  ;;  %v3920_v6 = vld [vmem:[%s5198_s5 + $0x90] sm:$0xff]  }
 0x234   : > { %1858 = vrot.lane.b32.xlu0 %v1836_v8, %s4033_s23  ;;  %1717 = vst.msk [vmem:[#allocation3 + $0xb8] sm:$0xff] %vm1693_vm7, %v1692_v7  ;;  %v2014_v10 = vpop.permute.xlu1 %2013  ;;  %v1894_v55 = vld [vmem:[#allocation4 + $0x62] sm:$0xff]  ;;  %v3923_v7 = vld [vmem:[%s5198_s5 + $0x98] sm:$0xff]  }
 0x235   : > { %2037 = vst.msk [vmem:[#allocation5 + $0x28] sm:$0xff] %vm2035_vm15, %v2014_v10  ;;  %v1943_v21 = vld [vmem:[#allocation4 + $0x63] sm:$0xff] }
 0x236   : > { %v2001_v34 = vld [vmem:[#allocation4 + $0x64] sm:$0xff] }
 0x238   : > { %1916 = vrot.lane.b32.xlu0 %v1894_v55, %s4034_s22  ;;  %v1746_v13 = vld [vmem:[#allocation3 + $0xa8] ss:$2 sm:$0xff]  ;;  %v1778_v14 = vld [vmem:[#allocation3 + $0xa9] ss:$2 sm:$0xff] }
 0x239   : > { %v2048_v15 = vld [vmem:[#allocation5 + $0x20] sm:$0xff]  ;;  %v1795_v18 = vmax.f32 %v1746_v13, %v1778_v14  ;;  %v3928_v55 = vld [vmem:[%s5198_s5 + $0xa8] sm:$0xff]   ;;  %v2588_v13 = vsel %vm2273_vm9, %v3929_v12, 0 }
 0x23a   : > { %v4807_v16 = vpack.c.bf16 %v2048_v15, %v2045_v11 }
 0x23b   : > { %v1748_v23 = vld [vmem:[#allocation3 + $0xb8] ss:$2 sm:$0xf]  ;;  %v1780_v24 = vld [vmem:[#allocation3 + $0xb9] ss:$2 sm:$0xf] }
 0x23c   : > { %2309 = vmatprep.mubr.bf16.mxu0 %v4807_v16  ;;  %1965 = vrot.lane.b32.xlu0 %v1943_v21, %s5221_s20  ;;  %1812 = vst.msk [vmem:[#allocation4 + $0x70] sm:$0xff] %vm1693_vm7, %v1795_v18  ;;  %v2049_v26 = vld [vmem:[#allocation5 + $0x28] sm:$0xff]  ;;  %v1796_v27 = vmax.f32 %v1748_v23, %v1780_v24 }
 0x23d   : > { %2310 = vmatmul.mubr.bf16.vlgmr.msra.gmra.mrb[48].mxu0 %v4812_v20  ;;  %v4821_v28 = vpack.c.bf16 %v2049_v26, %v2046_v25 }
 0x23e   : > { %3645 = vmatpush3.bf16.msra.mxu0 %v3908_v19  ;;  %1813 = vst.msk [vmem:[#allocation4 + $0x78] sm:$0xf] %vm1798_vm8, %v1796_v27  ;;  %vm2811_vm8 = vcmask 1047559  }
 0x23f   : > { %3646 = vmatprep.subr.bf16.mxu0 %v3909_v22  ;;  %3747 = vmatprep.mubr.msk.bf16.mxu1 %vm2260_vm0, %v4821_v28 }
 0x240   : > { %2019 = vrot.lane.b32.xlu0 %v1999_v31, %s5222_s15 }
 0x242   : > { %3647 = vmatpush3.bf16.msra.mxu0 %v3910_v29 }
 0x243   : > { %v1821_v35 = vld [vmem:[#allocation4 + $0x70] sm:$0xff]  ;;  %3648 = vmatprep.subr.bf16.mxu0 %v3911_v32 }
 0x244   : > { %2023 = vrot.lane.b32.xlu0 %v2001_v34, %s5222_s15  ;;  %1829 = vst.msk [vmem:[#allocation5 + $0xa8] sm:$0xff] %vm1693_vm7, %v1821_v35  ;;  %vm2808_vm7 = vcmask 1046534  }
 0x245   : > { %v1851_v37 = vpop.permute.xlu0 %1850  ;;  %v1837_v38 = vld [vmem:[#allocation4 + $0x71] sm:$0xff] }
 0x246   : > { %3649 = vmatpush3.bf16.msra.mxu0 %v3912_v33  ;;  %1876 = vst.msk [vmem:[#allocation5 + $0x30] sm:$0xff] %vm1870_vm10, %v1851_v37  ;;  %1860 = vrot.lane.b32.xlu1 %v1837_v38, %s4033_s23  ;;  %v1895_v42 = vld [vmem:[#allocation4 + $0x72] sm:$0xff]  ;;  %s3375_s23 = scalar_lea.sflag [#allocation9], %s434_s16 }
 0x247   : > { %1877 = vst.msk [vmem:[#allocation5 + $0x38] sm:$0xff] %vm1872_vm11, %v1851_v37  ;;  %3650 = vmatprep.subr.bf16.mxu0 %v3913_v36  ;;  %v1944_v46 = vld [vmem:[#allocation4 + $0x73] sm:$0xff] }
 0x248   : > { %v2002_v53 = vld [vmem:[#allocation4 + $0x74] sm:$0xff] }
 0x249   : > { %v1909_v41 = vpop.permute.xlu0 %1908 }
 0x24a   : > { %3651 = vmatpush3.bf16.msra.mxu0 %v3915_v39  ;;  %1931 = vst.msk [vmem:[#allocation5 + $0x38] sm:$0xff] %vm1928_vm12, %v1909_v41  ;;  %1918 = vrot.lane.b32.xlu1 %v1895_v42, %s4034_s22  ;;  %s3451_s22 = sshll.u32 %s434_s16, 3 }
 0x24b   : > { %3652 = vmatprep.subr.bf16.mxu0 %v3916_v40  ;;  %s436_s27 = scalar_lea.vmem [#allocation8], %s3451_s22  ;;  %s3968_s22 = sshll.u32 %s4040_s29, 4  ;;  %s3969_s22 = int_to_ptr.vmem [resolvable:$false] %s3968_s22 }
 0x24c   : > { %s3388_s24 = sshll.u32 %s436_s27, 4  ;;  %s3970_s0 = scalar_lea.vmem %s3969_s22, 256  ;;  %s5152_s24 = int_to_ptr.vmem [resolvable:$true] %s3388_s24 }
 0x24d   : > { %v1958_v45 = vpop.permute.xlu0 %1957  ;;  %v2050_v0 = vld [vmem:[#allocation5 + $0x30] sm:$0xff]  ;;  %p3971_p0 = scmp.lt.s32.totalorder %s5152_s24, %s3969_s22 }
 0x24e   : > { %3653 = vmatpush3.bf16.msra.mxu0 %v3918_v43  ;;  %1983 = vst.msk [vmem:[#allocation5 + $0x38] sm:$0xff] %vm1977_vm13, %v1958_v45  ;;  %1967 = vrot.lane.b32.xlu1 %v1944_v46, %s5221_s20  ;;  %s5150_s20 = scalar_lea.hbm %s5206_s13, %s3589_s21 }
 0x24f   : > { %1984 = vst.msk [vmem:[#allocation5 + $0x40] sm:$0xff] %vm1979_vm14, %v1958_v45  ;;  %3654 = vmatprep.subr.bf16.mxu0 %v3919_v44 }
 0x251   : > { %v2016_v49 = vpop.permute.xlu0 %2015 }
 0x252   : > { %3655 = vmatpush3.bf16.msra.mxu0 %v3921_v47  ;;  %2038 = vst.msk [vmem:[#allocation5 + $0x40] sm:$0xff] %vm2035_vm15, %v2016_v49  ;;  %2021 = vrot.lane.b32.xlu1 %v2000_v50, %s5222_s15 }
 0x253   : > { %3656 = vmatprep.subr.bf16.mxu0 %v3922_v48 }
 0x255   : > { %v2051_v61 = vld [vmem:[#allocation5 + $0x38] sm:$0xff] }
 0x256   : > { %3657 = vmatpush3.bf16.msra.mxu0 %v3924_v51  ;;  %2025 = vrot.lane.b32.xlu1 %v2002_v53, %s5222_s15  ;;  %s3964_s15 = scalar_lea.vmem %s5152_s24, 128 }
 0x257   : > { %3658 = vmatprep.subr.bf16.mxu0 %v3925_v52  ;;  %v1853_v56 = vpop.permute.xlu1 %1852  ;;  %p3965_p11 = scmp.ne.s32.totalorder %s5152_s24, %s3964_s15  ;;  %p3972_p1 = scmp.lt.s32.totalorder %s3970_s0, %s3964_s15 }
 0x258   : > { %1878 = vst.msk [vmem:[#allocation5 + $0x48] sm:$0xff] %vm1870_vm10, %v1853_v56 }
 0x259   : > { %1879 = vst.msk [vmem:[#allocation5 + $0x50] sm:$0xff] %vm1872_vm11, %v1853_v56  ;;  %v2052_v2 = vld [vmem:[#allocation5 + $0x40] sm:$0xff]  ;;  %p3966_p12 = pnand %p3965_p11, %p4149_p5  ;;  %p3973_p2 = por %p3972_p1, %p3971_p0 }
 0x25a   : > { %3659 = vmatpush3.bf16.msra.mxu0 %v3927_v54 }
 0x25b   : > { %v1911_v57 = vpop.permute.xlu1 %1910  ;;  %p3967_p13 = pneg %p3966_p12 }
 0x25c   : > { %1932 = vst.msk [vmem:[#allocation5 + $0x50] sm:$0xff] %vm1928_vm12, %v1911_v57 }
 0x25d   : > { %p3974_p3 = pnand %p3973_p2, %p3967_p13 }
 0x25f   : > { %v1960_v58 = vpop.permute.xlu1 %1959  ;;  %v2053_v60 = vld [vmem:[#allocation5 + $0x48] sm:$0xff] }
 0x260   : > { %1985 = vst.msk [vmem:[#allocation5 + $0x50] sm:$0xff] %vm1977_vm13, %v1960_v58  ;;  %v4893_v1 = vpack.c.bf16 %v2053_v60, %v2050_v0 }
 0x261   : > { %1986 = vst.msk [vmem:[#allocation5 + $0x58] sm:$0xff] %vm1979_vm14, %v1960_v58 }
 0x263   : > { %v2018_v59 = vpop.permute.xlu1 %2017 }
 0x264   : > { %2039 = vst.msk [vmem:[#allocation5 + $0x58] sm:$0xff] %vm2035_vm15, %v2018_v59 }
 0x267   : > { %v2054_v62 = vld [vmem:[#allocation5 + $0x50] sm:$0xff] }
 0x268   : > { %v4891_v63 = vpack.c.bf16 %v2054_v62, %v2051_v61 }
 0x26a   : > { %2317 = vmatprep.mubr.bf16.mxu0 %v4891_v63 }
 0x26b   : > { %2318 = vmatmul.mubr.bf16.gmra.mrb[52].mxu0 %v4893_v1  ;;  %v2055_v3 = vld [vmem:[#allocation5 + $0x58] sm:$0xff] }
 0x26c   : > { %v4897_v4 = vpack.c.bf16 %v2055_v3, %v2052_v2  ;;  %v3930_v2 = vld [vmem:[%s5200_s7 + $0x40] sm:$0xff]  }
 0x26d   : > { %v3931_v3 = vld [vmem:[%s5200_s7] sm:$0xff]  }
 0x26e   : > { %3748 = vmatmul.mubr.msk.bf16.vlgmr.msra.gmra.mrb[48].mxu1 %vm2260_vm0, %v4897_v4 }
 0x26f   : > { %3756 = vmatpush3.bf16.msra.mxu1 %v4829_v30 }
 0x270   : > { %3757 = vmatprep.subr.bf16.mxu1 %v3917_v5 }
 0x273   : > { %3758 = vmatpush3.bf16.msra.mxu1 %v3917_v5  ;;  %v3933_v5 = vld [vmem:[%s5200_s7 + $0x8] sm:$0xff]  }
 0x274   : > { %3759 = vmatprep.subr.bf16.mxu1 %v3920_v6 }
 0x275   : > { %v1855_v8 = vpop.permute.xlu0 %1854 }
 0x276   : > { %1880 = vst.msk [vmem:[#allocation5 + $0x60] sm:$0xff] %vm1870_vm10, %v1855_v8 }
 0x277   : > { %1881 = vst.msk [vmem:[#allocation5 + $0x68] sm:$0xff] %vm1872_vm11, %v1855_v8  ;;  %3760 = vmatpush3.bf16.msra.mxu1 %v3920_v6  ;;  %v3934_v6 = vld [vmem:[%s5200_s7 + $0x50] sm:$0xff]   ;;  %v3936_v8 = vld [vmem:[%s5200_s7 + $0x58] sm:$0xff]  }
 0x278   : > { %3761 = vmatprep.subr.bf16.mxu1 %v3923_v7 }
 0x279   : > { %v1913_v10 = vpop.permute.xlu0 %1912 }
 0x27a   : > { %1933 = vst.msk [vmem:[#allocation5 + $0x68] sm:$0xff] %vm1928_vm12, %v1913_v10  ;;  %v3938_v10 = vld [vmem:[%s5200_s7 + $0x60] sm:$0xff]  }
 0x27b   : > { %3762 = vmatpush3.bf16.msra.mxu1 %v3923_v7  ;;  %v3935_v7 = vld [vmem:[%s5200_s7 + $0x10] sm:$0xff]  }
 0x27c   : > { %3763 = vmatprep.subr.bf16.mxu1 %v3926_v9 }
 0x27d   : > { %v1962_v11 = vpop.permute.xlu0 %1961  ;;  %v2056_v23 = vld [vmem:[#allocation5 + $0x60] sm:$0xff] }
 0x27e   : > { %1987 = vst.msk [vmem:[#allocation5 + $0x68] sm:$0xff] %vm1977_vm13, %v1962_v11 }
 0x27f   : > { %1988 = vst.msk [vmem:[#allocation5 + $0x70] sm:$0xff] %vm1979_vm14, %v1962_v11  ;;  %3764 = vmatpush3.bf16.msra.mxu1 %v3926_v9  ;;  %v3937_v9 = vld [vmem:[%s5200_s7 + $0x18] sm:$0xff]   ;;  %v3940_v11 = vld [vmem:[%s5200_s7 + $0x68] sm:$0xff]  }
 0x280   : > { %3765 = vmatprep.subr.bf16.mxu1 %v3928_v55 }
 0x283   : > { %3766 = vmatpush3.bf16.msra.mxu1 %v3928_v55  ;;  %v3939_v55 = vld [vmem:[%s5200_s7 + $0x20] sm:$0xff]  }
 0x284   : > { %3814 = vmatprep.subr.msk.bf16.mxu1 %vm2273_vm9, %v3929_v12 }
 0x285   : > { %v2057_v19 = vld [vmem:[#allocation5 + $0x68] sm:$0xff] }
 0x287   : > { %v1857_v14 = vpop.permute.xlu1 %1856  ;;  %3768 = vmatpush3.bf16.msra.mxu1 %v2588_v13 }
 0x288   : > { %1882 = vst.msk [vmem:[#allocation5 + $0x78] sm:$0xff] %vm1870_vm10, %v1857_v14  ;;  %3695 = vmatprep.subr.bf16.mxu1 %v3930_v2 }
 0x289   : > { %1883 = vst.msk [vmem:[#allocation5 + $0x80] sm:$0xff] %vm1872_vm11, %v1857_v14 }
 0x28b   : > { %v1915_v15 = vpop.permute.xlu1 %1914 }
 0x28c   : > { %1934 = vst.msk [vmem:[#allocation5 + $0x80] sm:$0xff] %vm1928_vm12, %v1915_v15 }
 0x28f   : > { %v1964_v17 = vpop.permute.xlu1 %1963  ;;  %v2059_v18 = vld [vmem:[#allocation5 + $0x78] sm:$0xff] }
 0x290   : > { %1989 = vst.msk [vmem:[#allocation5 + $0x80] sm:$0xff] %vm1977_vm13, %v1964_v17  ;;  %v2074_v24 = vpack.c.bf16 %v2059_v18, %v2056_v23 }
 0x291   : > { %1990 = vst.msk [vmem:[#allocation5 + $0x88] sm:$0xff] %vm1979_vm14, %v1964_v17 }
 0x297   : > { %v2060_v21 = vld [vmem:[#allocation5 + $0x80] sm:$0xff] }
 0x298   : > { %v2075_v22 = vpack.c.bf16 %v2060_v21, %v2057_v19 }
 0x29a   : > { %2325 = vmatprep.mubr.bf16.mxu0 %v2075_v22 }
 0x29b   : > { %2326 = vmatmul.mubr.bf16.gmra.mrb[56].mxu0 %v2074_v24 }
 0x2a6   : > { %v1859_v25 = vpop.permute.xlu0 %1858 }
 0x2a7   : > { %1884 = vst.msk [vmem:[#allocation5 + $0x90] sm:$0xff] %vm1870_vm10, %v1859_v25 }
 0x2a8   : > { %1885 = vst.msk [vmem:[#allocation5 + $0x98] sm:$0xff] %vm1872_vm11, %v1859_v25 }
 0x2aa   : > { %v1917_v26 = vpop.permute.xlu0 %1916 }
 0x2ab   : > { %1935 = vst.msk [vmem:[#allocation5 + $0x98] sm:$0xff] %vm1928_vm12, %v1917_v26 }
 0x2ae   : > { %v1966_v27 = vpop.permute.xlu0 %1965  ;;  %v2062_v40 = vld [vmem:[#allocation5 + $0x90] sm:$0xff] }
 0x2af   : > { %1991 = vst.msk [vmem:[#allocation5 + $0x98] sm:$0xff] %vm1977_vm13, %v1966_v27 }
 0x2b0   : > { %1992 = vst.msk [vmem:[#allocation5 + $0xa0] sm:$0xff] %vm1979_vm14, %v1966_v27 }
 0x2b2   : > { %v2020_v29 = vpop.permute.xlu0 %2019 }
 0x2b3   : > { %2040 = vst.msk [vmem:[#allocation5 + $0x70] sm:$0xff] %vm2035_vm15, %v2020_v29 }
 0x2b6   : > { %v2024_v30 = vpop.permute.xlu0 %2023  ;;  %v2063_v37 = vld [vmem:[#allocation5 + $0x98] sm:$0xff] }
 0x2b7   : > { %2042 = vst.msk [vmem:[#allocation5 + $0xa0] sm:$0xff] %vm2035_vm15, %v2024_v30 }
 0x2b8   : > { %v1861_v31 = vpop.permute.xlu1 %1860 }
 0x2b9   : > { %1886 = vst.msk [vmem:[#allocation5 + $0xa8] sm:$0xff] %vm1870_vm10, %v1861_v31  ;;  %vm2864_vm10 = vcmask 1048064  }
 0x2ba   : > { %1887 = vst.msk [vmem:[#allocation5 + $0xb0] sm:$0xff] %vm1872_vm11, %v1861_v31  ;;  %v2058_v42 = vld [vmem:[#allocation5 + $0x70] sm:$0xff]  ;;  %vm4039_vm11 = vmmov 0  }
 0x2bc   : > { %v1919_v32 = vpop.permute.xlu1 %1918 }
 0x2bd   : > { %1936 = vst.msk [vmem:[#allocation5 + $0xb0] sm:$0xff] %vm1928_vm12, %v1919_v32  ;;  %vm3316_vm12 = vcmask 1041408  }
 0x2be   : > { %v2064_v45 = vld [vmem:[#allocation5 + $0xa0] sm:$0xff] }
 0x2c0   : > { %v1968_v33 = vpop.permute.xlu1 %1967  ;;  %v2065_v35 = vld [vmem:[#allocation5 + $0xa8] sm:$0xff] }
 0x2c1   : > { %1993 = vst.msk [vmem:[#allocation5 + $0xb0] sm:$0xff] %vm1977_vm13, %v1968_v33  ;;  %v2077_v41 = vpack.c.bf16 %v2065_v35, %v2062_v40  ;;  %vm3312_vm13 = vcmask 687104  }
 0x2c2   : > { %1994 = vst.msk [vmem:[#allocation5 + $0xb8] sm:$0xff] %vm1979_vm14, %v1968_v33  ;;  %vm3360_vm14 = vcmask 80896  }
 0x2c4   : > { %v2022_v34 = vpop.permute.xlu1 %2021 }
 0x2c5   : > { %2041 = vst.msk [vmem:[#allocation5 + $0x88] sm:$0xff] %vm2035_vm15, %v2022_v34 }
 0x2c8   : > { %v2026_v36 = vpop.permute.xlu1 %2025  ;;  %v2066_v38 = vld [vmem:[#allocation5 + $0xb0] sm:$0xff] }
 0x2c9   : > { %2043 = vst.msk [vmem:[#allocation5 + $0xb8] sm:$0xff] %vm2035_vm15, %v2026_v36  ;;  %v2078_v39 = vpack.c.bf16 %v2066_v38, %v2063_v37 }
 0x2cb   : > { %2333 = vmatprep.mubr.bf16.mxu0 %v2078_v39 }
 0x2cc   : > { %2334 = vmatmul.mubr.bf16.gmra.mrb[60].mxu0 %v2077_v41  ;;  %v2061_v43 = vld [vmem:[#allocation5 + $0x88] sm:$0xff] }
 0x2cd   : > { %2622 = vmatprep.mubr.bf16.mxu0 %v4807_v16  ;;  %v2076_v44 = vpack.c.bf16 %v2061_v43, %v2058_v42 }
 0x2cf   : > { %3751 = vmatprep.mubr.msk.bf16.mxu1 %vm2260_vm0, %v2076_v44 }
 0x2d0   : > { %v2067_v46 = vld [vmem:[#allocation5 + $0xb8] sm:$0xff] }
 0x2d1   : > { %v2079_v47 = vpack.c.bf16 %v2067_v46, %v2064_v45 }
 0x2d3   : > { %3752 = vmatmul.mubr.msk.bf16.gmra.mrb[52].mxu1 %vm2260_vm0, %v2079_v47 }
 0x2d4   : > { %2623 = vmatmul.mubr.bf16.vlgmr.msra.gmra.mrb[64].mxu0 %v4812_v20  ;;  %3769 = vmatprep.mubr.msk.bf16.mxu1 %vm2260_vm0, %v4821_v28 }
 0x2d5   : > { %2630 = vmatprep.mubr.bf16.mxu0 %v4891_v63 }
 0x2db   : > { %3770 = vmatmul.mubr.msk.bf16.vlgmr.msra.gmra.mrb[56].mxu1 %vm2260_vm0, %v4897_v4  ;;  %v3932_v4 = vld [vmem:[%s5200_s7 + $0x48] sm:$0xff]  }
 0x2dc   : > { %2631 = vmatmul.mubr.bf16.gmra.mrb[68].mxu0 %v4893_v1  ;;  %3773 = vmatprep.mubr.msk.bf16.mxu1 %vm2260_vm0, %v2076_v44 }
 0x2dd   : > { %2638 = vmatprep.mubr.bf16.mxu0 %v2075_v22  ;;  %3696 = vmatpush3.bf16.msra.mxu1 %v3931_v3 }
 0x2de   : > { %3697 = vmatprep.subr.bf16.mxu1 %v3932_v4 }
 0x2e1   : > { %3698 = vmatpush3.bf16.msra.mxu1 %v3933_v5 }
 0x2e2   : > { %3699 = vmatprep.subr.bf16.mxu1 %v3934_v6 }
 0x2e3   : > { %3774 = vmatmul.mubr.msk.bf16.gmra.mrb[60].mxu1 %vm2260_vm0, %v2079_v47  ;;  %v5006_v47 = vld [vmem:[%s5199_s6] ss:$0 sm:$0xff] }
 0x2e4   : > { %2639 = vmatmul.mubr.bf16.gmra.mrb[72].mxu0 %v2074_v24 }
 0x2e5   : > { %2646 = vmatprep.mubr.bf16.mxu0 %v2078_v39  ;;  %3700 = vmatpush3.bf16.msra.mxu1 %v3935_v7 }
 0x2e6   : > { %3701 = vmatprep.subr.bf16.mxu1 %v3936_v8 }
 0x2e9   : > { %3702 = vmatpush3.bf16.msra.mxu1 %v3937_v9 }
 0x2ea   : > { %3703 = vmatprep.subr.bf16.mxu1 %v3938_v10 }
 0x2ec   : > { %2647 = vmatmul.mubr.bf16.gmra.mrb[76].mxu0 %v2077_v41 }
 0x2ed   : > { %3704 = vmatpush3.bf16.msra.mxu1 %v3939_v55 }
 0x2ee   : > { %3705 = vmatprep.subr.bf16.mxu1 %v3940_v11 }
 0x310   : > { %v3609_v16 = vpop.f32.mrb[48].mxu0 }
 0x311   : > { %v3610_v20 = vpop.f32.mrb[49].mxu0 }
 0x312   : > { %v3611_v48 = vadd.f32 %v3610_v20, %v3609_v16  ;;  %v3612_v49 = vpop.f32.mrb[50].mxu0 }
 0x313   : > { %v3613_v28 = vpop.f32.mrb[51].mxu0 }
 0x314   : > { %v3614_v50 = vadd.f32 %v3613_v28, %v3612_v49 }
 0x33e   : > { %v3615_v51 = vpop.f32.mrb[52].mxu0 }
 0x33f   : > { %v3616_v52 = vpop.f32.mrb[53].mxu0 }
 0x340   : > { %v3617_v53 = vadd.f32 %v3616_v52, %v3615_v51  ;;  %v3618_v54 = vpop.f32.mrb[54].mxu0 }
 0x341   : > { %v3619_v56 = vpop.f32.mrb[55].mxu0  ;;  %v3749_v57 = vpop.f32.mrb[48].mxu1 }
 0x342   : > { %v3620_v58 = vadd.f32 %v3619_v56, %v3618_v54  ;;  %v4958_v59 = vadd.f32 %v3749_v57, %v3617_v53  ;;  %v2376_v60 = vpop.f32.mrb[49].mxu1 }
 0x343   : > { %v4960_v61 = vadd.f32 %v3611_v48, %v2376_v60  ;;  %v3750_v62 = vpop.f32.mrb[50].mxu1 }
 0x344   : > { %v4962_v63 = vadd.f32 %v3750_v62, %v3620_v58  ;;  %v2379_v0 = vpop.f32.mrb[51].mxu1 }
 0x345   : > { %v4964_v1 = vadd.f32 %v3614_v50, %v2379_v0 }
 0x36e   : > { %v3621_v12 = vpop.f32.mrb[56].mxu0 }
 0x36f   : > { %v3622_v13 = vpop.f32.mrb[57].mxu0 }
 0x370   : > { %v3623_v14 = vadd.f32 %v3622_v13, %v3621_v12  ;;  %v3624_v15 = vpop.f32.mrb[58].mxu0 }
 0x371   : > { %v3625_v17 = vpop.f32.mrb[59].mxu0 }
 0x372   : > { %v3626_v18 = vadd.f32 %v3625_v17, %v3624_v15 }
 0x39f   : > { %v3627_v19 = vpop.f32.mrb[60].mxu0 }
 0x3a0   : > { %v3628_v21 = vpop.f32.mrb[61].mxu0 }
 0x3a1   : > { %v3629_v22 = vadd.f32 %v3628_v21, %v3627_v19  ;;  %v3630_v23 = vpop.f32.mrb[62].mxu0 }
 0x3a2   : > { %v3631_v24 = vpop.f32.mrb[63].mxu0 }
 0x3a3   : > { %v3632_v25 = vadd.f32 %v3631_v24, %v3630_v23 }
 0x3a6   : > { %v3753_v26 = vpop.f32.mrb[52].mxu1 }
 0x3a7   : > { %v4999_v27 = vadd.f32 %v3753_v26, %v3629_v22  ;;  %v2392_v29 = vpop.f32.mrb[53].mxu1  ;;  %v3660_v30 = vpop.f32.mrb[64].mxu0 }
 0x3a8   : > { %v2393_v31 = vadd.f32 %v3623_v14, %v2392_v29  ;;  %v3754_v32 = vpop.f32.mrb[54].mxu1  ;;  %v3661_v33 = vpop.f32.mrb[65].mxu0 }
 0x3a9   : > { %v5001_v34 = vadd.f32 %v3754_v32, %v3632_v25  ;;  %v3662_v35 = vadd.f32 %v3661_v33, %v3660_v30  ;;  %v2395_v36 = vpop.f32.mrb[55].mxu1  ;;  %v3663_v37 = vpop.f32.mrb[66].mxu0 }
 0x3aa   : > { %v2396_v38 = vadd.f32 %v3626_v18, %v2395_v36  ;;  %v3664_v39 = vpop.f32.mrb[67].mxu0 }
 0x3ab   : > { %v3665_v40 = vadd.f32 %v3664_v39, %v3663_v37 }
 0x3ae   : > { %v3771_v41 = vpop.f32.mrb[56].mxu1 }
 0x3af   : > { %v3666_v42 = vpop.f32.mrb[68].mxu0  ;;  %v2689_v43 = vpop.f32.mrb[57].mxu1 }
 0x3b0   : > { %v2690_v44 = vadd.f32 %v3662_v35, %v2689_v43  ;;  %v3667_v45 = vpop.f32.mrb[69].mxu0  ;;  %v3772_v46 = vpop.f32.mrb[58].mxu1 }
 0x3b1   : > { %v3668_v16 = vadd.f32 %v3667_v45, %v3666_v42  ;;  %v3669_v20 = vpop.f32.mrb[70].mxu0  ;;  %v2692_v48 = vpop.f32.mrb[59].mxu1 }
 0x3b2   : > { %v2720_v49 = vmax.f32 %v4960_v61, %v2690_v44  ;;  %v2693_v28 = vadd.f32 %v3665_v40, %v2692_v48  ;;  %v3670_v50 = vpop.f32.mrb[71].mxu0 }
 0x3b3   : > { %v2698_v51 = vadd.f32 %v3771_v41, %v3668_v16  ;;  %v3671_v52 = vadd.f32 %v3670_v50, %v3669_v20 }
 0x3b4   : > { %v2735_v53 = vadd.f32 %v5006_v47, %v2720_v49  ;;  %v2721_v54 = vmax.f32 %v4964_v1, %v2693_v28 }
 0x3b5   : > { %v2722_v56 = vmax.f32 %v4958_v59, %v2698_v51  ;;  %v2701_v57 = vadd.f32 %v3772_v46, %v3671_v52 }
 0x3b6   : > { %v2743_v58 = vmax.f32 %v2735_v53, 0.0  ;;  %v2736_v60 = vadd.f32 %v5006_v47, %v2721_v54  ;;  %v3775_v62 = vpop.f32.mrb[60].mxu1 }
 0x3b7   : > { %v2737_v0 = vadd.f32 %v5006_v47, %v2722_v56  ;;  %v2723_v61 = vmax.f32 %v4962_v63, %v2701_v57  ;;  %v3672_v2 = vpop.f32.mrb[72].mxu0  ;;  %v2705_v3 = vpop.f32.mrb[61].mxu1 }
 0x3b8   : > { %2752 = vst.msk [vmem:[#allocation6] sm:$0xff] %vm2751_vm1, %v2743_v58  ;;  %v2744_v4 = vmax.f32 %v2736_v60, 0.0  ;;  %v3673_v5 = vpop.f32.mrb[73].mxu0  ;;  %v3776_v6 = vpop.f32.mrb[62].mxu1 }
 0x3b9   : > { %v2745_v1 = vmax.f32 %v2737_v0, 0.0  ;;  %v2738_v7 = vadd.f32 %v5006_v47, %v2723_v61  ;;  %v3674_v59 = vadd.f32 %v3673_v5, %v3672_v2  ;;  %v3675_v8 = vpop.f32.mrb[74].mxu0  ;;  %v2708_v9 = vpop.f32.mrb[63].mxu1 }
 0x3ba   : > { %2753 = vst.msk [vmem:[#allocation6 + $0x8] sm:$0xff] %vm2751_vm1, %v2744_v4  ;;  %v3676_v10 = vpop.f32.mrb[75].mxu0 }
 0x3bb   : > { %2754 = vst.msk [vmem:[#allocation6 + $0x10] sm:$0xff] %vm2751_vm1, %v2745_v1  ;;  %v2746_v55 = vmax.f32 %v2738_v7, 0.0  ;;  %v2706_v63 = vadd.f32 %v3674_v59, %v2705_v3  ;;  %v3677_v11 = vadd.f32 %v3676_v10, %v3675_v8 }
 0x3bd   : > { %2755 = vst.msk [vmem:[#allocation6 + $0x18] sm:$0xff] %vm2751_vm1, %v2746_v55  ;;  %v2724_v12 = vmax.f32 %v2393_v31, %v2706_v63  ;;  %v2709_v13 = vadd.f32 %v3677_v11, %v2708_v9 }
 0x3bf   : > { %v2739_v14 = vadd.f32 %v5006_v47, %v2724_v12  ;;  %v2725_v15 = vmax.f32 %v2396_v38, %v2709_v13  ;;  %v3678_v17 = vpop.f32.mrb[76].mxu0  ;;  %v2914_v36 = vld [vmem:[#allocation6 + $0x6] sm:$0x1]  ;;  %v2922_v39 = vld [vmem:[#allocation6 + $0x7] sm:$0x1] }
 0x3c0   : > { %v3679_v18 = vpop.f32.mrb[77].mxu0  ;;  %v2815_v45 = vld [vmem:[#allocation6 + $0x2] sm:$0x1]  ;;  %v2823_v16 = vld [vmem:[#allocation6 + $0x3] sm:$0x1] }
 0x3c1   : > { %v2747_v19 = vmax.f32 %v2739_v14, 0.0  ;;  %v2740_v21 = vadd.f32 %v5006_v47, %v2725_v15  ;;  %v3680_v22 = vadd.f32 %v3679_v18, %v3678_v17  ;;  %v3681_v23 = vpop.f32.mrb[78].mxu0  ;;  %v2915_v24 = vld [vmem:[#allocation6 + $0xe] sm:$0x1]  ;;  %v2923_v25 = vld [vmem:[#allocation6 + $0xf] sm:$0x1]  ;;  %v2831_v59 = vmax.f32 %v2815_v45, %v2823_v16 }
 0x3c2   : > { %v3682_v26 = vpop.f32.mrb[79].mxu0  ;;  %v2916_v29 = vld [vmem:[#allocation6 + $0x16] sm:$0x1]  ;;  %v2924_v30 = vld [vmem:[#allocation6 + $0x17] sm:$0x1]  ;;  %v2931_v32 = vmax.f32 %v2915_v24, %v2923_v25 }
 0x3c3   : > { %2756 = vst.msk [vmem:[#allocation6 + $0x20] sm:$0xff] %vm2751_vm1, %v2747_v19  ;;  %v2748_v31 = vmax.f32 %v2740_v21, 0.0  ;;  %v2714_v33 = vadd.f32 %v3775_v62, %v3680_v22  ;;  %v3683_v35 = vadd.f32 %v3682_v26, %v3681_v23  ;;  %v2816_v37 = vld [vmem:[#allocation6 + $0xa] sm:$0x1]  ;;  %v2932_v41 = vmax.f32 %v2916_v29, %v2924_v30  ;;  %v2817_v46 = vld [vmem:[#allocation6 + $0x12] sm:$0x1] }
 0x3c4   : > { %v2917_v38 = vld [vmem:[#allocation6 + $0x1e] sm:$0x1]  ;;  %v2925_v40 = vld [vmem:[#allocation6 + $0x1f] sm:$0x1]  ;;  %v2824_v20 = vld [vmem:[#allocation6 + $0xb] sm:$0x1] }
 0x3c5   : > { %2757 = vst.msk [vmem:[#allocation6 + $0x28] sm:$0xff] %vm2751_vm1, %v2748_v31  ;;  %v2726_v42 = vmax.f32 %v4999_v27, %v2714_v33  ;;  %v2717_v43 = vadd.f32 %v3776_v6, %v3683_v35  ;;  %v2933_v44 = vmax.f32 %v2917_v38, %v2925_v40  ;;  %v2946_v48 = vrot.slane %v2931_v32, 7  ;;  %v2818_v49 = vld [vmem:[#allocation6 + $0x1a] sm:$0x1]  ;;  %v2825_v28 = vld [vmem:[#allocation6 + $0x13] sm:$0x1] }
 0x3c6   : > { %v2832_v50 = vmax.f32 %v2816_v37, %v2824_v20  ;;  %v2826_v53 = vld [vmem:[#allocation6 + $0x1b] sm:$0x1]  ;;  %v2867_v54 = vld [vmem:[#allocation6 + $0xc] sm:$0x1]  ;;  %v2868_v56 = vld [vmem:[#allocation6 + $0x14] sm:$0x1]  ;;  %v2930_v27 = vmax.f32 %v2914_v36, %v2922_v39  ;;  %v2833_v58 = vmax.f32 %v2817_v46, %v2825_v28 }
 0x3c7   : > { %v2741_v51 = vadd.f32 %v5006_v47, %v2726_v42  ;;  %v2727_v52 = vmax.f32 %v5001_v34, %v2717_v43  ;;  %v2948_v57 = vrot.slane %v2932_v41, 6  ;;  %v2875_v62 = vld [vmem:[#allocation6 + $0xd] sm:$0x1]  ;;  %v2876_v0 = vld [vmem:[#allocation6 + $0x15] sm:$0x1]  ;;  %v2950_v3 = vrot.slane %v2933_v44, 5 }
 0x3c8   : > { %v2847_v60 = vrot.slane %v2832_v50, 7  ;;  %v2869_v4 = vld [vmem:[#allocation6 + $0x1c] sm:$0x1]  ;;  %v2877_v5 = vld [vmem:[#allocation6 + $0x1d] sm:$0x1]  ;;  %v2947_v34 = vsel %vm2793_vm2, %v2946_v48, %v2930_v27  ;;  %v2834_v8 = vmax.f32 %v2818_v49, %v2826_v53  ;;  %v2883_v9 = vmax.f32 %v2867_v54, %v2875_v62  ;;  %v3941_v44 = vld [vmem:[%s5200_s7 + $0x28] sm:$0xff]  }
 0x3c9   : > { %v2749_v61 = vmax.f32 %v2741_v51, 0.0  ;;  %v2742_v2 = vadd.f32 %v5006_v47, %v2727_v52  ;;  %v2849_v11 = vrot.slane %v2833_v58, 6  ;;  %v2884_v12 = vmax.f32 %v2868_v56, %v2876_v0  ;;  %v2866_v47 = vld [vmem:[#allocation6 + $0x4] sm:$0x1]  ;;  %v2874_v39 = vld [vmem:[#allocation6 + $0x5] sm:$0x1]  ;;  %3706 = vmatpush3.bf16.msra.mxu1 %v3941_v44 }
 0x3ca   : > { %v2918_v6 = vld [vmem:[#allocation6 + $0x26] sm:$0x1]  ;;  %v2926_v1 = vld [vmem:[#allocation6 + $0x27] sm:$0x1]  ;;  %v2819_v7 = vld [vmem:[#allocation6 + $0x22] sm:$0x1]  ;;  %v2848_v18 = vsel %vm2793_vm2, %v2847_v60, %v2831_v59  ;;  %v2885_v19 = vmax.f32 %v2869_v4, %v2877_v5  ;;  %v2949_v22 = vsel %vm2796_vm3, %v2948_v57, %v2947_v34  ;;  %v2882_v43 = vmax.f32 %v2866_v47, %v2874_v39 }
 0x3cb   : > { %2758 = vst.msk [vmem:[#allocation6 + $0x30] sm:$0xff] %vm2751_vm1, %v2749_v61  ;;  %v2750_v10 = vmax.f32 %v2742_v2, 0.0  ;;  %v2934_v55 = vmax.f32 %v2918_v6, %v2926_v1  ;;  %v2827_v63 = vld [vmem:[#allocation6 + $0x23] sm:$0x1]  ;;  %v2870_v25 = vld [vmem:[#allocation6 + $0x24] sm:$0x1]  ;;  %v2850_v33 = vsel %vm2796_vm3, %v2849_v11, %v2848_v18  ;;  %v2951_v40 = vsel %vm2799_vm4, %v2950_v3, %v2949_v22 }
 0x3cc   : > { %v2919_v13 = vld [vmem:[#allocation6 + $0x2e] sm:$0x1]  ;;  %v2927_v14 = vld [vmem:[#allocation6 + $0x2f] sm:$0x1]  ;;  %v2820_v15 = vld [vmem:[#allocation6 + $0x2a] sm:$0x1]  ;;  %v2835_v17 = vmax.f32 %v2819_v7, %v2827_v63 }
 0x3cd   : > { %2759 = vst.msk [vmem:[#allocation6 + $0x38] sm:$0xff] %vm2751_vm1, %v2750_v10  ;;  %v2935_v21 = vmax.f32 %v2919_v13, %v2927_v14  ;;  %v2952_v23 = vrot.slane %v2934_v55, 4  ;;  %v2828_v24 = vld [vmem:[#allocation6 + $0x2b] sm:$0x1]  ;;  %v2851_v29 = vrot.slane %v2834_v8, 5  ;;  %v2898_v31 = vrot.slane %v2883_v9, 7 }
 0x3ce   : > { %v2836_v26 = vmax.f32 %v2820_v15, %v2828_v24  ;;  %v2871_v30 = vld [vmem:[#allocation6 + $0x2c] sm:$0x1]  ;;  %v2878_v32 = vld [vmem:[#allocation6 + $0x25] sm:$0x1]  ;;  %v2853_v35 = vrot.slane %v2835_v17, 4  ;;  %v2900_v38 = vrot.slane %v2884_v12, 6 }
 0x3cf   : > { %v2879_v36 = vld [vmem:[#allocation6 + $0x2d] sm:$0x1]  ;;  %v2886_v37 = vmax.f32 %v2870_v25, %v2878_v32  ;;  %v2954_v41 = vrot.slane %v2935_v21, 3  ;;  %v2902_v42 = vrot.slane %v2885_v19, 5  ;;  %v2953_v45 = vsel %vm2802_vm5, %v2952_v23, %v2951_v40  ;;  %v3942_v48 = vld [vmem:[%s5200_s7 + $0x70] sm:$0xff]   ;;  %v3944_v32 = vld [vmem:[%s5200_s7 + $0x78] sm:$0xff]  }
 0x3d0   : > { %v2855_v46 = vrot.slane %v2836_v26, 3  ;;  %v2887_v16 = vmax.f32 %v2871_v30, %v2879_v36  ;;  %v2852_v51 = vsel %vm2799_vm4, %v2851_v29, %v2850_v33  ;;  %v2899_v52 = vsel %vm2793_vm2, %v2898_v31, %v2882_v43  ;;  %3707 = vmatprep.subr.bf16.mxu1 %v3942_v48  ;;  %v2761_v5 = vld [vmem:[#allocation6 + $0x8] sm:$0x1]  ;;  %v2762_v6 = vld [vmem:[#allocation6 + $0x10] sm:$0x1]  ;;  %v3945_v39 = vld [vmem:[%s5200_s7 + $0x38] sm:$0xff]  }
 0x3d1   : > { %v2904_v20 = vrot.slane %v2886_v37, 4  ;;  %v2854_v56 = vsel %vm2802_vm5, %v2853_v35, %v2852_v51  ;;  %v2901_v58 = vsel %vm2796_vm3, %v2900_v38, %v2899_v52  ;;  %v2955_v0 = vsel %vm2805_vm6, %v2954_v41, %v2953_v45  ;;  %v2763_v10 = vld [vmem:[#allocation6 + $0x18] sm:$0x1]  ;;  %v2764_v13 = vld [vmem:[#allocation6 + $0x20] sm:$0x1]  ;;  %v3943_v22 = vld [vmem:[%s5200_s7 + $0x30] sm:$0xff]  }
 0x3d2   : > { %v2920_v49 = vld [vmem:[#allocation6 + $0x36] sm:$0x1]  ;;  %v2928_v28 = vld [vmem:[#allocation6 + $0x37] sm:$0x1]  ;;  %v2821_v50 = vld [vmem:[#allocation6 + $0x32] sm:$0x1]  ;;  %v2903_v4 = vsel %vm2799_vm4, %v2902_v42, %v2901_v58  ;;  %v2856_v63 = vsel %vm2805_vm6, %v2855_v46, %v2854_v56  ;;  %3708 = vmatpush3.bf16.msra.mxu1 %v3943_v22 }
 0x3d3   : > { %v2936_v53 = vmax.f32 %v2920_v49, %v2928_v28  ;;  %v2829_v54 = vld [vmem:[#allocation6 + $0x33] sm:$0x1]  ;;  %v2872_v27 = vld [vmem:[#allocation6 + $0x34] sm:$0x1]  ;;  %v2880_v57 = vld [vmem:[#allocation6 + $0x35] sm:$0x1]  ;;  %v2905_v9 = vsel %vm2802_vm5, %v2904_v20, %v2903_v4  ;;  %3709 = vmatprep.subr.bf16.mxu1 %v3944_v32 }
 0x3d4   : > { %v2921_v60 = vld [vmem:[#allocation6 + $0x3e] sm:$0x1]  ;;  %v2929_v62 = vld [vmem:[#allocation6 + $0x3f] sm:$0x1]  ;;  %v2822_v61 = vld [vmem:[#allocation6 + $0x3a] sm:$0x1]  ;;  %v2837_v2 = vmax.f32 %v2821_v50, %v2829_v54  ;;  %v2888_v3 = vmax.f32 %v2872_v27, %v2880_v57 }
 0x3d5   : > { %v2937_v1 = vmax.f32 %v2921_v60, %v2929_v62  ;;  %v2956_v34 = vrot.slane %v2936_v53, 2  ;;  %v2830_v7 = vld [vmem:[#allocation6 + $0x3b] sm:$0x1]  ;;  %v2873_v59 = vld [vmem:[#allocation6 + $0x3c] sm:$0x1]  ;;  %v2906_v8 = vrot.slane %v2887_v16, 3 }
 0x3d6   : > { %v2838_v55 = vmax.f32 %v2822_v61, %v2830_v7  ;;  %v2857_v11 = vrot.slane %v2837_v2, 2  ;;  %v2881_v12 = vld [vmem:[#allocation6 + $0x3d] sm:$0x1]  ;;  %v2908_v47 = vrot.slane %v2888_v3, 2  ;;  %v2765_v19 = vld [vmem:[#allocation6 + $0x28] sm:$0x1]  ;;  %3710 = vmatpush3.bf16.msra.mxu1 %v3945_v39 }
 0x3d7   : > { %v2957_v14 = vsel %vm2808_vm7, %v2956_v34, %v2955_v0  ;;  %v2958_v15 = vrot.slane %v2937_v1, 1  ;;  %v2889_v17 = vmax.f32 %v2873_v59, %v2881_v12  ;;  %v2907_v18 = vsel %vm2805_vm6, %v2906_v8, %v2905_v9  ;;  %v2766_v21 = vld [vmem:[#allocation6 + $0x30] sm:$0x1]  ;;  %v2767_v26 = vld [vmem:[#allocation6 + $0x38] sm:$0x1]  ;;  %v3946_v51 = vld [vmem:[%s5202_s9] sm:$0xff]  }
 0x3d8   : > { %v2858_v23 = vsel %vm2808_vm7, %v2857_v11, %v2856_v63  ;;  %v2859_v24 = vrot.slane %v2838_v55, 1  ;;  %v2909_v25 = vsel %vm2808_vm7, %v2908_v47, %v2907_v18  ;;  %v2769_v29 = vld [vmem:[#allocation6 + $0x9] sm:$0x1]  ;;  %v2770_v30 = vld [vmem:[#allocation6 + $0x11] sm:$0x1]  ;;  %v4038_v58 = vmov 0.0  }
 0x3d9   : > { %v2959_v31 = vsel %vm2811_vm8, %v2958_v15, %v2957_v14  ;;  %v2910_v33 = vrot.slane %v2889_v17, 1  ;;  %v2771_v35 = vld [vmem:[#allocation6 + $0x19] sm:$0x1]  ;;  %v2772_v36 = vld [vmem:[#allocation6 + $0x21] sm:$0x1]  ;;  %v2777_v37 = vmax.f32 %v2761_v5, %v2769_v29  ;;  %v2778_v38 = vmax.f32 %v2762_v6, %v2770_v30  ;;  %3777 = vmatprep.subr.bf16.mxu0 %v4038_v58  ;;  %3797 = vmatprep.subr.bf16.mxu1 %v4038_v58  ;;  %v3947_v0 = vld [vmem:[%s5202_s9 + $0x8] sm:$0xff]  }
 0x3da   : > { %2960 = vrot.lane.b32.xlu0 %v2959_v31, %s4037_s30  ;;  %v2860_v40 = vsel %vm2811_vm8, %v2859_v24, %v2858_v23  ;;  %v2773_v41 = vld [vmem:[#allocation6 + $0x29] sm:$0x1]  ;;  %v2774_v42 = vld [vmem:[#allocation6 + $0x31] sm:$0x1]  ;;  %v2775_v43 = vld [vmem:[#allocation6 + $0x39] sm:$0x1]  ;;  %v2779_v44 = vmax.f32 %v2763_v10, %v2771_v35  ;;  %v2780_v45 = vmax.f32 %v2764_v13, %v2772_v36  ;;  %3778 = vmatpush3.bf16.msra.mxu0 %v3946_v51 }
 0x3db   : > { %2861 = vrot.lane.b32.xlu1 %v2860_v40, %s4037_s30  ;;  %v2911_v46 = vsel %vm2811_vm8, %v2910_v33, %v2909_v25  ;;  %v2781_v16 = vmax.f32 %v2765_v19, %v2773_v41  ;;  %v2760_v20 = vld [vmem:[#allocation6] sm:$0x1]  ;;  %v2768_v48 = vld [vmem:[#allocation6 + $0x1] sm:$0x1]  ;;  %v2782_v49 = vmax.f32 %v2766_v21, %v2774_v42  ;;  %v2792_v28 = vrot.slane %v2777_v37, 7  ;;  %3779 = vmatprep.subr.bf16.mxu0 %v4038_v58  ;;  %v3948_v6 = vld [vmem:[%s5202_s9 + $0x10] sm:$0xff]  }
 0x3dc   : > { %2913 = vst.msk [vmem:[#allocation7 + $0x8] sm:$0xff] %vm2751_vm1, %v2911_v46  ;;  %v2795_v50 = vrot.slane %v2778_v38, 6  ;;  %v2783_v52 = vmax.f32 %v2767_v26, %v2775_v43  ;;  %v2798_v53 = vrot.slane %v2779_v44, 5  ;;  %v2776_v54 = vmax.f32 %v2760_v20, %v2768_v48  ;;  %v3949_v34 = vld [vmem:[%s5202_s9 + $0x18] sm:$0xff]   ;;  %v3950_v7 = vld [vmem:[%s5202_s9 + $0x20] sm:$0xff]   ;;  %v3951_v59 = vld [vmem:[%s5202_s9 + $0x28] sm:$0xff]   ;;  %3793 = vmatprep.mubr.msk.bf16.mxu0 %vm4039_vm11, %v4038_v58 }
 0x3dd   : > { %v2801_v56 = vrot.slane %v2780_v45, 4  ;;  %v2804_v27 = vrot.slane %v2781_v16, 3  ;;  %v2807_v60 = vrot.slane %v2782_v49, 2  ;;  %v3952_v12 = vld [vmem:[%s5202_s9 + $0x30] sm:$0xff]   ;;  %v3953_v47 = vld [vmem:[%s5202_s9 + $0x38] ss:$0 sps:$4 sm:$0xff]  }
 0x3de   : > { %v2794_v57 = vsel %vm2793_vm2, %v2792_v28, %v2776_v54  ;;  %v2810_v61 = vrot.slane %v2783_v52, 1  ;;  %3780 = vmatpush3.bf16.msra.mxu0 %v3947_v0  ;;  %v3954_v13 = vld [vmem:[%s5204_s11] sm:$0xff]   ;;  %v3217_v14 = vsel %vm2273_vm9, %v3953_v47, 0  ;;  %v3955_v15 = vld [vmem:[%s5204_s11 + $0x8] sm:$0xff]   ;;  %v3956_v17 = vld [vmem:[%s5204_s11 + $0x10] sm:$0xff]   ;;  %vm3212_vm9 = vcmask 982016  }
 0x3df   : > { %v2797_v62 = vsel %vm2796_vm3, %v2795_v50, %v2794_v57  ;;  %3781 = vmatprep.subr.bf16.mxu0 %v4038_v58  ;;  %v3957_v18 = vld [vmem:[%s5204_s11 + $0x18] sm:$0xff]   ;;  %v3553_v21 = vld [vmem:[%s5201_s8] ss:$0 sm:$0xff]  ;;  %v3959_v31 = vld [vmem:[%s5204_s11 + $0x28] ss:$0 sps:$4 sm:$0x33]  }
 0x3e0   : > { %v2800_v2 = vsel %vm2799_vm4, %v2798_v53, %v2797_v62  ;;  %v3958_v32 = vld [vmem:[%s5204_s11 + $0x20] sm:$0xff]   ;;  %v3318_v33 = vsel %vm3316_vm12, %v3959_v31, 0 }
 0x3e1   : > { %v2803_v3 = vsel %vm2802_vm5, %v2801_v56, %v2800_v2  ;;  %v3570_v35 = vld [vmem:[%s5203_s10] ss:$0 sm:$0xff] }
 0x3e2   : > { %v2806_v4 = vsel %vm2805_vm6, %v2804_v27, %v2803_v3  ;;  %3782 = vmatpush3.bf16.msra.mxu0 %v3948_v6  ;;  %v3580_v43 = vld [vmem:[%s5205_s12] ss:$0 sm:$0xff] }
 0x3e3   : > { %v2809_v5 = vsel %vm2808_vm7, %v2807_v60, %v2806_v4  ;;  %3783 = vmatprep.subr.bf16.mxu0 %v4038_v58 }
 0x3e4   : > { %v2812_v1 = vsel %vm2811_vm8, %v2810_v61, %v2809_v5 }
 0x3e5   : > { %2814 = vst.msk [vmem:[#allocation7] sm:$0xff] %vm2751_vm1, %v2812_v1 }
 0x3e6   : > { %3784 = vmatpush3.bf16.msra.mxu0 %v3949_v34 }
 0x3e7   : > { %3785 = vmatprep.subr.bf16.mxu0 %v4038_v58 }
 0x3ea   : > { %3786 = vmatpush3.bf16.msra.mxu0 %v3950_v7 }
 0x3eb   : > { %3787 = vmatprep.subr.bf16.mxu0 %v4038_v58 }
 0x3ee   : > { %3788 = vmatpush3.bf16.msra.mxu0 %v3951_v59 }
 0x3ef   : > { %3789 = vmatprep.subr.bf16.mxu0 %v4038_v58 }
 0x3f2   : > { %3790 = vmatpush3.bf16.msra.mxu0 %v3952_v12 }
 0x3f3   : > { %3791 = vmatprep.subr.bf16.mxu0 %v4038_v58 }
 0x3f6   : > { %3792 = vmatpush3.bf16.msra.mxu0 %v3217_v14 }
 0x44c   : > { %v2961_v8 = vpop.permute.xlu0 %2960 }
 0x44d   : > { %2963 = vst.msk [vmem:[#allocation7 + $0x8] sm:$0xff] %vm2864_vm10, %v2961_v8  ;;  %v2862_v9 = vpop.permute.xlu1 %2861 }
 0x44e   : > { %2865 = vst.msk [vmem:[#allocation7] sm:$0xff] %vm2864_vm10, %v2862_v9 }
 0x454   : > { %v2965_v10 = vld [vmem:[#allocation7 + $0x8] sm:$0xff] }
 0x455   : > { %v2967_v55 = vpack.c.bf16 %v2965_v10, %v2965_v10  ;;  %v2964_v63 = vld [vmem:[#allocation7] sm:$0xff] }
 0x456   : > { %v2966_v11 = vpack.c.bf16 %v2964_v63, %v2964_v63 }
 0x457   : > { %3135 = vmatprep.mubr.bf16.mxu1 %v2967_v55 }
 0x458   : > { %3136 = vmatmul.mubr.bf16.vlgmr.msra.gmra.mrb[64].mxu1 %v2966_v11 }
 0x459   : > { %3809 = vmatprep.mubr.msk.bf16.mxu1 %vm4039_vm11, %v4038_v58  ;;  %3798 = vmatpush3.bf16.msra.mxu1 %v3954_v13 }
 0x45a   : > { %3799 = vmatprep.subr.bf16.mxu1 %v4038_v58 }
 0x45d   : > { %3800 = vmatpush3.bf16.msra.mxu1 %v3955_v15 }
 0x45e   : > { %3801 = vmatprep.subr.bf16.mxu1 %v4038_v58 }
 0x461   : > { %3802 = vmatpush3.bf16.msra.mxu1 %v3956_v17 }
 0x462   : > { %3803 = vmatprep.subr.bf16.mxu1 %v4038_v58 }
 0x465   : > { %3804 = vmatpush3.bf16.msra.mxu1 %v3957_v18 }
 0x466   : > { %3805 = vmatprep.subr.bf16.mxu1 %v4038_v58 }
 0x469   : > { %3806 = vmatpush3.bf16.msra.mxu1 %v3958_v32 }
 0x46a   : > { %3807 = vmatprep.subr.bf16.mxu1 %v4038_v58 }
 0x46d   : > { %3808 = vmatpush3.bf16.msra.mxu1 %v3318_v33 }
 0x52b   : > { %v3711_v19 = vpop.f32.mrb[64].mxu1 }
 0x52c   : > { %v3712_v22 = vpop.f32.mrb[65].mxu1 }
 0x52d   : > { %v3713_v23 = vadd.f32 %v3712_v22, %v3711_v19  ;;  %v3714_v24 = vpop.f32.mrb[66].mxu1 }
 0x52e   : > { %v3715_v25 = vpop.f32.mrb[67].mxu1 }
 0x52f   : > { %v3138_v26 = vadd.f32 %v3713_v23, %v3553_v21 }
 0x531   : > { %v3143_v29 = vmax.f32 %v3138_v26, 0.0 }
 0x533   : > { %v3144_v30 = vpack.c.bf16 %v3143_v29, %v3143_v29 }
 0x535   : > { %3794 = vmatmul.mubr.msk.bf16.vlgmr.msra.gmra.mrb[80].mxu0 %vm3212_vm9, %v3144_v30 }
 0x608   : > { %v3253_v36 = vpop.f32.mrb[80].mxu0 }
 0x609   : > { %v3254_v37 = vadd.f32 %v3570_v35, %v3253_v36  ;;  %v3795_v38 = vpop.f32.mrb[81].mxu0 }
 0x60a   : > { %v3256_v39 = vpop.f32.mrb[82].mxu0 }
 0x60b   : > { %v3259_v40 = vmax.f32 %v3254_v37, 0.0  ;;  %v3796_v41 = vpop.f32.mrb[83].mxu0 }
 0x60d   : > { %v3260_v42 = vpack.c.bf16 %v3259_v40, %v3259_v40 }
 0x60f   : > { %3810 = vmatmul.mubr.msk.bf16.vlgmr.msra.gmra.mrb[68].mxu1 %vm3312_vm13, %v3260_v42 }
 0x6e2   : > { %v3354_v44 = vpop.f32.mrb[68].mxu1 }
 0x6e3   : > { %v3355_v45 = vadd.f32 %v3580_v43, %v3354_v44  ;;  %v3811_v46 = vpop.f32.mrb[69].mxu1 }
 0x6e4   : > { %v3357_v16 = vpop.f32.mrb[70].mxu1 }
 0x6e5   : > { %v3812_v20 = vpop.f32.mrb[71].mxu1  ;;  %v3361_v48 = vsel %vm3360_vm14, %v3355_v45, -inf }
 0x6e6   : > { %3362 = vmax.xlane.f32.xlu0 %v3361_v48 }
 0x773   : > { %v3363_v49 = vpop.xlane.xlu0 %3362 }
 0x774   : > { %v3364_v28 = vsub.f32 %v3355_v45, %v3363_v49 }
 0x776   : > { %v3365_v50 = vmul.f32 1.442695, %v3364_v28 }
 0x778   : > { %3960 = vpow2.f32 %v3365_v50 }
 0x782   : > { %v3961_v51 = vpop.eup %3960 }
 0x783   : > { %v3367_v52 = vsel %vm3360_vm14, %v3961_v51, 0.0 }
 0x784   : > { %3368 = vadd.xlane.f32.xlu1 %v3367_v52 }
 0x811   : > { %v3369_v53 = vpop.xlane.xlu1 %3368 }
 0x812   : > { %3962 = vlog2.f32 %v3369_v53 }
 0x81c   : > { %v3963_v54 = vpop.eup %3962 }
 0x81d   : > { %v3371_v56 = vmul.f32 0.6931472, %v3963_v54 }
 0x81f   : > { %v3372_v27 = vsub.f32 %v3364_v28, %v3371_v56 }
 0x821   : > { %3373 = vst.msk [vmem:[%s436_s27] sm:$0xff] %vm3360_vm14, %v3372_v27 }
 0x822   : > { %3977 = shalt.err (!%p3974_p3)
}
 0x823   : > { %s3978_s16 = scalar_lea.hbm %s5150_s20, 128  ;;  %s3982_s30 = scalar_lea.hbm %s5206_s13, 256 }
 0x824   : > { %p3979_p4 = scmp.ne.s32.totalorder %s5150_s20, %s3978_s16  ;;  %p3983_p9 = scmp.lt.u32.totalorder %s5150_s20, %s5206_s13 }
 0x825   : > { %p3984_p10 = scmp.lt.u32.totalorder %s3982_s30, %s3978_s16  ;;  %p3986_p12 = scmp.lt.u32.totalorder %s3978_s16, %s5150_s20 }
 0x826   : > { %p3980_p7 = pnand %p3979_p4, %p4149_p5 }
 0x827   : > { %p3985_p11 = por %p3984_p10, %p3983_p9 }
 0x828   : > { %p3981_p8 = pneg %p3980_p7 }
 0x829   : > { %p3987_p13 = por %p3986_p12, %p3985_p11 }
 0x82b   : > { %p3988_p0 = pnand %p3987_p13, %p3981_p8 }
 0x82d   : > { %3991 = shalt.err (!%p3988_p0)
}
 0x82e   : > { %3815 = dma.vmem_to_hbm [thread:$0]  (%p4149_p5), %s5152_s24, 128, %s5150_s20, %s3375_s23  }
 0x82f PF: > { %p3821_p1 = scmp.ge.s32.totalorder %s4026_s28, 2  ;;  %s3400_s0 = sand.u32 1, %s4014_s25  }
 0x830   : > { %s3401_s15 = scalar_lea.sflag [#allocation9], %s3400_s0 }
 0x831   : > { %p3818_p2 = pnand %p3821_p1, %p4153_p6 }
 0x833   : > { %4009 = dma.done.wait (!%p3818_p2), %s3401_s15, 128  }
 0x834   : > { %4011 = vsyncadd (!%p3818_p2), %s3401_s15, 4294967168  ;;  %s5223_s22 = sld [smem:[#allocation11_spill]]  ;;  %s5224_s27 = sld [smem:[#allocation12_spill]] }
 0x835   : > { %p23_p3 = scmp.ge.s32.totalorder %s4136_s14, 4   ;;  %s5225_s25 = smov %s4018_s26 }
 0x836   : > { %s5227_s28 = smov %s4136_s14 }
 0x837   :  { %25 = sbr.rel (!%p23_p3) target bundleno = 5 (0x5), region = 138 }
 0x83a   : > { %s5226_s26 = smov %s5223_s22 }
 0x83e   :  { %3406 = vsyncpa [#allocation9], 1 }
 0x83f   :  { %3408 = vsyncpa [#allocation9 + $0x1], 1 }

</bundles_post_ra>
